<compile_context>
chip_gen: v5e
topology: v5e:2x2
jax: 0.10.0
libtpu: 0.0.40
codegen_flags: <defaults>
</compile_context>

<pallas_src>
import functools

import jax
import jax.numpy as jnp
from jax import lax
from jax.experimental import pallas as pl
from jax.experimental.pallas import tpu as pltpu

IN_EPS = 1e-5  # nn.InstanceNorm2d default eps


def _round_up(x, m):
    return (x + m - 1) // m * m


def _cdiv(a, b):
    return (a + b - 1) // b


def _chip_vmem_capacity():
    try:
        cap = getattr(pltpu.get_tpu_info(), "vmem_capacity_bytes", None)
        if cap:
            return int(cap)
    except Exception:
        pass
    return 64 * 1024 * 1024  # conservative (v7x-sized) default


_VMEM_CAP = _chip_vmem_capacity()
VMEM_LIMIT = min(_VMEM_CAP * 3 // 4, 100 * 1024 * 1024)  # scoped-VMEM budget per pallas_call
ROW_TILE = 512 if _VMEM_CAP >= (96 << 20) else 256       # spatial rows per M tile
K_TILE = 2048 if _VMEM_CAP >= (96 << 20) else 1024       # max contraction block size


# ----------------------------------------------------------------------------- kernels


def _fused_conv_in_kernel(*refs, has_k, add_res, act, neg_slope, hw_valid, hw_pad, n_hw):
    """Fused Conv (im2col matmul) + InstanceNorm + activation (+ residual add).

    grid = (N, HW_tiles[, K_tiles]).  The conv result stays resident in a per-batch f32
    VMEM slab (y_acc); per-channel sum / sum-of-squares accumulate across the HW axis; the
    last HW (and K) step normalizes every tile and writes the lane-dense bf16 output block
    (which is resident across the HW/K axes, constant block index).
    """
    if add_res:
        p_ref, w_ref, b_ref, r_ref, o_ref, y_acc, ssum, ssq = refs
    else:
        p_ref, w_ref, b_ref, o_ref, y_acc, ssum, ssq = refs
        r_ref = None

    hw = pl.program_id(1)

    part = jnp.dot(p_ref[0], w_ref[...], preferred_element_type=jnp.float32)

    def stats_and_finalize(acc):
        y = acc + b_ref[...]                                  # (thw, Cp) conv + bias, f32
        y_acc[hw] = y
        row_sum = jnp.sum(y, axis=0, keepdims=True)           # (1, Cp)
        row_sq = jnp.sum(y * y, axis=0, keepdims=True)        # (1, Cp)

        @pl.when(hw == 0)
        def _():
            ssum[...] = row_sum
            ssq[...] = row_sq

        @pl.when(hw > 0)
        def _():
            ssum[...] = ssum[...] + row_sum
            ssq[...] = ssq[...] + row_sq

        @pl.when(hw == n_hw - 1)
        def _():
            # Padded HW rows hold exactly y == bias (their patch rows are zero), so the
            # statistics are corrected analytically instead of masking every step.
            bb = b_ref[...]
            npad = hw_pad - hw_valid
            s0 = ssum[...] - float(npad) * bb if npad else ssum[...]
            s1 = ssq[...] - float(npad) * (bb * bb) if npad else ssq[...]
            inv_n = 1.0 / float(hw_valid)
            mean = s0 * inv_n
            var = jnp.maximum(s1 * inv_n - mean * mean, 0.0)  # clamp f32 cancellation
            scale = lax.rsqrt(var + IN_EPS)

            def emit(t):
                yt = (y_acc[t] - mean) * scale
                if act == "relu":
                    yt = jnp.maximum(yt, 0.0)
                elif act == "lrelu":
                    yt = jnp.where(yt > 0, yt, neg_slope * yt)
                if add_res:
                    yt = yt + r_ref[0, t].astype(jnp.float32)
                o_ref[0, t] = yt.astype(o_ref.dtype)

            if n_hw == 1:
                emit(0)
            else:
                lax.fori_loop(0, n_hw, lambda t, c: (emit(t), c)[1], 0,
                              unroll=n_hw <= 8)

    if has_k:
        k = pl.program_id(2)

        @pl.when(k == 0)
        def _():
            y_acc[hw] = part

        @pl.when(k > 0)
        def _():
            y_acc[hw] = y_acc[hw] + part

        @pl.when(k == pl.num_programs(2) - 1)
        def _():
            stats_and_finalize(y_acc[hw])
    else:
        stats_and_finalize(part)


def _conv_stats_kernel(*refs, has_k, hw_valid, hw_pad):
    """Large-image fallback, pass 1: tiled conv matmul + bias, fused stats accumulation."""
    if has_k:
        p_ref, w_ref, b_ref, y_ref, s_ref, acc_ref = refs
    else:
        p_ref, w_ref, b_ref, y_ref, s_ref = refs
        acc_ref = None

    hw = pl.program_id(1)
    part = jnp.dot(p_ref[0], w_ref[...], preferred_element_type=jnp.float32)

    def emit(acc):
        y = acc + b_ref[...]
        y_ref[0] = y.astype(y_ref.dtype)
        row_sum = jnp.sum(y, axis=0, keepdims=True)
        row_sq = jnp.sum(y * y, axis=0, keepdims=True)

        @pl.when(hw == 0)
        def _():
            s_ref[0, 0:1, :] = row_sum
            s_ref[0, 1:2, :] = row_sq

        @pl.when(hw > 0)
        def _():
            s_ref[0, 0:1, :] = s_ref[0, 0:1, :] + row_sum
            s_ref[0, 1:2, :] = s_ref[0, 1:2, :] + row_sq

        npad = hw_pad - hw_valid
        if npad:
            @pl.when(hw == pl.num_programs(1) - 1)
            def _():
                bb = b_ref[...]
                s_ref[0, 0:1, :] = s_ref[0, 0:1, :] - float(npad) * bb
                s_ref[0, 1:2, :] = s_ref[0, 1:2, :] - float(npad) * (bb * bb)

    if has_k:
        k = pl.program_id(2)

        @pl.when(k == 0)
        def _():
            acc_ref[...] = part

        @pl.when(k > 0)
        def _():
            acc_ref[...] = acc_ref[...] + part

        @pl.when(k == pl.num_programs(2) - 1)
        def _():
            emit(acc_ref[...])
    else:
        emit(part)


def _norm_act_kernel(*refs, act, add_res, hw_valid, neg_slope):
    """Large-image fallback, pass 2: InstanceNorm apply + activation (+ residual add)."""
    if add_res:
        y_ref, s_ref, r_ref, o_ref = refs
    else:
        y_ref, s_ref, o_ref = refs
        r_ref = None

    y = y_ref[0].astype(jnp.float32)                          # (thw, Cp)
    inv_n = 1.0 / float(hw_valid)
    mean = s_ref[0, 0:1, :] * inv_n
    var = jnp.maximum(s_ref[0, 1:2, :] * inv_n - mean * mean, 0.0)
    out = (y - mean) * lax.rsqrt(var + IN_EPS)
    if act == "relu":
        out = jnp.maximum(out, 0.0)
    elif act == "lrelu":
        out = jnp.where(out > 0, out, neg_slope * out)
    if add_res:
        out = out + r_ref[0].astype(jnp.float32)
    o_ref[0] = out.astype(o_ref.dtype)


# ----------------------------------------------------------------------------- conv layer


def _conv_in_act(x_nhwc, w_oihw, bias, *, stride, refpad, act, neg_slope=0.01, residual=None):
    """Conv2d (optional reflection pad, no conv padding) + InstanceNorm2d + activation (+res)."""
    N = x_nhwc.shape[0]
    Cin = x_nhwc.shape[3]
    Cout, _, KH, KW = w_oihw.shape

    xp = x_nhwc.astype(jnp.bfloat16)
    if refpad:
        xp = jnp.pad(xp, ((0, 0), (refpad, refpad), (refpad, refpad), (0, 0)), mode="reflect")

    if KH == 1 and KW == 1 and stride == 1:
        Hout, Wout = xp.shape[1], xp.shape[2]
        patches = xp.reshape(N, Hout * Wout, Cin)             # 1x1 conv: no expansion
    else:
        Hp, Wp = xp.shape[1], xp.shape[2]
        Hout = (Hp - KH) // stride + 1
        Wout = (Wp - KW) // stride + 1
        cols = []
        for i in range(KH):
            for j in range(KW):
                cols.append(xp[:, i:i + stride * (Hout - 1) + 1:stride,
                               j:j + stride * (Wout - 1) + 1:stride, :])
        patches = jnp.stack(cols, axis=3).reshape(N, Hout * Wout, KH * KW * Cin)
        # TODO(synk): replace the XLA-materialized bf16 im2col with in-kernel tap
        # accumulation (halo-slab DMA + KH*KW shifted matmuls) to cut conv input HBM
        # bytes another ~9-16x at large image sizes.

    HW = Hout * Wout
    K = KH * KW * Cin
    Cp = _round_up(Cout, 128)                                 # lane-dense channel padding

    wmat = jnp.transpose(w_oihw, (2, 3, 1, 0)).reshape(K, Cout)
    wmat = jnp.pad(wmat, ((0, 0), (0, Cp - Cout))).astype(jnp.bfloat16)
    bvec = jnp.pad(bias, (0, Cp - Cout)).reshape(1, Cp).astype(jnp.float32)

    # padding-free HW tiling
    n_hw = max(1, _cdiv(HW, ROW_TILE))
    thw = _round_up(_cdiv(HW, n_hw), 8)
    hw_pad = thw * n_hw
    if hw_pad != HW:
        patches = jnp.pad(patches, ((0, 0), (0, hw_pad - HW), (0, 0)))

    # K tiling: single (unpadded) resident block when it fits, 128-aligned tiles otherwise
    if K <= K_TILE:
        tk, k_pad, n_k = K, K, 1
    else:
        n_k = _cdiv(K, K_TILE)
        tk = _round_up(_cdiv(K, n_k), 128)
        k_pad = tk * n_k
        patches = jnp.pad(patches, ((0, 0), (0, 0), (0, k_pad - K)))
        wmat = jnp.pad(wmat, ((0, k_pad - K), (0, 0)))
    has_k = n_k > 1

    add_res = residual is not None
    r = None
    if add_res:
        r = residual.reshape(N, HW, Cout).astype(jnp.bfloat16)
        r = jnp.pad(r, ((0, 0), (0, hw_pad - HW), (0, Cp - Cout)))

    # fused vs two-pass decision: per-batch VMEM residency estimate
    resident = n_hw * thw * Cp * 4                            # y_acc (f32 scratch)
    resident += 2 * n_hw * thw * Cp * 2                       # output block (bf16, 2x buffered)
    if add_res:
        resident += 2 * n_hw * thw * Cp * 2                   # residual block (bf16, 2x buffered)
    resident += 2 * (thw * tk + tk * Cp) * 2                  # streamed patch + weight blocks
    use_fused = resident <= VMEM_LIMIT // 2

    conv_cost = pl.CostEstimate(
        flops=2 * N * hw_pad * k_pad * Cp,
        transcendentals=N * Cp,
        bytes_accessed=2 * (N * hw_pad * k_pad + k_pad * Cp + N * hw_pad * Cp
                            + (N * hw_pad * Cp if add_res else 0)) + 4 * N * 2 * Cp,
    )

    if use_fused:
        kern = functools.partial(
            _fused_conv_in_kernel, has_k=has_k, add_res=add_res, act=act,
            neg_slope=neg_slope, hw_valid=HW, hw_pad=hw_pad, n_hw=n_hw)
        if has_k:
            grid = (N, n_hw, n_k)
            sem = ("parallel", "arbitrary", "arbitrary")
            p_spec = pl.BlockSpec((1, thw, tk), lambda n, h, k: (n, h, k))
            w_spec = pl.BlockSpec((tk, Cp), lambda n, h, k: (k, 0))
            b_spec = pl.BlockSpec((1, Cp), lambda n, h, k: (0, 0))
            res_spec = pl.BlockSpec((1, n_hw, thw, Cp), lambda n, h, k: (n, 0, 0, 0))
            o_spec = pl.BlockSpec((1, n_hw, thw, Cp), lambda n, h, k: (n, 0, 0, 0))
        else:
            grid = (N, n_hw)
            sem = ("parallel", "arbitrary")
            p_spec = pl.BlockSpec((1, thw, tk), lambda n, h: (n, h, 0))
            w_spec = pl.BlockSpec((tk, Cp), lambda n, h: (0, 0))
            b_spec = pl.BlockSpec((1, Cp), lambda n, h: (0, 0))
            res_spec = pl.BlockSpec((1, n_hw, thw, Cp), lambda n, h: (n, 0, 0, 0))
            o_spec = pl.BlockSpec((1, n_hw, thw, Cp), lambda n, h: (n, 0, 0, 0))

        in_specs = [p_spec, w_spec, b_spec]
        inputs = [patches, wmat, bvec]
        if add_res:
            in_specs.append(res_spec)
            inputs.append(r.reshape(N, n_hw, thw, Cp))

        out4 = pl.pallas_call(
            kern,
            out_shape=jax.ShapeDtypeStruct((N, n_hw, thw, Cp), jnp.bfloat16),
            grid_spec=pltpu.PrefetchScalarGridSpec(
                num_scalar_prefetch=0, grid=grid,
                in_specs=in_specs, out_specs=o_spec,
                scratch_shapes=[pltpu.VMEM((n_hw, thw, Cp), jnp.float32),
                                pltpu.VMEM((1, Cp), jnp.float32),
                                pltpu.VMEM((1, Cp), jnp.float32)]),
            compiler_params=pltpu.CompilerParams(
                dimension_semantics=sem, vmem_limit_bytes=VMEM_LIMIT),
            cost_estimate=conv_cost,
        )(*inputs)
        out = out4.reshape(N, hw_pad, Cp)
    else:
        # ---- large-image fallback, pass 1: conv + stats (y streamed to HBM) ----
        kern1 = functools.partial(_conv_stats_kernel, has_k=has_k, hw_valid=HW, hw_pad=hw_pad)
        if has_k:
            grid1 = (N, n_hw, n_k)
            sem1 = ("parallel", "arbitrary", "arbitrary")
            in_specs1 = [pl.BlockSpec((1, thw, tk), lambda n, h, k: (n, h, k)),
                         pl.BlockSpec((tk, Cp), lambda n, h, k: (k, 0)),
                         pl.BlockSpec((1, Cp), lambda n, h, k: (0, 0))]
            out_specs1 = [pl.BlockSpec((1, thw, Cp), lambda n, h, k: (n, h, 0)),
                          pl.BlockSpec((1, 2, Cp), lambda n, h, k: (n, 0, 0))]
            scratch1 = [pltpu.VMEM((thw, Cp), jnp.float32)]
        else:
            grid1 = (N, n_hw)
            sem1 = ("parallel", "arbitrary")
            in_specs1 = [pl.BlockSpec((1, thw, tk), lambda n, h: (n, h, 0)),
                         pl.BlockSpec((tk, Cp), lambda n, h: (0, 0)),
                         pl.BlockSpec((1, Cp), lambda n, h: (0, 0))]
            out_specs1 = [pl.BlockSpec((1, thw, Cp), lambda n, h: (n, h, 0)),
                          pl.BlockSpec((1, 2, Cp), lambda n, h: (n, 0, 0))]
            scratch1 = []

        y, stats = pl.pallas_call(
            kern1,
            out_shape=(jax.ShapeDtypeStruct((N, hw_pad, Cp), jnp.bfloat16),
                       jax.ShapeDtypeStruct((N, 2, Cp), jnp.float32)),
            grid_spec=pltpu.PrefetchScalarGridSpec(
                num_scalar_prefetch=0, grid=grid1, in_specs=in_specs1,
                out_specs=out_specs1, scratch_shapes=scratch1),
            compiler_params=pltpu.CompilerParams(
                dimension_semantics=sem1, vmem_limit_bytes=VMEM_LIMIT),
            cost_estimate=conv_cost,
        )(patches, wmat, bvec)

        # ---- pass 2: normalize + activation (+ residual add) ----
        kern2 = functools.partial(_norm_act_kernel, act=act, add_res=add_res,
                                  hw_valid=HW, neg_slope=neg_slope)
        inputs2 = [y, stats]
        in_specs2 = [pl.BlockSpec((1, thw, Cp), lambda n, h: (n, h, 0)),
                     pl.BlockSpec((1, 2, Cp), lambda n, h: (n, 0, 0))]
        if add_res:
            inputs2.append(r)
            in_specs2.append(pl.BlockSpec((1, thw, Cp), lambda n, h: (n, h, 0)))

        out = pl.pallas_call(
            kern2,
            out_shape=jax.ShapeDtypeStruct((N, hw_pad, Cp), jnp.bfloat16),
            grid_spec=pltpu.PrefetchScalarGridSpec(
                num_scalar_prefetch=0, grid=(N, n_hw), in_specs=in_specs2,
                out_specs=pl.BlockSpec((1, thw, Cp), lambda n, h: (n, h, 0))),
            compiler_params=pltpu.CompilerParams(
                dimension_semantics=("parallel", "parallel"),
                vmem_limit_bytes=VMEM_LIMIT),
        )(*inputs2)

    return out[:, :HW, :Cout].reshape(N, Hout, Wout, Cout)


# ----------------------------------------------------------------------------- JAX glue


def _nearest_down2(x):  # NCHW, F.interpolate(scale_factor=0.5) (nearest)
    H, W = x.shape[2], x.shape[3]
    Ho, Wo = H // 2, W // 2
    idx_h = (jnp.arange(Ho) * H) // Ho
    idx_w = (jnp.arange(Wo) * W) // Wo
    return jnp.take(jnp.take(x, idx_h, axis=2), idx_w, axis=3)


def _bilinear_up2_align_corners(x):  # NCHW, F.interpolate(scale_factor=2, bilinear, align_corners=True)
    N, C, H, W = x.shape
    Ho, Wo = 2 * H, 2 * W

    def coords(n_in, n_out):
        if n_in == 1:
            return jnp.zeros((n_out,), jnp.float32)
        return jnp.arange(n_out, dtype=jnp.float32) * ((n_in - 1) / (n_out - 1))

    ys, xs = coords(H, Ho), coords(W, Wo)
    y0 = jnp.floor(ys).astype(jnp.int32)
    x0 = jnp.floor(xs).astype(jnp.int32)
    y1 = jnp.minimum(y0 + 1, H - 1)
    x1 = jnp.minimum(x0 + 1, W - 1)
    wy = (ys - y0).reshape(1, 1, Ho, 1)
    wx = (xs - x0).reshape(1, 1, 1, Wo)

    r0 = jnp.take(x, y0, axis=2)
    r1 = jnp.take(x, y1, axis=2)
    v00 = jnp.take(r0, x0, axis=3)
    v01 = jnp.take(r0, x1, axis=3)
    v10 = jnp.take(r1, x0, axis=3)
    v11 = jnp.take(r1, x1, axis=3)
    top = v00 * (1 - wx) + v01 * wx
    bot = v10 * (1 - wx) + v11 * wx
    return top * (1 - wy) + bot * wy


def _pad_to(x, Ht, Wt):  # zero-pad (PyTorch F.pad split) to target spatial size
    dy, dx = Ht - x.shape[2], Wt - x.shape[3]
    return jnp.pad(x, ((0, 0), (0, 0), (dy // 2, dy - dy // 2), (dx // 2, dx - dx // 2)))


# ----------------------------------------------------------------------------- model


def init_params(key, in_features, out_features, n_residual_blocks):
    """Deterministic synthetic parameters matching the PyTorch module layout (Conv2d defaults)."""
    def conv_init(k, cin, cout, ks):
        kw_, kb_ = jax.random.split(k)
        bound = 1.0 / float(cin * ks * ks) ** 0.5
        w = jax.random.uniform(kw_, (cout, cin, ks, ks), jnp.float32, -bound, bound)
        b = jax.random.uniform(kb_, (cout,), jnp.float32, -bound, bound)
        return w, b

    keys = jax.random.split(key, 2 + 2 * n_residual_blocks)
    w0, b0 = conv_init(keys[0], in_features, out_features, 1)
    w1, b1 = conv_init(keys[1], out_features, out_features, 4)
    res = []
    for i in range(n_residual_blocks):
        wa, ba = conv_init(keys[2 + 2 * i], out_features, out_features, 3)
        wb, bb = conv_init(keys[3 + 2 * i], out_features, out_features, 3)
        res.append(dict(wa=wa, ba=ba, wb=wb, bb=bb))
    return dict(w0=w0, b0=b0, w1=w1, b1=b1, res=res)


def pathology_block_forward(x1, x2, x3, params, *, alt_leak=False, neg_slope=0.01):
    """Forward pass. x1/x2/x3 are NCHW float32; output NCHW (N, out_features, H2//2, W2//2)."""
    act = "lrelu" if alt_leak else "relu"
    Ht, Wt = x2.shape[2], x2.shape[3]

    x1d = _pad_to(_nearest_down2(x1), Ht, Wt)
    x3u = _pad_to(_bilinear_up2_align_corners(x3), Ht, Wt)
    x = jnp.concatenate([x1d, x2, x3u], axis=1)               # NCHW, C = in_features
    x = jnp.transpose(x, (0, 2, 3, 1))                        # NHWC

    p = params
    # Conv2d(in, out, 1) + InstanceNorm2d + act
    x = _conv_in_act(x, p["w0"], p["b0"], stride=1, refpad=0, act=act, neg_slope=neg_slope)
    # ReflectionPad2d(1) + Conv2d(out, out, 4, stride=2) + InstanceNorm2d + act
    x = _conv_in_act(x, p["w1"], p["b1"], stride=2, refpad=1, act=act, neg_slope=neg_slope)
    # ResidualBlocks: x + IN(conv3(act(IN(conv3(refpad(x))))))
    for rb in p["res"]:
        h = _conv_in_act(x, rb["wa"], rb["ba"], stride=1, refpad=1, act=act, neg_slope=neg_slope)
        x = _conv_in_act(h, rb["wb"], rb["bb"], stride=1, refpad=1, act="none",
                         neg_slope=neg_slope, residual=x)
    return jnp.transpose(x, (0, 3, 1, 2)).astype(jnp.float32)  # NHWC -> NCHW


if __name__ == "__main__":
    key = jax.random.PRNGKey(0)
    N = 2
    C1, C2, C3 = 4, 6, 6            # in_features = 16
    H2, W2 = 24, 24                 # x2 is the reference resolution
    out_features = 32
    n_residual_blocks = 2

    kp, k1, k2, k3 = jax.random.split(key, 4)
    params = init_params(kp, C1 + C2 + C3, out_features, n_residual_blocks)
    x1 = jax.random.normal(k1, (N, C1, 2 * H2, 2 * W2), jnp.float32)   # 2x resolution branch
    x2 = jax.random.normal(k2, (N, C2, H2, W2), jnp.float32)           # reference branch
    x3 = jax.random.normal(k3, (N, C3, H2 // 2, W2 // 2), jnp.float32) # 0.5x resolution branch

    fwd = jax.jit(lambda a, b, c: pathology_block_forward(a, b, c, params))
    y = fwd(x1, x2, x3)
    jax.block_until_ready(y)

    # 24x24 -> (1x1 conv) 24x24 -> (refpad1 + 4x4 s2) 12x12 -> residual blocks keep 12x12
    assert y.shape == (N, out_features, 12, 12), y.shape
    assert bool(jnp.all(jnp.isfinite(y)))
    print("KERNEL_OK")
</pallas_src>

<mosaic_0001>
module attributes {stable_mosaic.version = 11 : i64} {
  func.func @_fused_conv_in_kernel(%arg0: i32, %arg1: i32, %arg2: memref<1x192x16xbf16, #tpu.memory_space<vmem>>, %arg3: memref<16x128xbf16, #tpu.memory_space<vmem>>, %arg4: memref<1x128xf32, #tpu.memory_space<vmem>>, %arg5: memref<1x3x192x128xbf16, #tpu.memory_space<vmem>>, %arg6: memref<3x192x128xf32, #tpu.memory_space<vmem>>, %arg7: memref<1x128xf32, #tpu.memory_space<vmem>>, %arg8: memref<1x128xf32, #tpu.memory_space<vmem>>) attributes {dimension_semantics = [#tpu.dimension_semantics<parallel>, #tpu.dimension_semantics<arbitrary>], iteration_bounds = array<i64: 2, 3>, scalar_prefetch = 0 : i64, scratch_operands = 3 : i64, tpu.core_type = #tpu.core_type<tc>, window_params = [{transform_indices = @transform_0, window_bounds = array<i64: 1, 192, 16>}, {pipeline_mode = #tpu.pipeline_mode<synchronous>, transform_indices = @transform_1, window_bounds = array<i64: 16, 128>}, {pipeline_mode = #tpu.pipeline_mode<synchronous>, transform_indices = @transform_2, window_bounds = array<i64: 1, 128>}, {transform_indices = @transform_3, window_bounds = array<i64: 1, 3, 192, 128>}]} {
    %c0 = arith.constant 0 : index
    %c0_0 = arith.constant 0 : index
    %c0_1 = arith.constant 0 : index
    %0 = vector.load %arg2[%c0, %c0_0, %c0_1] : memref<1x192x16xbf16, #tpu.memory_space<vmem>>, vector<1x192x16xbf16>
    %1 = vector.shape_cast %0 : vector<1x192x16xbf16> to vector<192x16xbf16>
    %c0_2 = arith.constant 0 : index
    %c0_3 = arith.constant 0 : index
    %2 = vector.load %arg3[%c0_2, %c0_3] : memref<16x128xbf16, #tpu.memory_space<vmem>>, vector<16x128xbf16>
    %cst = arith.constant dense<0.000000e+00> : vector<192x128xf32>
    %3 = tpu.matmul %1, %2, %cst {dimension_numbers = #tpu.dot_dimension_numbers<[1], [0], [0], [1], [0, 0, 1, 1], [], []>} : vector<192x16xbf16>, vector<16x128xbf16>, vector<192x128xf32> -> vector<192x128xf32>
    %c0_4 = arith.constant 0 : index
    %c0_5 = arith.constant 0 : index
    %4 = vector.load %arg4[%c0_4, %c0_5] : memref<1x128xf32, #tpu.memory_space<vmem>>, vector<1x128xf32>
    %5 = vector.broadcast %4 : vector<1x128xf32> to vector<192x128xf32>
    %6 = arith.addf %3, %5 : vector<192x128xf32>
    %7 = arith.index_cast %arg1 : i32 to index
    %c0_6 = arith.constant 0 : index
    %c0_7 = arith.constant 0 : index
    %8 = vector.load %arg6[%7, %c0_6, %c0_7] : memref<3x192x128xf32, #tpu.memory_space<vmem>>, vector<1x192x128xf32>
    %9 = vector.shape_cast %8 : vector<1x192x128xf32> to vector<192x128xf32>
    %10 = vector.shape_cast %6 : vector<192x128xf32> to vector<1x192x128xf32>
    tpu.vector_store %arg6[%7, %c0_6, %c0_7], %10 {strides = array<i32>} : memref<3x192x128xf32, #tpu.memory_space<vmem>>, vector<1x192x128xf32>,
    %cst_8 = arith.constant dense<0.000000e+00> : vector<128xf32>
    %11 = vector.multi_reduction <add>, %6, %cst_8 [0] : vector<192x128xf32> to vector<128xf32>
    %12 = vector.shape_cast %11 : vector<128xf32> to vector<1x128xf32>
    %13 = arith.mulf %6, %6 : vector<192x128xf32>
    %cst_9 = arith.constant dense<0.000000e+00> : vector<128xf32>
    %14 = vector.multi_reduction <add>, %13, %cst_9 [0] : vector<192x128xf32> to vector<128xf32>
    %15 = vector.shape_cast %14 : vector<128xf32> to vector<1x128xf32>
    %c0_i32 = arith.constant 0 : i32
    %16 = arith.cmpi eq, %arg1, %c0_i32 : i32
    %17 = arith.extui %16 : i1 to i32
    %c0_i32_10 = arith.constant 0 : i32
    %18 = arith.cmpi ne, %17, %c0_i32_10 : i32
    scf.if %18 {
      %c0_14 = arith.constant 0 : index
      %c0_15 = arith.constant 0 : index
      %25 = vector.load %arg7[%c0_14, %c0_15] : memref<1x128xf32, #tpu.memory_space<vmem>>, vector<1x128xf32>
      tpu.vector_store %arg7[%c0_14, %c0_15], %12 {strides = array<i32>} : memref<1x128xf32, #tpu.memory_space<vmem>>, vector<1x128xf32>,
      %c0_16 = arith.constant 0 : index
      %c0_17 = arith.constant 0 : index
      %26 = vector.load %arg8[%c0_16, %c0_17] : memref<1x128xf32, #tpu.memory_space<vmem>>, vector<1x128xf32>
      tpu.vector_store %arg8[%c0_16, %c0_17], %15 {strides = array<i32>} : memref<1x128xf32, #tpu.memory_space<vmem>>, vector<1x128xf32>,
    } else {
    }
    %c0_i32_11 = arith.constant 0 : i32
    %19 = arith.cmpi sgt, %arg1, %c0_i32_11 : i32
    %20 = arith.extui %19 : i1 to i32
    %c0_i32_12 = arith.constant 0 : i32
    %21 = arith.cmpi ne, %20, %c0_i32_12 : i32
    scf.if %21 {
      %c0_14 = arith.constant 0 : index
      %c0_15 = arith.constant 0 : index
      %25 = vector.load %arg7[%c0_14, %c0_15] : memref<1x128xf32, #tpu.memory_space<vmem>>, vector<1x128xf32>
      %26 = arith.addf %25, %12 : vector<1x128xf32>
      %c0_16 = arith.constant 0 : index
      %c0_17 = arith.constant 0 : index
      %27 = vector.load %arg7[%c0_16, %c0_17] : memref<1x128xf32, #tpu.memory_space<vmem>>, vector<1x128xf32>
      tpu.vector_store %arg7[%c0_16, %c0_17], %26 {strides = array<i32>} : memref<1x128xf32, #tpu.memory_space<vmem>>, vector<1x128xf32>,
      %c0_18 = arith.constant 0 : index
      %c0_19 = arith.constant 0 : index
      %28 = vector.load %arg8[%c0_18, %c0_19] : memref<1x128xf32, #tpu.memory_space<vmem>>, vector<1x128xf32>
      %29 = arith.addf %28, %15 : vector<1x128xf32>
      %c0_20 = arith.constant 0 : index
      %c0_21 = arith.constant 0 : index
      %30 = vector.load %arg8[%c0_20, %c0_21] : memref<1x128xf32, #tpu.memory_space<vmem>>, vector<1x128xf32>
      tpu.vector_store %arg8[%c0_20, %c0_21], %29 {strides = array<i32>} : memref<1x128xf32, #tpu.memory_space<vmem>>, vector<1x128xf32>,
    } else {
    }
    %c2_i32 = arith.constant 2 : i32
    %22 = arith.cmpi eq, %arg1, %c2_i32 : i32
    %23 = arith.extui %22 : i1 to i32
    %c0_i32_13 = arith.constant 0 : i32
    %24 = arith.cmpi ne, %23, %c0_i32_13 : i32
    scf.if %24 {
      %c0_14 = arith.constant 0 : index
      %c0_15 = arith.constant 0 : index
      %25 = vector.load %arg7[%c0_14, %c0_15] : memref<1x128xf32, #tpu.memory_space<vmem>>, vector<1x128xf32>
      %c0_16 = arith.constant 0 : index
      %c0_17 = arith.constant 0 : index
      %26 = vector.load %arg8[%c0_16, %c0_17] : memref<1x128xf32, #tpu.memory_space<vmem>>, vector<1x128xf32>
      %cst_18 = arith.constant 0.00173611112 : f32
      %27 = vector.broadcast %cst_18 : f32 to vector<1x128xf32>
      %28 = arith.mulf %25, %27 : vector<1x128xf32>
      %cst_19 = arith.constant 0.00173611112 : f32
      %29 = vector.broadcast %cst_19 : f32 to vector<1x128xf32>
      %30 = arith.mulf %26, %29 : vector<1x128xf32>
      %31 = arith.mulf %28, %28 : vector<1x128xf32>
      %32 = arith.subf %30, %31 : vector<1x128xf32>
      %cst_20 = arith.constant 0.000000e+00 : f32
      %33 = vector.broadcast %cst_20 : f32 to vector<1x128xf32>
      %34 = arith.maximumf %32, %33 : vector<1x128xf32>
      %cst_21 = arith.constant 9.99999974E-6 : f32
      %35 = vector.broadcast %cst_21 : f32 to vector<1x128xf32>
      %36 = arith.addf %34, %35 : vector<1x128xf32>
      %37 = math.rsqrt %36 : vector<1x128xf32>
      %c0_i32_22 = arith.constant 0 : i32
      %38 = arith.index_cast %c0_i32_22 : i32 to index
      %c0_23 = arith.constant 0 : index
      %c0_24 = arith.constant 0 : index
      %39 = vector.load %arg6[%38, %c0_23, %c0_24] : memref<3x192x128xf32, #tpu.memory_space<vmem>>, vector<1x192x128xf32>
      %40 = vector.shape_cast %39 : vector<1x192x128xf32> to vector<192x128xf32>
      %41 = vector.broadcast %28 : vector<1x128xf32> to vector<192x128xf32>
      %42 = arith.subf %40, %41 : vector<192x128xf32>
      %43 = vector.broadcast %37 : vector<1x128xf32> to vector<192x128xf32>
      %44 = arith.mulf %42, %43 : vector<192x128xf32>
      %cst_25 = arith.constant 0.000000e+00 : f32
      %45 = vector.broadcast %cst_25 : f32 to vector<192x128xf32>
      %46 = arith.maximumf %44, %45 : vector<192x128xf32>
      %47 = arith.truncf %46 : vector<192x128xf32> to vector<192x128xbf16>
      %c0_26 = arith.constant 0 : index
      %48 = arith.index_cast %c0_i32_22 : i32 to index
      %c0_27 = arith.constant 0 : index
      %c0_28 = arith.constant 0 : index
      %49 = vector.load %arg5[%c0_26, %48, %c0_27, %c0_28] : memref<1x3x192x128xbf16, #tpu.memory_space<vmem>>, vector<1x1x192x128xbf16>
      %50 = vector.shape_cast %49 : vector<1x1x192x128xbf16> to vector<192x128xbf16>
      %51 = vector.shape_cast %47 : vector<192x128xbf16> to vector<1x1x192x128xbf16>
      tpu.vector_store %arg5[%c0_26, %48, %c0_27, %c0_28], %51 {strides = array<i32>} : memref<1x3x192x128xbf16, #tpu.memory_space<vmem>>, vector<1x1x192x128xbf16>,
      %c1_i32 = arith.constant 1 : i32
      %52 = arith.index_cast %c1_i32 : i32 to index
      %c0_29 = arith.constant 0 : index
      %c0_30 = arith.constant 0 : index
      %53 = vector.load %arg6[%52, %c0_29, %c0_30] : memref<3x192x128xf32, #tpu.memory_space<vmem>>, vector<1x192x128xf32>
      %54 = vector.shape_cast %53 : vector<1x192x128xf32> to vector<192x128xf32>
      %55 = vector.broadcast %28 : vector<1x128xf32> to vector<192x128xf32>
      %56 = arith.subf %54, %55 : vector<192x128xf32>
      %57 = vector.broadcast %37 : vector<1x128xf32> to vector<192x128xf32>
      %58 = arith.mulf %56, %57 : vector<192x128xf32>
      %cst_31 = arith.constant 0.000000e+00 : f32
      %59 = vector.broadcast %cst_31 : f32 to vector<192x128xf32>
      %60 = arith.maximumf %58, %59 : vector<192x128xf32>
      %61 = arith.truncf %60 : vector<192x128xf32> to vector<192x128xbf16>
      %c0_32 = arith.constant 0 : index
      %62 = arith.index_cast %c1_i32 : i32 to index
      %c0_33 = arith.constant 0 : index
      %c0_34 = arith.constant 0 : index
      %63 = vector.load %arg5[%c0_32, %62, %c0_33, %c0_34] : memref<1x3x192x128xbf16, #tpu.memory_space<vmem>>, vector<1x1x192x128xbf16>
      %64 = vector.shape_cast %63 : vector<1x1x192x128xbf16> to vector<192x128xbf16>
      %65 = vector.shape_cast %61 : vector<192x128xbf16> to vector<1x1x192x128xbf16>
      tpu.vector_store %arg5[%c0_32, %62, %c0_33, %c0_34], %65 {strides = array<i32>} : memref<1x3x192x128xbf16, #tpu.memory_space<vmem>>, vector<1x1x192x128xbf16>,
      %c2_i32_35 = arith.constant 2 : i32
      %66 = arith.index_cast %c2_i32_35 : i32 to index
      %c0_36 = arith.constant 0 : index
      %c0_37 = arith.constant 0 : index
      %67 = vector.load %arg6[%66, %c0_36, %c0_37] : memref<3x192x128xf32, #tpu.memory_space<vmem>>, vector<1x192x128xf32>
      %68 = vector.shape_cast %67 : vector<1x192x128xf32> to vector<192x128xf32>
      %69 = vector.broadcast %28 : vector<1x128xf32> to vector<192x128xf32>
      %70 = arith.subf %68, %69 : vector<192x128xf32>
      %71 = vector.broadcast %37 : vector<1x128xf32> to vector<192x128xf32>
      %72 = arith.mulf %70, %71 : vector<192x128xf32>
      %cst_38 = arith.constant 0.000000e+00 : f32
      %73 = vector.broadcast %cst_38 : f32 to vector<192x128xf32>
      %74 = arith.maximumf %72, %73 : vector<192x128xf32>
      %75 = arith.truncf %74 : vector<192x128xf32> to vector<192x128xbf16>
      %c0_39 = arith.constant 0 : index
      %76 = arith.index_cast %c2_i32_35 : i32 to index
      %c0_40 = arith.constant 0 : index
      %c0_41 = arith.constant 0 : index
      %77 = vector.load %arg5[%c0_39, %76, %c0_40, %c0_41] : memref<1x3x192x128xbf16, #tpu.memory_space<vmem>>, vector<1x1x192x128xbf16>
      %78 = vector.shape_cast %77 : vector<1x1x192x128xbf16> to vector<192x128xbf16>
      %79 = vector.shape_cast %75 : vector<192x128xbf16> to vector<1x1x192x128xbf16>
      tpu.vector_store %arg5[%c0_39, %76, %c0_40, %c0_41], %79 {strides = array<i32>} : memref<1x3x192x128xbf16, #tpu.memory_space<vmem>>, vector<1x1x192x128xbf16>,
      %c3_i32 = arith.constant 3 : i32
    } else {
    }
    return
  }
  func.func @transform_0(%arg0: i32, %arg1: i32) -> (i32, i32, i32) {
    %c0_i32 = arith.constant 0 : i32
    %c0_i32_0 = arith.constant 0 : i32
    return %arg0, %arg1, %c0_i32 : i32, i32, i32
  }
  func.func @transform_1(%arg0: i32, %arg1: i32) -> (i32, i32) {
    %c0_i32 = arith.constant 0 : i32
    %c0_i32_0 = arith.constant 0 : i32
    %c0_i32_1 = arith.constant 0 : i32
    return %c0_i32, %c0_i32_0 : i32, i32
  }
  func.func @transform_2(%arg0: i32, %arg1: i32) -> (i32, i32) {
    %c0_i32 = arith.constant 0 : i32
    %c0_i32_0 = arith.constant 0 : i32
    %c0_i32_1 = arith.constant 0 : i32
    return %c0_i32, %c0_i32_0 : i32, i32
  }
  func.func @transform_3(%arg0: i32, %arg1: i32) -> (i32, i32, i32, i32) {
    %c0_i32 = arith.constant 0 : i32
    %c0_i32_0 = arith.constant 0 : i32
    %c0_i32_1 = arith.constant 0 : i32
    %c0_i32_2 = arith.constant 0 : i32
    return %arg0, %c0_i32, %c0_i32_0, %c0_i32_1 : i32, i32, i32, i32
  }
}

module attributes {stable_mosaic.version = 11 : i64} {
  func.func @_fused_conv_in_kernel(%arg0: i32, %arg1: i32, %arg2: memref<1x144x512xbf16, #tpu.memory_space<vmem>>, %arg3: memref<512x128xbf16, #tpu.memory_space<vmem>>, %arg4: memref<1x128xf32, #tpu.memory_space<vmem>>, %arg5: memref<1x1x144x128xbf16, #tpu.memory_space<vmem>>, %arg6: memref<1x144x128xf32, #tpu.memory_space<vmem>>, %arg7: memref<1x128xf32, #tpu.memory_space<vmem>>, %arg8: memref<1x128xf32, #tpu.memory_space<vmem>>) attributes {dimension_semantics = [#tpu.dimension_semantics<parallel>, #tpu.dimension_semantics<arbitrary>], iteration_bounds = array<i64: 2, 1>, scalar_prefetch = 0 : i64, scratch_operands = 3 : i64, tpu.core_type = #tpu.core_type<tc>, window_params = [{transform_indices = @transform_0, window_bounds = array<i64: 1, 144, 512>}, {pipeline_mode = #tpu.pipeline_mode<synchronous>, transform_indices = @transform_1, window_bounds = array<i64: 512, 128>}, {pipeline_mode = #tpu.pipeline_mode<synchronous>, transform_indices = @transform_2, window_bounds = array<i64: 1, 128>}, {transform_indices = @transform_3, window_bounds = array<i64: 1, 1, 144, 128>}]} {
    %c0 = arith.constant 0 : index
    %c0_0 = arith.constant 0 : index
    %c0_1 = arith.constant 0 : index
    %0 = vector.load %arg2[%c0, %c0_0, %c0_1] : memref<1x144x512xbf16, #tpu.memory_space<vmem>>, vector<1x144x512xbf16>
    %1 = vector.shape_cast %0 : vector<1x144x512xbf16> to vector<144x512xbf16>
    %c0_2 = arith.constant 0 : index
    %c0_3 = arith.constant 0 : index
    %2 = vector.load %arg3[%c0_2, %c0_3] : memref<512x128xbf16, #tpu.memory_space<vmem>>, vector<512x128xbf16>
    %cst = arith.constant dense<0.000000e+00> : vector<144x128xf32>
    %3 = tpu.matmul %1, %2, %cst {dimension_numbers = #tpu.dot_dimension_numbers<[1], [0], [0], [1], [0, 0, 1, 1], [], []>} : vector<144x512xbf16>, vector<512x128xbf16>, vector<144x128xf32> -> vector<144x128xf32>
    %c0_4 = arith.constant 0 : index
    %c0_5 = arith.constant 0 : index
    %4 = vector.load %arg4[%c0_4, %c0_5] : memref<1x128xf32, #tpu.memory_space<vmem>>, vector<1x128xf32>
    %5 = vector.broadcast %4 : vector<1x128xf32> to vector<144x128xf32>
    %6 = arith.addf %3, %5 : vector<144x128xf32>
    %7 = arith.index_cast %arg1 : i32 to index
    %c0_6 = arith.constant 0 : index
    %c0_7 = arith.constant 0 : index
    %8 = vector.load %arg6[%7, %c0_6, %c0_7] : memref<1x144x128xf32, #tpu.memory_space<vmem>>, vector<1x144x128xf32>
    %9 = vector.shape_cast %8 : vector<1x144x128xf32> to vector<144x128xf32>
    %10 = vector.shape_cast %6 : vector<144x128xf32> to vector<1x144x128xf32>
    tpu.vector_store %arg6[%7, %c0_6, %c0_7], %10 {strides = array<i32>} : memref<1x144x128xf32, #tpu.memory_space<vmem>>, vector<1x144x128xf32>,
    %cst_8 = arith.constant dense<0.000000e+00> : vector<128xf32>
    %11 = vector.multi_reduction <add>, %6, %cst_8 [0] : vector<144x128xf32> to vector<128xf32>
    %12 = vector.shape_cast %11 : vector<128xf32> to vector<1x128xf32>
    %13 = arith.mulf %6, %6 : vector<144x128xf32>
    %cst_9 = arith.constant dense<0.000000e+00> : vector<128xf32>
    %14 = vector.multi_reduction <add>, %13, %cst_9 [0] : vector<144x128xf32> to vector<128xf32>
    %15 = vector.shape_cast %14 : vector<128xf32> to vector<1x128xf32>
    %c0_i32 = arith.constant 0 : i32
    %16 = arith.cmpi eq, %arg1, %c0_i32 : i32
    %17 = arith.extui %16 : i1 to i32
    %c0_i32_10 = arith.constant 0 : i32
    %18 = arith.cmpi ne, %17, %c0_i32_10 : i32
    scf.if %18 {
      %c0_15 = arith.constant 0 : index
      %c0_16 = arith.constant 0 : index
      %25 = vector.load %arg7[%c0_15, %c0_16] : memref<1x128xf32, #tpu.memory_space<vmem>>, vector<1x128xf32>
      tpu.vector_store %arg7[%c0_15, %c0_16], %12 {strides = array<i32>} : memref<1x128xf32, #tpu.memory_space<vmem>>, vector<1x128xf32>,
      %c0_17 = arith.constant 0 : index
      %c0_18 = arith.constant 0 : index
      %26 = vector.load %arg8[%c0_17, %c0_18] : memref<1x128xf32, #tpu.memory_space<vmem>>, vector<1x128xf32>
      tpu.vector_store %arg8[%c0_17, %c0_18], %15 {strides = array<i32>} : memref<1x128xf32, #tpu.memory_space<vmem>>, vector<1x128xf32>,
    } else {
    }
    %c0_i32_11 = arith.constant 0 : i32
    %19 = arith.cmpi sgt, %arg1, %c0_i32_11 : i32
    %20 = arith.extui %19 : i1 to i32
    %c0_i32_12 = arith.constant 0 : i32
    %21 = arith.cmpi ne, %20, %c0_i32_12 : i32
    scf.if %21 {
      %c0_15 = arith.constant 0 : index
      %c0_16 = arith.constant 0 : index
      %25 = vector.load %arg7[%c0_15, %c0_16] : memref<1x128xf32, #tpu.memory_space<vmem>>, vector<1x128xf32>
      %26 = arith.addf %25, %12 : vector<1x128xf32>
      %c0_17 = arith.constant 0 : index
      %c0_18 = arith.constant 0 : index
      %27 = vector.load %arg7[%c0_17, %c0_18] : memref<1x128xf32, #tpu.memory_space<vmem>>, vector<1x128xf32>
      tpu.vector_store %arg7[%c0_17, %c0_18], %26 {strides = array<i32>} : memref<1x128xf32, #tpu.memory_space<vmem>>, vector<1x128xf32>,
      %c0_19 = arith.constant 0 : index
      %c0_20 = arith.constant 0 : index
      %28 = vector.load %arg8[%c0_19, %c0_20] : memref<1x128xf32, #tpu.memory_space<vmem>>, vector<1x128xf32>
      %29 = arith.addf %28, %15 : vector<1x128xf32>
      %c0_21 = arith.constant 0 : index
      %c0_22 = arith.constant 0 : index
      %30 = vector.load %arg8[%c0_21, %c0_22] : memref<1x128xf32, #tpu.memory_space<vmem>>, vector<1x128xf32>
      tpu.vector_store %arg8[%c0_21, %c0_22], %29 {strides = array<i32>} : memref<1x128xf32, #tpu.memory_space<vmem>>, vector<1x128xf32>,
    } else {
    }
    %c0_i32_13 = arith.constant 0 : i32
    %22 = arith.cmpi eq, %arg1, %c0_i32_13 : i32
    %23 = arith.extui %22 : i1 to i32
    %c0_i32_14 = arith.constant 0 : i32
    %24 = arith.cmpi ne, %23, %c0_i32_14 : i32
    scf.if %24 {
      %c0_15 = arith.constant 0 : index
      %c0_16 = arith.constant 0 : index
      %25 = vector.load %arg7[%c0_15, %c0_16] : memref<1x128xf32, #tpu.memory_space<vmem>>, vector<1x128xf32>
      %c0_17 = arith.constant 0 : index
      %c0_18 = arith.constant 0 : index
      %26 = vector.load %arg8[%c0_17, %c0_18] : memref<1x128xf32, #tpu.memory_space<vmem>>, vector<1x128xf32>
      %cst_19 = arith.constant 0.0069444445 : f32
      %27 = vector.broadcast %cst_19 : f32 to vector<1x128xf32>
      %28 = arith.mulf %25, %27 : vector<1x128xf32>
      %cst_20 = arith.constant 0.0069444445 : f32
      %29 = vector.broadcast %cst_20 : f32 to vector<1x128xf32>
      %30 = arith.mulf %26, %29 : vector<1x128xf32>
      %31 = arith.mulf %28, %28 : vector<1x128xf32>
      %32 = arith.subf %30, %31 : vector<1x128xf32>
      %cst_21 = arith.constant 0.000000e+00 : f32
      %33 = vector.broadcast %cst_21 : f32 to vector<1x128xf32>
      %34 = arith.maximumf %32, %33 : vector<1x128xf32>
      %cst_22 = arith.constant 9.99999974E-6 : f32
      %35 = vector.broadcast %cst_22 : f32 to vector<1x128xf32>
      %36 = arith.addf %34, %35 : vector<1x128xf32>
      %37 = math.rsqrt %36 : vector<1x128xf32>
      %c0_23 = arith.constant 0 : index
      %c0_24 = arith.constant 0 : index
      %c0_25 = arith.constant 0 : index
      %38 = vector.load %arg6[%c0_23, %c0_24, %c0_25] : memref<1x144x128xf32, #tpu.memory_space<vmem>>, vector<1x144x128xf32>
      %39 = vector.shape_cast %38 : vector<1x144x128xf32> to vector<144x128xf32>
      %40 = vector.broadcast %28 : vector<1x128xf32> to vector<144x128xf32>
      %41 = arith.subf %39, %40 : vector<144x128xf32>
      %42 = vector.broadcast %37 : vector<1x128xf32> to vector<144x128xf32>
      %43 = arith.mulf %41, %42 : vector<144x128xf32>
      %cst_26 = arith.constant 0.000000e+00 : f32
      %44 = vector.broadcast %cst_26 : f32 to vector<144x128xf32>
      %45 = arith.maximumf %43, %44 : vector<144x128xf32>
      %46 = arith.truncf %45 : vector<144x128xf32> to vector<144x128xbf16>
      %c0_27 = arith.constant 0 : index
      %c0_28 = arith.constant 0 : index
      %c0_29 = arith.constant 0 : index
      %c0_30 = arith.constant 0 : index
      %47 = vector.load %arg5[%c0_27, %c0_28, %c0_29, %c0_30] : memref<1x1x144x128xbf16, #tpu.memory_space<vmem>>, vector<1x1x144x128xbf16>
      %48 = vector.shape_cast %47 : vector<1x1x144x128xbf16> to vector<144x128xbf16>
      %49 = vector.shape_cast %46 : vector<144x128xbf16> to vector<1x1x144x128xbf16>
      tpu.vector_store %arg5[%c0_27, %c0_28, %c0_29, %c0_30], %49 {strides = array<i32>} : memref<1x1x144x128xbf16, #tpu.memory_space<vmem>>, vector<1x1x144x128xbf16>,
    } else {
    }
    return
  }
  func.func @transform_0(%arg0: i32, %arg1: i32) -> (i32, i32, i32) {
    %c0_i32 = arith.constant 0 : i32
    %c0_i32_0 = arith.constant 0 : i32
    return %arg0, %arg1, %c0_i32 : i32, i32, i32
  }
  func.func @transform_1(%arg0: i32, %arg1: i32) -> (i32, i32) {
    %c0_i32 = arith.constant 0 : i32
    %c0_i32_0 = arith.constant 0 : i32
    %c0_i32_1 = arith.constant 0 : i32
    return %c0_i32, %c0_i32_0 : i32, i32
  }
  func.func @transform_2(%arg0: i32, %arg1: i32) -> (i32, i32) {
    %c0_i32 = arith.constant 0 : i32
    %c0_i32_0 = arith.constant 0 : i32
    %c0_i32_1 = arith.constant 0 : i32
    return %c0_i32, %c0_i32_0 : i32, i32
  }
  func.func @transform_3(%arg0: i32, %arg1: i32) -> (i32, i32, i32, i32) {
    %c0_i32 = arith.constant 0 : i32
    %c0_i32_0 = arith.constant 0 : i32
    %c0_i32_1 = arith.constant 0 : i32
    %c0_i32_2 = arith.constant 0 : i32
    return %arg0, %c0_i32, %c0_i32_0, %c0_i32_1 : i32, i32, i32, i32
  }
}

module attributes {stable_mosaic.version = 11 : i64} {
  func.func @_fused_conv_in_kernel(%arg0: i32, %arg1: i32, %arg2: memref<1x144x288xbf16, #tpu.memory_space<vmem>>, %arg3: memref<288x128xbf16, #tpu.memory_space<vmem>>, %arg4: memref<1x128xf32, #tpu.memory_space<vmem>>, %arg5: memref<1x1x144x128xbf16, #tpu.memory_space<vmem>>, %arg6: memref<1x144x128xf32, #tpu.memory_space<vmem>>, %arg7: memref<1x128xf32, #tpu.memory_space<vmem>>, %arg8: memref<1x128xf32, #tpu.memory_space<vmem>>) attributes {dimension_semantics = [#tpu.dimension_semantics<parallel>, #tpu.dimension_semantics<arbitrary>], iteration_bounds = array<i64: 2, 1>, scalar_prefetch = 0 : i64, scratch_operands = 3 : i64, tpu.core_type = #tpu.core_type<tc>, window_params = [{transform_indices = @transform_0, window_bounds = array<i64: 1, 144, 288>}, {pipeline_mode = #tpu.pipeline_mode<synchronous>, transform_indices = @transform_1, window_bounds = array<i64: 288, 128>}, {pipeline_mode = #tpu.pipeline_mode<synchronous>, transform_indices = @transform_2, window_bounds = array<i64: 1, 128>}, {transform_indices = @transform_3, window_bounds = array<i64: 1, 1, 144, 128>}]} {
    %c0 = arith.constant 0 : index
    %c0_0 = arith.constant 0 : index
    %c0_1 = arith.constant 0 : index
    %0 = vector.load %arg2[%c0, %c0_0, %c0_1] : memref<1x144x288xbf16, #tpu.memory_space<vmem>>, vector<1x144x288xbf16>
    %1 = vector.shape_cast %0 : vector<1x144x288xbf16> to vector<144x288xbf16>
    %c0_2 = arith.constant 0 : index
    %c0_3 = arith.constant 0 : index
    %2 = vector.load %arg3[%c0_2, %c0_3] : memref<288x128xbf16, #tpu.memory_space<vmem>>, vector<288x128xbf16>
    %cst = arith.constant dense<0.000000e+00> : vector<144x128xf32>
    %3 = tpu.matmul %1, %2, %cst {dimension_numbers = #tpu.dot_dimension_numbers<[1], [0], [0], [1], [0, 0, 1, 1], [], []>} : vector<144x288xbf16>, vector<288x128xbf16>, vector<144x128xf32> -> vector<144x128xf32>
    %c0_4 = arith.constant 0 : index
    %c0_5 = arith.constant 0 : index
    %4 = vector.load %arg4[%c0_4, %c0_5] : memref<1x128xf32, #tpu.memory_space<vmem>>, vector<1x128xf32>
    %5 = vector.broadcast %4 : vector<1x128xf32> to vector<144x128xf32>
    %6 = arith.addf %3, %5 : vector<144x128xf32>
    %7 = arith.index_cast %arg1 : i32 to index
    %c0_6 = arith.constant 0 : index
    %c0_7 = arith.constant 0 : index
    %8 = vector.load %arg6[%7, %c0_6, %c0_7] : memref<1x144x128xf32, #tpu.memory_space<vmem>>, vector<1x144x128xf32>
    %9 = vector.shape_cast %8 : vector<1x144x128xf32> to vector<144x128xf32>
    %10 = vector.shape_cast %6 : vector<144x128xf32> to vector<1x144x128xf32>
    tpu.vector_store %arg6[%7, %c0_6, %c0_7], %10 {strides = array<i32>} : memref<1x144x128xf32, #tpu.memory_space<vmem>>, vector<1x144x128xf32>,
    %cst_8 = arith.constant dense<0.000000e+00> : vector<128xf32>
    %11 = vector.multi_reduction <add>, %6, %cst_8 [0] : vector<144x128xf32> to vector<128xf32>
    %12 = vector.shape_cast %11 : vector<128xf32> to vector<1x128xf32>
    %13 = arith.mulf %6, %6 : vector<144x128xf32>
    %cst_9 = arith.constant dense<0.000000e+00> : vector<128xf32>
    %14 = vector.multi_reduction <add>, %13, %cst_9 [0] : vector<144x128xf32> to vector<128xf32>
    %15 = vector.shape_cast %14 : vector<128xf32> to vector<1x128xf32>
    %c0_i32 = arith.constant 0 : i32
    %16 = arith.cmpi eq, %arg1, %c0_i32 : i32
    %17 = arith.extui %16 : i1 to i32
    %c0_i32_10 = arith.constant 0 : i32
    %18 = arith.cmpi ne, %17, %c0_i32_10 : i32
    scf.if %18 {
      %c0_15 = arith.constant 0 : index
      %c0_16 = arith.constant 0 : index
      %25 = vector.load %arg7[%c0_15, %c0_16] : memref<1x128xf32, #tpu.memory_space<vmem>>, vector<1x128xf32>
      tpu.vector_store %arg7[%c0_15, %c0_16], %12 {strides = array<i32>} : memref<1x128xf32, #tpu.memory_space<vmem>>, vector<1x128xf32>,
      %c0_17 = arith.constant 0 : index
      %c0_18 = arith.constant 0 : index
      %26 = vector.load %arg8[%c0_17, %c0_18] : memref<1x128xf32, #tpu.memory_space<vmem>>, vector<1x128xf32>
      tpu.vector_store %arg8[%c0_17, %c0_18], %15 {strides = array<i32>} : memref<1x128xf32, #tpu.memory_space<vmem>>, vector<1x128xf32>,
    } else {
    }
    %c0_i32_11 = arith.constant 0 : i32
    %19 = arith.cmpi sgt, %arg1, %c0_i32_11 : i32
    %20 = arith.extui %19 : i1 to i32
    %c0_i32_12 = arith.constant 0 : i32
    %21 = arith.cmpi ne, %20, %c0_i32_12 : i32
    scf.if %21 {
      %c0_15 = arith.constant 0 : index
      %c0_16 = arith.constant 0 : index
      %25 = vector.load %arg7[%c0_15, %c0_16] : memref<1x128xf32, #tpu.memory_space<vmem>>, vector<1x128xf32>
      %26 = arith.addf %25, %12 : vector<1x128xf32>
      %c0_17 = arith.constant 0 : index
      %c0_18 = arith.constant 0 : index
      %27 = vector.load %arg7[%c0_17, %c0_18] : memref<1x128xf32, #tpu.memory_space<vmem>>, vector<1x128xf32>
      tpu.vector_store %arg7[%c0_17, %c0_18], %26 {strides = array<i32>} : memref<1x128xf32, #tpu.memory_space<vmem>>, vector<1x128xf32>,
      %c0_19 = arith.constant 0 : index
      %c0_20 = arith.constant 0 : index
      %28 = vector.load %arg8[%c0_19, %c0_20] : memref<1x128xf32, #tpu.memory_space<vmem>>, vector<1x128xf32>
      %29 = arith.addf %28, %15 : vector<1x128xf32>
      %c0_21 = arith.constant 0 : index
      %c0_22 = arith.constant 0 : index
      %30 = vector.load %arg8[%c0_21, %c0_22] : memref<1x128xf32, #tpu.memory_space<vmem>>, vector<1x128xf32>
      tpu.vector_store %arg8[%c0_21, %c0_22], %29 {strides = array<i32>} : memref<1x128xf32, #tpu.memory_space<vmem>>, vector<1x128xf32>,
    } else {
    }
    %c0_i32_13 = arith.constant 0 : i32
    %22 = arith.cmpi eq, %arg1, %c0_i32_13 : i32
    %23 = arith.extui %22 : i1 to i32
    %c0_i32_14 = arith.constant 0 : i32
    %24 = arith.cmpi ne, %23, %c0_i32_14 : i32
    scf.if %24 {
      %c0_15 = arith.constant 0 : index
      %c0_16 = arith.constant 0 : index
      %25 = vector.load %arg7[%c0_15, %c0_16] : memref<1x128xf32, #tpu.memory_space<vmem>>, vector<1x128xf32>
      %c0_17 = arith.constant 0 : index
      %c0_18 = arith.constant 0 : index
      %26 = vector.load %arg8[%c0_17, %c0_18] : memref<1x128xf32, #tpu.memory_space<vmem>>, vector<1x128xf32>
      %cst_19 = arith.constant 0.0069444445 : f32
      %27 = vector.broadcast %cst_19 : f32 to vector<1x128xf32>
      %28 = arith.mulf %25, %27 : vector<1x128xf32>
      %cst_20 = arith.constant 0.0069444445 : f32
      %29 = vector.broadcast %cst_20 : f32 to vector<1x128xf32>
      %30 = arith.mulf %26, %29 : vector<1x128xf32>
      %31 = arith.mulf %28, %28 : vector<1x128xf32>
      %32 = arith.subf %30, %31 : vector<1x128xf32>
      %cst_21 = arith.constant 0.000000e+00 : f32
      %33 = vector.broadcast %cst_21 : f32 to vector<1x128xf32>
      %34 = arith.maximumf %32, %33 : vector<1x128xf32>
      %cst_22 = arith.constant 9.99999974E-6 : f32
      %35 = vector.broadcast %cst_22 : f32 to vector<1x128xf32>
      %36 = arith.addf %34, %35 : vector<1x128xf32>
      %37 = math.rsqrt %36 : vector<1x128xf32>
      %c0_23 = arith.constant 0 : index
      %c0_24 = arith.constant 0 : index
      %c0_25 = arith.constant 0 : index
      %38 = vector.load %arg6[%c0_23, %c0_24, %c0_25] : memref<1x144x128xf32, #tpu.memory_space<vmem>>, vector<1x144x128xf32>
      %39 = vector.shape_cast %38 : vector<1x144x128xf32> to vector<144x128xf32>
      %40 = vector.broadcast %28 : vector<1x128xf32> to vector<144x128xf32>
      %41 = arith.subf %39, %40 : vector<144x128xf32>
      %42 = vector.broadcast %37 : vector<1x128xf32> to vector<144x128xf32>
      %43 = arith.mulf %41, %42 : vector<144x128xf32>
      %cst_26 = arith.constant 0.000000e+00 : f32
      %44 = vector.broadcast %cst_26 : f32 to vector<144x128xf32>
      %45 = arith.maximumf %43, %44 : vector<144x128xf32>
      %46 = arith.truncf %45 : vector<144x128xf32> to vector<144x128xbf16>
      %c0_27 = arith.constant 0 : index
      %c0_28 = arith.constant 0 : index
      %c0_29 = arith.constant 0 : index
      %c0_30 = arith.constant 0 : index
      %47 = vector.load %arg5[%c0_27, %c0_28, %c0_29, %c0_30] : memref<1x1x144x128xbf16, #tpu.memory_space<vmem>>, vector<1x1x144x128xbf16>
      %48 = vector.shape_cast %47 : vector<1x1x144x128xbf16> to vector<144x128xbf16>
      %49 = vector.shape_cast %46 : vector<144x128xbf16> to vector<1x1x144x128xbf16>
      tpu.vector_store %arg5[%c0_27, %c0_28, %c0_29, %c0_30], %49 {strides = array<i32>} : memref<1x1x144x128xbf16, #tpu.memory_space<vmem>>, vector<1x1x144x128xbf16>,
    } else {
    }
    return
  }
  func.func @transform_0(%arg0: i32, %arg1: i32) -> (i32, i32, i32) {
    %c0_i32 = arith.constant 0 : i32
    %c0_i32_0 = arith.constant 0 : i32
    return %arg0, %arg1, %c0_i32 : i32, i32, i32
  }
  func.func @transform_1(%arg0: i32, %arg1: i32) -> (i32, i32) {
    %c0_i32 = arith.constant 0 : i32
    %c0_i32_0 = arith.constant 0 : i32
    %c0_i32_1 = arith.constant 0 : i32
    return %c0_i32, %c0_i32_0 : i32, i32
  }
  func.func @transform_2(%arg0: i32, %arg1: i32) -> (i32, i32) {
    %c0_i32 = arith.constant 0 : i32
    %c0_i32_0 = arith.constant 0 : i32
    %c0_i32_1 = arith.constant 0 : i32
    return %c0_i32, %c0_i32_0 : i32, i32
  }
  func.func @transform_3(%arg0: i32, %arg1: i32) -> (i32, i32, i32, i32) {
    %c0_i32 = arith.constant 0 : i32
    %c0_i32_0 = arith.constant 0 : i32
    %c0_i32_1 = arith.constant 0 : i32
    %c0_i32_2 = arith.constant 0 : i32
    return %arg0, %c0_i32, %c0_i32_0, %c0_i32_1 : i32, i32, i32, i32
  }
}

module attributes {stable_mosaic.version = 11 : i64} {
  func.func @_fused_conv_in_kernel(%arg0: i32, %arg1: i32, %arg2: memref<1x144x288xbf16, #tpu.memory_space<vmem>>, %arg3: memref<288x128xbf16, #tpu.memory_space<vmem>>, %arg4: memref<1x128xf32, #tpu.memory_space<vmem>>, %arg5: memref<1x1x144x128xbf16, #tpu.memory_space<vmem>>, %arg6: memref<1x1x144x128xbf16, #tpu.memory_space<vmem>>, %arg7: memref<1x144x128xf32, #tpu.memory_space<vmem>>, %arg8: memref<1x128xf32, #tpu.memory_space<vmem>>, %arg9: memref<1x128xf32, #tpu.memory_space<vmem>>) attributes {dimension_semantics = [#tpu.dimension_semantics<parallel>, #tpu.dimension_semantics<arbitrary>], iteration_bounds = array<i64: 2, 1>, scalar_prefetch = 0 : i64, scratch_operands = 3 : i64, tpu.core_type = #tpu.core_type<tc>, window_params = [{transform_indices = @transform_0, window_bounds = array<i64: 1, 144, 288>}, {pipeline_mode = #tpu.pipeline_mode<synchronous>, transform_indices = @transform_1, window_bounds = array<i64: 288, 128>}, {pipeline_mode = #tpu.pipeline_mode<synchronous>, transform_indices = @transform_2, window_bounds = array<i64: 1, 128>}, {transform_indices = @transform_3, window_bounds = array<i64: 1, 1, 144, 128>}, {transform_indices = @transform_4, window_bounds = array<i64: 1, 1, 144, 128>}]} {
    %c0 = arith.constant 0 : index
    %c0_0 = arith.constant 0 : index
    %c0_1 = arith.constant 0 : index
    %0 = vector.load %arg2[%c0, %c0_0, %c0_1] : memref<1x144x288xbf16, #tpu.memory_space<vmem>>, vector<1x144x288xbf16>
    %1 = vector.shape_cast %0 : vector<1x144x288xbf16> to vector<144x288xbf16>
    %c0_2 = arith.constant 0 : index
    %c0_3 = arith.constant 0 : index
    %2 = vector.load %arg3[%c0_2, %c0_3] : memref<288x128xbf16, #tpu.memory_space<vmem>>, vector<288x128xbf16>
    %cst = arith.constant dense<0.000000e+00> : vector<144x128xf32>
    %3 = tpu.matmul %1, %2, %cst {dimension_numbers = #tpu.dot_dimension_numbers<[1], [0], [0], [1], [0, 0, 1, 1], [], []>} : vector<144x288xbf16>, vector<288x128xbf16>, vector<144x128xf32> -> vector<144x128xf32>
    %c0_4 = arith.constant 0 : index
    %c0_5 = arith.constant 0 : index
    %4 = vector.load %arg4[%c0_4, %c0_5] : memref<1x128xf32, #tpu.memory_space<vmem>>, vector<1x128xf32>
    %5 = vector.broadcast %4 : vector<1x128xf32> to vector<144x128xf32>
    %6 = arith.addf %3, %5 : vector<144x128xf32>
    %7 = arith.index_cast %arg1 : i32 to index
    %c0_6 = arith.constant 0 : index
    %c0_7 = arith.constant 0 : index
    %8 = vector.load %arg7[%7, %c0_6, %c0_7] : memref<1x144x128xf32, #tpu.memory_space<vmem>>, vector<1x144x128xf32>
    %9 = vector.shape_cast %8 : vector<1x144x128xf32> to vector<144x128xf32>
    %10 = vector.shape_cast %6 : vector<144x128xf32> to vector<1x144x128xf32>
    tpu.vector_store %arg7[%7, %c0_6, %c0_7], %10 {strides = array<i32>} : memref<1x144x128xf32, #tpu.memory_space<vmem>>, vector<1x144x128xf32>,
    %cst_8 = arith.constant dense<0.000000e+00> : vector<128xf32>
    %11 = vector.multi_reduction <add>, %6, %cst_8 [0] : vector<144x128xf32> to vector<128xf32>
    %12 = vector.shape_cast %11 : vector<128xf32> to vector<1x128xf32>
    %13 = arith.mulf %6, %6 : vector<144x128xf32>
    %cst_9 = arith.constant dense<0.000000e+00> : vector<128xf32>
    %14 = vector.multi_reduction <add>, %13, %cst_9 [0] : vector<144x128xf32> to vector<128xf32>
    %15 = vector.shape_cast %14 : vector<128xf32> to vector<1x128xf32>
    %c0_i32 = arith.constant 0 : i32
    %16 = arith.cmpi eq, %arg1, %c0_i32 : i32
    %17 = arith.extui %16 : i1 to i32
    %c0_i32_10 = arith.constant 0 : i32
    %18 = arith.cmpi ne, %17, %c0_i32_10 : i32
    scf.if %18 {
      %c0_15 = arith.constant 0 : index
      %c0_16 = arith.constant 0 : index
      %25 = vector.load %arg8[%c0_15, %c0_16] : memref<1x128xf32, #tpu.memory_space<vmem>>, vector<1x128xf32>
      tpu.vector_store %arg8[%c0_15, %c0_16], %12 {strides = array<i32>} : memref<1x128xf32, #tpu.memory_space<vmem>>, vector<1x128xf32>,
      %c0_17 = arith.constant 0 : index
      %c0_18 = arith.constant 0 : index
      %26 = vector.load %arg9[%c0_17, %c0_18] : memref<1x128xf32, #tpu.memory_space<vmem>>, vector<1x128xf32>
      tpu.vector_store %arg9[%c0_17, %c0_18], %15 {strides = array<i32>} : memref<1x128xf32, #tpu.memory_space<vmem>>, vector<1x128xf32>,
    } else {
    }
    %c0_i32_11 = arith.constant 0 : i32
    %19 = arith.cmpi sgt, %arg1, %c0_i32_11 : i32
    %20 = arith.extui %19 : i1 to i32
    %c0_i32_12 = arith.constant 0 : i32
    %21 = arith.cmpi ne, %20, %c0_i32_12 : i32
    scf.if %21 {
      %c0_15 = arith.constant 0 : index
      %c0_16 = arith.constant 0 : index
      %25 = vector.load %arg8[%c0_15, %c0_16] : memref<1x128xf32, #tpu.memory_space<vmem>>, vector<1x128xf32>
      %26 = arith.addf %25, %12 : vector<1x128xf32>
      %c0_17 = arith.constant 0 : index
      %c0_18 = arith.constant 0 : index
      %27 = vector.load %arg8[%c0_17, %c0_18] : memref<1x128xf32, #tpu.memory_space<vmem>>, vector<1x128xf32>
      tpu.vector_store %arg8[%c0_17, %c0_18], %26 {strides = array<i32>} : memref<1x128xf32, #tpu.memory_space<vmem>>, vector<1x128xf32>,
      %c0_19 = arith.constant 0 : index
      %c0_20 = arith.constant 0 : index
      %28 = vector.load %arg9[%c0_19, %c0_20] : memref<1x128xf32, #tpu.memory_space<vmem>>, vector<1x128xf32>
      %29 = arith.addf %28, %15 : vector<1x128xf32>
      %c0_21 = arith.constant 0 : index
      %c0_22 = arith.constant 0 : index
      %30 = vector.load %arg9[%c0_21, %c0_22] : memref<1x128xf32, #tpu.memory_space<vmem>>, vector<1x128xf32>
      tpu.vector_store %arg9[%c0_21, %c0_22], %29 {strides = array<i32>} : memref<1x128xf32, #tpu.memory_space<vmem>>, vector<1x128xf32>,
    } else {
    }
    %c0_i32_13 = arith.constant 0 : i32
    %22 = arith.cmpi eq, %arg1, %c0_i32_13 : i32
    %23 = arith.extui %22 : i1 to i32
    %c0_i32_14 = arith.constant 0 : i32
    %24 = arith.cmpi ne, %23, %c0_i32_14 : i32
    scf.if %24 {
      %c0_15 = arith.constant 0 : index
      %c0_16 = arith.constant 0 : index
      %25 = vector.load %arg8[%c0_15, %c0_16] : memref<1x128xf32, #tpu.memory_space<vmem>>, vector<1x128xf32>
      %c0_17 = arith.constant 0 : index
      %c0_18 = arith.constant 0 : index
      %26 = vector.load %arg9[%c0_17, %c0_18] : memref<1x128xf32, #tpu.memory_space<vmem>>, vector<1x128xf32>
      %cst_19 = arith.constant 0.0069444445 : f32
      %27 = vector.broadcast %cst_19 : f32 to vector<1x128xf32>
      %28 = arith.mulf %25, %27 : vector<1x128xf32>
      %cst_20 = arith.constant 0.0069444445 : f32
      %29 = vector.broadcast %cst_20 : f32 to vector<1x128xf32>
      %30 = arith.mulf %26, %29 : vector<1x128xf32>
      %31 = arith.mulf %28, %28 : vector<1x128xf32>
      %32 = arith.subf %30, %31 : vector<1x128xf32>
      %cst_21 = arith.constant 0.000000e+00 : f32
      %33 = vector.broadcast %cst_21 : f32 to vector<1x128xf32>
      %34 = arith.maximumf %32, %33 : vector<1x128xf32>
      %cst_22 = arith.constant 9.99999974E-6 : f32
      %35 = vector.broadcast %cst_22 : f32 to vector<1x128xf32>
      %36 = arith.addf %34, %35 : vector<1x128xf32>
      %37 = math.rsqrt %36 : vector<1x128xf32>
      %c0_23 = arith.constant 0 : index
      %c0_24 = arith.constant 0 : index
      %c0_25 = arith.constant 0 : index
      %38 = vector.load %arg7[%c0_23, %c0_24, %c0_25] : memref<1x144x128xf32, #tpu.memory_space<vmem>>, vector<1x144x128xf32>
      %39 = vector.shape_cast %38 : vector<1x144x128xf32> to vector<144x128xf32>
      %40 = vector.broadcast %28 : vector<1x128xf32> to vector<144x128xf32>
      %41 = arith.subf %39, %40 : vector<144x128xf32>
      %42 = vector.broadcast %37 : vector<1x128xf32> to vector<144x128xf32>
      %43 = arith.mulf %41, %42 : vector<144x128xf32>
      %c0_26 = arith.constant 0 : index
      %c0_27 = arith.constant 0 : index
      %c0_28 = arith.constant 0 : index
      %c0_29 = arith.constant 0 : index
      %44 = vector.load %arg5[%c0_26, %c0_27, %c0_28, %c0_29] : memref<1x1x144x128xbf16, #tpu.memory_space<vmem>>, vector<1x1x144x128xbf16>
      %45 = vector.shape_cast %44 : vector<1x1x144x128xbf16> to vector<144x128xbf16>
      %46 = arith.extf %45 : vector<144x128xbf16> to vector<144x128xf32>
      %47 = arith.addf %43, %46 : vector<144x128xf32>
      %48 = arith.truncf %47 : vector<144x128xf32> to vector<144x128xbf16>
      %c0_30 = arith.constant 0 : index
      %c0_31 = arith.constant 0 : index
      %c0_32 = arith.constant 0 : index
      %c0_33 = arith.constant 0 : index
      %49 = vector.load %arg6[%c0_30, %c0_31, %c0_32, %c0_33] : memref<1x1x144x128xbf16, #tpu.memory_space<vmem>>, vector<1x1x144x128xbf16>
      %50 = vector.shape_cast %49 : vector<1x1x144x128xbf16> to vector<144x128xbf16>
      %51 = vector.shape_cast %48 : vector<144x128xbf16> to vector<1x1x144x128xbf16>
      tpu.vector_store %arg6[%c0_30, %c0_31, %c0_32, %c0_33], %51 {strides = array<i32>} : memref<1x1x144x128xbf16, #tpu.memory_space<vmem>>, vector<1x1x144x128xbf16>,
    } else {
    }
    return
  }
  func.func @transform_0(%arg0: i32, %arg1: i32) -> (i32, i32, i32) {
    %c0_i32 = arith.constant 0 : i32
    %c0_i32_0 = arith.constant 0 : i32
    return %arg0, %arg1, %c0_i32 : i32, i32, i32
  }
  func.func @transform_1(%arg0: i32, %arg1: i32) -> (i32, i32) {
    %c0_i32 = arith.constant 0 : i32
    %c0_i32_0 = arith.constant 0 : i32
    %c0_i32_1 = arith.constant 0 : i32
    return %c0_i32, %c0_i32_0 : i32, i32
  }
  func.func @transform_2(%arg0: i32, %arg1: i32) -> (i32, i32) {
    %c0_i32 = arith.constant 0 : i32
    %c0_i32_0 = arith.constant 0 : i32
    %c0_i32_1 = arith.constant 0 : i32
    return %c0_i32, %c0_i32_0 : i32, i32
  }
  func.func @transform_3(%arg0: i32, %arg1: i32) -> (i32, i32, i32, i32) {
    %c0_i32 = arith.constant 0 : i32
    %c0_i32_0 = arith.constant 0 : i32
    %c0_i32_1 = arith.constant 0 : i32
    %c0_i32_2 = arith.constant 0 : i32
    return %arg0, %c0_i32, %c0_i32_0, %c0_i32_1 : i32, i32, i32, i32
  }
  func.func @transform_4(%arg0: i32, %arg1: i32) -> (i32, i32, i32, i32) {
    %c0_i32 = arith.constant 0 : i32
    %c0_i32_0 = arith.constant 0 : i32
    %c0_i32_1 = arith.constant 0 : i32
    %c0_i32_2 = arith.constant 0 : i32
    return %arg0, %c0_i32, %c0_i32_0, %c0_i32_1 : i32, i32, i32, i32
  }
}

</mosaic_0001>

<bundles_post_ra>
// kernel: _lambda_.6
= control target key start
LH: loop header
LB: loop body
LE: loop exit
PB: predicated region body
PF: predicated region fallthrough
CT: control target
= control target key end

     0   :  { %s1524_s12 = smov 0   ;;  %s1526_s13 = smov 0   ;;  %s2274_s0 = inlined_call_operand.vmem [shape: bf16[2,576,16], index: 0, kind: input, shape index: {}]   ;;  %s2275_s1 = inlined_call_operand.vmem [shape: bf16[16,128], index: 1, kind: input, shape index: {}]   ;;  %s2276_s2 = inlined_call_operand.vmem [shape: f32[1,128], index: 2, kind: input, shape index: {}]   ;;  %s2277_s3 = inlined_call_operand.vmem [shape: bf16[2,3,192,128], index: 3, kind: output, shape index: {}]  }
   0x1   :  { %s1528_s14 = smov 0   ;;  %s1530_s15 = smov 0  }
   0x2   :  { %s1532_s16 = smov 0  }
   0x3 LB: > { %s22_s17 = sadd.s32 1, %s1494_s14  ;;  %s25_s18 = sadd.s32 1, %s1498_s15  ;;  %s1502_s16 = sphi %s1532_s16, %s13_s16   ;;  %s1498_s15 = sphi %s1530_s15, %s2371_s15   ;;  %s1494_s14 = sphi %s1528_s14, %s2370_s14   ;;  %s1490_s13 = sphi %s1526_s13, %s2369_s13   ;;  %s1486_s12 = sphi %s1524_s12, %s2368_s12  }
   0x4   : > { %p23_p0 = scmp.ge.s32.totalorder %s22_s17, 3  ;;  %p1068_p1 = scmp.ge.s32.totalorder %s1502_s16, 1 }
   0x5   : > { %p156_p2 = scmp.lt.s32.totalorder %s1502_s16, 7 }
   0x6   : > { %s2373_s17 = smov (%p23_p0, %s22_s17), 0  ;;  %s2375_s18 = smov (!%p23_p0, %s25_s18), %s1498_s15 }
   0x7   : > { %p157_p3 = pnand %p1068_p1, %p156_p2  ;;  %p27_p4 = scmp.ge.s32.totalorder %s2375_s18, 2 }
   0x8   : > { %s184_s21 = smul.u32 (!%p157_p3), 24, %s1486_s12  ;;  %p185_p5 = scmp.lt.s32.totalorder (!%p157_p3), %s1490_s13, 1 }
   0x9   : > { %s2377_s18 = smov (%p27_p4, %s2375_s18), 0  ;;  %160 = sbr.rel (%p157_p3) target bundleno = 357 (0x165), region = 32 }
   0xa   : > { %p187_p6 = scmp.lt.s32.totalorder (!%p157_p3), %s184_s21, 71  ;;  %s402_s5 = smul.u32 (!%p157_p3), 192, %s1486_s12 }
   0xb   : > { %p1135_p7 = scmp.ne.s32.totalorder (!%p157_p3), %s1486_s12, 0 }
   0xc   : > { %s1590_s8 = scalar_lea.vmem (!%p157_p3), [#allocation2], %s402_s5 }
   0xe   : > { %v1200_v0 = vld [vmem:[%s2275_s1] sm:$0xff]  ;;  %s2379_s13 = smov (!%p185_p5, %s1490_s13), 1  ;;  %s2381_s21 = smov (!%p187_p6, %s184_s21), 71  ;;  %vm296_vm0 = vcmask 130048  }
   0xf   : > { %340 = vmatpush.bf16.msra.mxu0 %v1200_v0  ;;  %1416 = vmatpush.bf16.msra.mxu1 %v1200_v0  ;;  %s1419_s22 = smul.u32 72, %s2379_s13  ;;  %v1584_v13 = vld [vmem:[%s2276_s2] ss:$0 sm:$0xff] }
  0x10   : > { %1417 = vmatpush.bf16.msra.mxu2 %v1200_v0  ;;  %1418 = vmatpush.bf16.msra.mxu3 %v1200_v0  ;;  %s1420_s23 = smul.u32 288, %s2379_s13 }
  0x11   : > { %s190_s24 = sadd.s32 %s1419_s22, %s2381_s21 }
  0x12   : > { %s1069_s25 = sshll.u32 %s190_s24, 2  ;;  %s1563_s28 = scalar_lea.vmem %s2277_s3, %s1420_s23 }
  0x13   : > { %s192_s4 = scalar_lea.vmem %s2274_s0, %s1069_s25 }
  0x14   : > { %v1188_v1 = vld [vmem:[%s192_s4] sm:$0xff]  ;;  %v1191_v2 = vld [vmem:[%s192_s4 + $0x18] sm:$0xff]  ;;  %v1194_v3 = vld [vmem:[%s192_s4 + $0x30] sm:$0xff] }
  0x15   : > { %v1197_v4 = vld [vmem:[%s192_s4 + $0x48] sm:$0xff]  ;;  %1123 = vmatmul.msk.bf16.vlgmr.msra.gmra.mxu0 %vm296_vm0, %v1188_v1  ;;  %1126 = vmatmul.msk.bf16.vlgmr.msra.gmra.mxu1 %vm296_vm0, %v1191_v2  ;;  %v1192_v6 = vld [vmem:[%s192_s4 + $0x20] sm:$0xff]  ;;  %v1195_v7 = vld [vmem:[%s192_s4 + $0x38] sm:$0xff] }
  0x16   : > { %1129 = vmatmul.msk.bf16.vlgmr.msra.gmra.mxu2 %vm296_vm0, %v1194_v3  ;;  %1132 = vmatmul.msk.bf16.vlgmr.msra.gmra.mxu3 %vm296_vm0, %v1197_v4  ;;  %v1189_v5 = vld [vmem:[%s192_s4 + $0x8] sm:$0xff]  ;;  %v1198_v8 = vld [vmem:[%s192_s4 + $0x50] sm:$0xff]  ;;  %v1196_v11 = vld [vmem:[%s192_s4 + $0x40] sm:$0xff] }
  0x17   : > { %v1190_v9 = vld [vmem:[%s192_s4 + $0x10] sm:$0xff]  ;;  %v1193_v10 = vld [vmem:[%s192_s4 + $0x28] sm:$0xff]  ;;  %v1199_v12 = vld [vmem:[%s192_s4 + $0x58] sm:$0xff] }
  0x25   : > { %1124 = vmatmul.msk.bf16.gmra.mxu0 %vm296_vm0, %v1189_v5  ;;  %1127 = vmatmul.msk.bf16.gmra.mxu1 %vm296_vm0, %v1192_v6 }
  0x26   : > { %1130 = vmatmul.msk.bf16.gmra.mxu2 %vm296_vm0, %v1195_v7  ;;  %1133 = vmatmul.msk.bf16.gmra.mxu3 %vm296_vm0, %v1198_v8 }
  0x35   : > { %1125 = vmatmul.msk.bf16.gmra.mxu0 %vm296_vm0, %v1190_v9  ;;  %1128 = vmatmul.msk.bf16.gmra.mxu1 %vm296_vm0, %v1193_v10 }
  0x36   : > { %1131 = vmatmul.msk.bf16.gmra.mxu2 %vm296_vm0, %v1196_v11  ;;  %1134 = vmatmul.msk.bf16.gmra.mxu3 %vm296_vm0, %v1199_v12 }
  0x92   : > { %v342_v14 = vpop.f32.mrf.mxu0  ;;  %v357_v15 = vpop.f32.mrf.mxu1 }
  0x93   : > { %v343_v16 = vadd.f32 %v1584_v13, %v342_v14  ;;  %v1588_v17 = vadd.f32 %v1584_v13, %v357_v15 }
  0x95   : > { %404 = vst [vmem:[%s1590_s8] sm:$0xff] %v343_v16  ;;  %v457_v51 = vmul.f32 %v343_v16, %v343_v16  ;;  %v463_v9 = vmul.f32 %v1588_v17, %v1588_v17 }
  0x96   : > { %410 = vst [vmem:[%s1590_s8 + $0x30] sm:$0xff] %v1588_v17 }
  0x99   : > { %v372_v18 = vpop.f32.mrf.mxu2  ;;  %v387_v19 = vpop.f32.mrf.mxu3 }
  0x9a   : > { %v344_v20 = vpop.f32.mrf.mxu0  ;;  %v359_v21 = vpop.f32.mrf.mxu1  ;;  %v1596_v22 = vadd.f32 %v1584_v13, %v372_v18  ;;  %v1603_v25 = vadd.f32 %v1584_v13, %v387_v19 }
  0x9b   : > { %v345_v23 = vadd.f32 %v1584_v13, %v344_v20  ;;  %v1600_v24 = vadd.f32 %v1584_v13, %v359_v21 }
  0x9c   : > { %416 = vst [vmem:[%s1590_s8 + $0x60] sm:$0xff] %v1596_v22 }
  0x9d   : > { %405 = vst [vmem:[%s1590_s8 + $0x8] sm:$0xff] %v345_v23  ;;  %v458_v44 = vmul.f32 %v345_v23, %v345_v23  ;;  %v428_v53 = vadd.f32 %v345_v23, %v343_v16  ;;  %v464_v12 = vmul.f32 %v1600_v24, %v1600_v24 }
  0x9e   : > { %411 = vst [vmem:[%s1590_s8 + $0x38] sm:$0xff] %v1600_v24 }
  0x9f   : > { %422 = vst [vmem:[%s1590_s8 + $0x90] sm:$0xff] %v1603_v25  ;;  %v481_v54 = vadd.f32 %v458_v44, %v457_v51 }
  0xa1   : > { %v374_v26 = vpop.f32.mrf.mxu2  ;;  %v389_v27 = vpop.f32.mrf.mxu3 }
  0xa2   : > { %v347_v28 = vpop.f32.mrf.mxu0  ;;  %v362_v29 = vpop.f32.mrf.mxu1  ;;  %v1613_v30 = vadd.f32 %v1584_v13, %v374_v26  ;;  %v1620_v33 = vadd.f32 %v1584_v13, %v389_v27 }
  0xa3   : > { %v348_v31 = vadd.f32 %v1584_v13, %v347_v28  ;;  %v1617_v32 = vadd.f32 %v1584_v13, %v362_v29 }
  0xa4   : > { %417 = vst [vmem:[%s1590_s8 + $0x68] sm:$0xff] %v1613_v30 }
  0xa5   : > { %406 = vst [vmem:[%s1590_s8 + $0x10] sm:$0xff] %v348_v31  ;;  %v459_v52 = vmul.f32 %v348_v31, %v348_v31  ;;  %v429_v56 = vadd.f32 %v428_v53, %v348_v31  ;;  %v465_v21 = vmul.f32 %v1617_v32, %v1617_v32 }
  0xa6   : > { %412 = vst [vmem:[%s1590_s8 + $0x40] sm:$0xff] %v1617_v32 }
  0xa7   : > { %423 = vst [vmem:[%s1590_s8 + $0x98] sm:$0xff] %v1620_v33  ;;  %v482_v57 = vadd.f32 %v481_v54, %v459_v52 }
  0xa9   : > { %v377_v34 = vpop.f32.mrf.mxu2  ;;  %v392_v35 = vpop.f32.mrf.mxu3 }
  0xaa   : > { %v349_v36 = vpop.f32.mrf.mxu0  ;;  %v364_v37 = vpop.f32.mrf.mxu1  ;;  %v1630_v38 = vadd.f32 %v1584_v13, %v377_v34  ;;  %v1635_v41 = vadd.f32 %v1584_v13, %v392_v35 }
  0xab   : > { %v350_v39 = vadd.f32 %v1584_v13, %v349_v36  ;;  %v365_v40 = vadd.f32 %v1584_v13, %v364_v37 }
  0xac   : > { %418 = vst [vmem:[%s1590_s8 + $0x70] sm:$0xff] %v1630_v38 }
  0xad   : > { %407 = vst [vmem:[%s1590_s8 + $0x18] sm:$0xff] %v350_v39  ;;  %v460_v55 = vmul.f32 %v350_v39, %v350_v39  ;;  %v430_v58 = vadd.f32 %v429_v56, %v350_v39  ;;  %v466_v26 = vmul.f32 %v365_v40, %v365_v40 }
  0xae   : > { %413 = vst [vmem:[%s1590_s8 + $0x48] sm:$0xff] %v365_v40 }
  0xaf   : > { %424 = vst [vmem:[%s1590_s8 + $0xa0] sm:$0xff] %v1635_v41  ;;  %v483_v62 = vadd.f32 %v482_v57, %v460_v55 }
  0xb1   : > { %v379_v42 = vpop.f32.mrf.mxu2  ;;  %v394_v43 = vpop.f32.mrf.mxu3 }
  0xb2   : > { %v352_v45 = vpop.f32.mrf.mxu0  ;;  %v367_v46 = vpop.f32.mrf.mxu1  ;;  %v1644_v47 = vadd.f32 %v1584_v13, %v379_v42  ;;  %v1649_v50 = vadd.f32 %v1584_v13, %v394_v43  ;;  %v471_v43 = vmul.f32 %v1630_v38, %v1630_v38 }
  0xb3   : > { %v353_v48 = vadd.f32 %v1584_v13, %v352_v45  ;;  %v368_v49 = vadd.f32 %v1584_v13, %v367_v46 }
  0xb4   : > { %419 = vst [vmem:[%s1590_s8 + $0x78] sm:$0xff] %v1644_v47  ;;  %v472_v46 = vmul.f32 %v1644_v47, %v1644_v47 }
  0xb5   : > { %408 = vst [vmem:[%s1590_s8 + $0x20] sm:$0xff] %v353_v48  ;;  %v461_v59 = vmul.f32 %v353_v48, %v353_v48  ;;  %v431_v2 = vadd.f32 %v430_v58, %v353_v48  ;;  %v467_v29 = vmul.f32 %v368_v49, %v368_v49 }
  0xb6   : > { %414 = vst [vmem:[%s1590_s8 + $0x50] sm:$0xff] %v368_v49 }
  0xb7   : > { %425 = vst [vmem:[%s1590_s8 + $0xa8] sm:$0xff] %v1649_v50  ;;  %v484_v6 = vadd.f32 %v483_v62, %v461_v59  ;;  %v478_v62 = vmul.f32 %v1649_v50, %v1649_v50 }
  0xb9   : > { %v382_v60 = vpop.f32.mrf.mxu2  ;;  %v397_v61 = vpop.f32.mrf.mxu3 }
  0xba   : > { %v354_v63 = vpop.f32.mrf.mxu0  ;;  %v369_v0 = vpop.f32.mrf.mxu1  ;;  %v383_v1 = vadd.f32 %v1584_v13, %v382_v60  ;;  %v398_v5 = vadd.f32 %v1584_v13, %v397_v61 }
  0xbb   : > { %v355_v3 = vadd.f32 %v1584_v13, %v354_v63  ;;  %v370_v4 = vadd.f32 %v1584_v13, %v369_v0 }
  0xbc   : > { %420 = vst [vmem:[%s1590_s8 + $0x80] sm:$0xff] %v383_v1  ;;  %v473_v51 = vmul.f32 %v383_v1, %v383_v1 }
  0xbd   : > { %409 = vst [vmem:[%s1590_s8 + $0x28] sm:$0xff] %v355_v3  ;;  %v432_v7 = vadd.f32 %v431_v2, %v355_v3  ;;  %v462_v8 = vmul.f32 %v355_v3, %v355_v3  ;;  %v468_v35 = vmul.f32 %v370_v4, %v370_v4 }
  0xbe   : > { %415 = vst [vmem:[%s1590_s8 + $0x58] sm:$0xff] %v370_v4 }
  0xbf   : > { %v433_v10 = vadd.f32 %v432_v7, %v1588_v17  ;;  %v485_v11 = vadd.f32 %v484_v6, %v462_v8  ;;  %426 = vst [vmem:[%s1590_s8 + $0xb0] sm:$0xff] %v398_v5 }
  0xc1   : > { %v434_v14 = vadd.f32 %v433_v10, %v1600_v24  ;;  %v486_v15 = vadd.f32 %v485_v11, %v463_v9  ;;  %v384_v16 = vpop.f32.mrf.mxu2  ;;  %v399_v18 = vpop.f32.mrf.mxu3 }
  0xc2   : > { %v385_v19 = vadd.f32 %v1584_v13, %v384_v16  ;;  %v400_v20 = vadd.f32 %v1584_v13, %v399_v18  ;;  %v469_v13 = vmul.f32 %v1596_v22, %v1596_v22 }
  0xc3   : > { %v487_v23 = vadd.f32 %v486_v15, %v464_v12  ;;  %v435_v17 = vadd.f32 %v434_v14, %v1617_v32  ;;  %v470_v32 = vmul.f32 %v1613_v30, %v1613_v30 }
  0xc4   : > { %421 = vst [vmem:[%s1590_s8 + $0x88] sm:$0xff] %v385_v19  ;;  %v474_v55 = vmul.f32 %v385_v19, %v385_v19  ;;  %v480_v6 = vmul.f32 %v400_v20, %v400_v20 }
  0xc5   : > { %v436_v27 = vadd.f32 %v435_v17, %v365_v40  ;;  %v488_v28 = vadd.f32 %v487_v23, %v465_v21  ;;  %427 = vst [vmem:[%s1590_s8 + $0xb8] sm:$0xff] %v400_v20 }
  0xc7   : > { %v437_v24 = vadd.f32 %v436_v27, %v368_v49  ;;  %v489_v31 = vadd.f32 %v488_v28, %v466_v26 }
  0xc9   : > { %v438_v34 = vadd.f32 %v437_v24, %v370_v4  ;;  %v490_v36 = vadd.f32 %v489_v31, %v467_v29 }
  0xcb   : > { %v439_v37 = vadd.f32 %v438_v34, %v1596_v22  ;;  %v491_v39 = vadd.f32 %v490_v36, %v468_v35 }
  0xcd   : > { %v440_v42 = vadd.f32 %v439_v37, %v1613_v30  ;;  %v492_v40 = vadd.f32 %v491_v39, %v469_v13  ;;  %v475_v30 = vmul.f32 %v1603_v25, %v1603_v25 }
  0xcf   : > { %v493_v44 = vadd.f32 %v492_v40, %v470_v32  ;;  %v441_v45 = vadd.f32 %v440_v42, %v1630_v38  ;;  %v476_v38 = vmul.f32 %v1620_v33, %v1620_v33 }
  0xd1   : > { %v442_v48 = vadd.f32 %v441_v45, %v1644_v47  ;;  %v494_v49 = vadd.f32 %v493_v44, %v471_v43  ;;  %v477_v47 = vmul.f32 %v1635_v41, %v1635_v41 }
  0xd3   : > { %v443_v22 = vadd.f32 %v442_v48, %v383_v1  ;;  %v495_v52 = vadd.f32 %v494_v49, %v472_v46  ;;  %v479_v1 = vmul.f32 %v398_v5, %v398_v5 }
  0xd5   : > { %v496_v53 = vadd.f32 %v495_v52, %v473_v51  ;;  %v444_v54 = vadd.f32 %v443_v22, %v385_v19 }
  0xd7   : > { %v445_v56 = vadd.f32 %v444_v54, %v1603_v25  ;;  %v497_v57 = vadd.f32 %v496_v53, %v474_v55 }
  0xd9   : > { %v446_v58 = vadd.f32 %v445_v56, %v1620_v33  ;;  %v498_v59 = vadd.f32 %v497_v57, %v475_v30 }
  0xdb   : > { %v499_v60 = vadd.f32 %v498_v59, %v476_v38  ;;  %v447_v61 = vadd.f32 %v446_v58, %v1635_v41 }
  0xdd   : > { %v448_v63 = vadd.f32 %v447_v61, %v1649_v50  ;;  %v500_v0 = vadd.f32 %v499_v60, %v477_v47 }
  0xdf   : > { %v449_v25 = vadd.f32 %v448_v63, %v398_v5  ;;  %v501_v2 = vadd.f32 %v500_v0, %v478_v62 }
  0xe1   : > { %v502_v3 = vadd.f32 %v501_v2, %v479_v1  ;;  %v450_v4 = vadd.f32 %v449_v25, %v400_v20 }
  0xe3   : > { %v451_v33 = vrot.slane %v450_v4, 4  ;;  %v503_v7 = vadd.f32 %v502_v3, %v480_v6 }
  0xe5   : > { %v452_v8 = vadd.f32 %v451_v33, %v450_v4  ;;  %v504_v9 = vrot.slane %v503_v7, 4 }
  0xe7   : > { %v453_v10 = vrot.slane %v452_v8, 2  ;;  %v505_v11 = vadd.f32 %v504_v9, %v503_v7 }
  0xe9   : > { %v454_v12 = vadd.f32 %v453_v10, %v452_v8  ;;  %v506_v41 = vrot.slane %v505_v11, 2 }
  0xeb   : > { %v455_v14 = vrot.slane %v454_v12, 1  ;;  %v507_v15 = vadd.f32 %v506_v41, %v505_v11  ;;  %513 = sbr.rel (%p1135_p7) target bundleno = 242 (0xf2), region = 36 }
  0xed   : > { %v456_v16 = vadd.f32 %v455_v14, %v454_v12  ;;  %v508_v18 = vrot.slane %v507_v15, 1 }
  0xef   : > { %v509_v50 = vadd.f32 %v508_v18, %v507_v15 }
  0xf0   : > { %514 = vst [vmem:[#allocation3] sm:$0x1] %v456_v16 }
  0xf1   : > { %515 = vst [vmem:[#allocation4] sm:$0x1] %v509_v50 }
  0xf2 PF: > { %p1136_p8 = scmp.le.s32.totalorder %s1486_s12, 0 }
  0xf4   : > { %519 = sbr.rel (%p1136_p8) target bundleno = 254 (0xfe), region = 40 }
  0xf9   : > { %v520_v5 = vld [vmem:[#allocation3] sm:$0x1]  ;;  %v523_v19 = vld [vmem:[#allocation4] sm:$0x1] }
  0xfa   : > { %v521_v20 = vadd.f32 %v520_v5, %v456_v16  ;;  %v524_v21 = vadd.f32 %v523_v19, %v509_v50 }
  0xfc   : > { %522 = vst [vmem:[#allocation3] sm:$0x1] %v521_v20 }
  0xfd   : > { %525 = vst [vmem:[#allocation4] sm:$0x1] %v524_v21 }
  0xfe PF: > { %p1137_p9 = scmp.ne.s32.totalorder %s1486_s12, 2 }
 0x100   : > { %529 = sbr.rel (%p1137_p9) target bundleno = 357 (0x165), region = 44 }
 0x105   : > { %v530_v23 = vld [vmem:[#allocation3] sm:$0x1]  ;;  %v531_v17 = vld [vmem:[#allocation4] sm:$0x1]  ;;  %v1709_v35 = vld [vmem:[#allocation2 + $0x8] sm:$0xff] }
 0x106   : > { %v532_v26 = vmul.f32 0.0017361111, %v530_v23  ;;  %v533_v27 = vmul.f32 0.0017361111, %v531_v17  ;;  %v1707_v34 = vld [vmem:[#allocation2] sm:$0xff]  ;;  %v1711_v36 = vld [vmem:[#allocation2 + $0x10] sm:$0xff] }
 0x107   : > { %v1715_v37 = vld [vmem:[#allocation2 + $0x18] sm:$0xff]  ;;  %v1717_v39 = vld [vmem:[#allocation2 + $0x20] sm:$0xff]  ;;  %v1719_v32 = vld [vmem:[#allocation2 + $0x28] sm:$0xff] }
 0x108   : > { %v534_v28 = vmul.f32 %v532_v26, %v532_v26  ;;  %v1713_v13 = vperm.slane %v532_v26, 0  ;;  %v1721_v42 = vld [vmem:[#allocation2 + $0x30] sm:$0xff]  ;;  %v1724_v40 = vld [vmem:[#allocation2 + $0x38] sm:$0xff]  ;;  %v1726_v43 = vld [vmem:[#allocation2 + $0x40] sm:$0xff] }
 0x109   : > { %v1728_v44 = vld [vmem:[#allocation2 + $0x48] sm:$0xff]  ;;  %v1730_v45 = vld [vmem:[#allocation2 + $0x50] sm:$0xff]  ;;  %v1732_v46 = vld [vmem:[#allocation2 + $0x58] sm:$0xff] }
 0x10a   : > { %v535_v29 = vsub.f32 %v533_v27, %v534_v28  ;;  %v1734_v48 = vld [vmem:[#allocation2 + $0x60] sm:$0xff]  ;;  %v1736_v49 = vld [vmem:[#allocation2 + $0x68] sm:$0xff]  ;;  %v1738_v22 = vld [vmem:[#allocation2 + $0x70] sm:$0xff]  ;;  %v2302_v5 = vsub.f32 %v1711_v36, %v1713_v13  ;;  %v2306_v36 = vsub.f32 %v1721_v42, %v1713_v13  ;;  %v2308_v42 = vsub.f32 %v1726_v43, %v1713_v13 }
 0x10b   : > { %v1740_v51 = vld [vmem:[#allocation2 + $0x78] sm:$0xff]  ;;  %v1748_v55 = vld [vmem:[#allocation2 + $0x80] sm:$0xff]  ;;  %v1750_v30 = vld [vmem:[#allocation2 + $0x88] sm:$0xff] }
 0x10c   : > { %v536_v24 = vmax.f32 %v535_v29, 0.0  ;;  %v1752_v56 = vld [vmem:[#allocation2 + $0x90] sm:$0xff]  ;;  %v1762_v47 = vld [vmem:[#allocation2 + $0x98] sm:$0xff]  ;;  %v1764_v60 = vld [vmem:[#allocation2 + $0xa0] sm:$0xff] }
 0x10d   : > { %v1766_v61 = vld [vmem:[#allocation2 + $0xa8] sm:$0xff]  ;;  %v1776_v1 = vld [vmem:[#allocation2 + $0xb0] sm:$0xff]  ;;  %v1778_v2 = vld [vmem:[#allocation2 + $0xb8] sm:$0xff] }
 0x10e   : > { %v1705_v31 = vadd.f32 1e-05, %v536_v24  ;;  %v1780_v3 = vld [vmem:[#allocation2 + $0xc0] sm:$0xff]  ;;  %v1792_v9 = vld [vmem:[#allocation2 + $0xc8] sm:$0xff]  ;;  %v1794_v10 = vld [vmem:[#allocation2 + $0xd0] sm:$0xff] }
 0x10f   : > { %v1796_v11 = vld [vmem:[#allocation2 + $0xd8] sm:$0xff]  ;;  %v1806_v16 = vld [vmem:[#allocation2 + $0xe0] sm:$0xff]  ;;  %v1808_v18 = vld [vmem:[#allocation2 + $0xe8] sm:$0xff] }
 0x110   : > { %1462 = vrsqrt.f32 %v1705_v31  ;;  %v1810_v50 = vld [vmem:[#allocation2 + $0xf0] sm:$0xff]  ;;  %vm544_vm1 = vweird.f32 %v1705_v31  ;;  %v1818_v20 = vld [vmem:[#allocation2 + $0xf8] sm:$0xff]  ;;  %v1820_v21 = vld [vmem:[#allocation2 + $0x100] sm:$0xff] }
 0x111   : > { %v1822_v23 = vld [vmem:[#allocation2 + $0x108] sm:$0xff]  ;;  %v1831_v29 = vld [vmem:[#allocation2 + $0x110] sm:$0xff]  ;;  %v1833_v24 = vld [vmem:[#allocation2 + $0x118] sm:$0xff] }
 0x112   : > { %v1835_v19 = vld [vmem:[#allocation2 + $0x120] sm:$0xff]  ;;  %v1845_v15 = vld [vmem:[#allocation2 + $0x128] sm:$0xff]  ;;  %v1847_v28 = vld [vmem:[#allocation2 + $0x130] sm:$0xff] }
 0x113   : > { %v1849_v14 = vld [vmem:[#allocation2 + $0x138] sm:$0xff]  ;;  %v1865_v8 = vld [vmem:[#allocation2 + $0x140] sm:$0xff]  ;;  %v1877_v27 = vld [vmem:[#allocation2 + $0x150] sm:$0xff] }
 0x114   : > { %v1879_v6 = vld [vmem:[#allocation2 + $0x158] sm:$0xff]  ;;  %v1889_v33 = vld [vmem:[#allocation2 + $0x168] sm:$0xff]  ;;  %v1891_v63 = vld [vmem:[#allocation2 + $0x170] sm:$0xff] }
 0x115   : > { %2290 = vst [vmem:[#allocation5_spill] sm:$0xff] %v1879_v6  ;;  %v1893_v26 = vld [vmem:[#allocation2 + $0x178] sm:$0xff]  ;;  %v1903_v59 = vld [vmem:[#allocation2 + $0x180] sm:$0xff]  ;;  %v1905_v7 = vld [vmem:[#allocation2 + $0x188] sm:$0xff] }
 0x116   : > { %v1782_v4 = vpop.eup %1462  ;;  %2291 = vst [vmem:[#allocation6_spill] sm:$0xff] %v1889_v33  ;;  %v1907_v58 = vld [vmem:[#allocation2 + $0x190] sm:$0xff]  ;;  %v1916_v57 = vld [vmem:[#allocation2 + $0x198] sm:$0xff]  ;;  %v1920_v54 = vld [vmem:[#allocation2 + $0x1a8] sm:$0xff]  ;;  %v2300_v33 = vsub.f32 %v1707_v34, %v1713_v13  ;;  %v2304_v34 = vsub.f32 %v1717_v39, %v1713_v13 }
 0x117   : > { %v539_v12 = vmul.f32 %v1782_v4, %v1705_v31  ;;  %vm545_vm2 = vweird.f32 %v1782_v4  ;;  %2292 = vst [vmem:[#allocation7_spill] sm:$0xff] %v1891_v63  ;;  %v1918_v31 = vld [vmem:[#allocation2 + $0x1a0] sm:$0xff]  ;;  %v1930_v52 = vld [vmem:[#allocation2 + $0x1b0] sm:$0xff]  ;;  %v1932_v0 = vld [vmem:[#allocation2 + $0x1b8] sm:$0xff] }
 0x118   : > { %vm1855_vm3 = vmor %vm544_vm1, %vm545_vm2  ;;  %2293 = vst [vmem:[#allocation8_spill] sm:$0xff] %v1893_v26  ;;  %v1943_v63 = vld [vmem:[#allocation2 + $0x1c0] sm:$0xff] }
 0x119   : > { %v540_v17 = vmul.f32 %v1782_v4, %v539_v12  ;;  %v1881_v12 = vld [vmem:[#allocation2 + $0x160] sm:$0xff]  ;;  %2294 = vst [vmem:[#allocation9_spill] sm:$0xff] %v1918_v31 }
 0x11a   : > { %2295 = vst [vmem:[#allocation10_spill] sm:$0xff] %v1920_v54 }
 0x11b   : > { %v541_v41 = vmul.f32 0.5, %v540_v17  ;;  %v1867_v17 = vld [vmem:[#allocation2 + $0x148] sm:$0xff]  ;;  %2296 = vst [vmem:[#allocation11_spill] sm:$0xff] %v1930_v52 }
 0x11c   : > { %2297 = vst [vmem:[#allocation12_spill] sm:$0xff] %v1932_v0 }
 0x11d   : > { %v542_v25 = vsub.f32 1.5, %v541_v41  ;;  %2298 = vst [vmem:[#allocation13_spill] sm:$0xff] %v1943_v63  ;;  %v1945_v41 = vld [vmem:[#allocation2 + $0x1c8] sm:$0xff] }
 0x11e   : > { %2299 = vst [vmem:[#allocation14_spill] sm:$0xff] %v1945_v41 }
 0x11f   : > { %v543_v38 = vmul.f32 %v1782_v4, %v542_v25  ;;  %v2303_v25 = vsub.f32 %v1715_v37, %v1713_v13  ;;  %v2307_v37 = vsub.f32 %v1724_v40, %v1713_v13  ;;  %v2309_v40 = vsub.f32 %v1728_v44, %v1713_v13 }
 0x120   : > { %v2312_v44 = vsub.f32 %v1734_v48, %v1713_v13 }
 0x121   : > { %v547_v6 = vsel %vm1855_vm3, %v1782_v4, %v543_v38  ;;  %v2301_v4 = vsub.f32 %v1709_v35, %v1713_v13  ;;  %v2305_v35 = vsub.f32 %v1719_v32, %v1713_v13 }
 0x122   : > { %v1947_v26 = vperm.slane %v547_v6, 0 }
 0x124   : > { %v602_v38 = vmul.f32 %v1947_v26, %v2300_v33  ;;  %v603_v53 = vmul.f32 %v1947_v26, %v2301_v4  ;;  %v604_v62 = vmul.f32 %v1947_v26, %v2302_v5  ;;  %v605_v6 = vmul.f32 %v1947_v26, %v2303_v25 }
 0x125   : > { %v606_v33 = vmul.f32 %v1947_v26, %v2304_v34  ;;  %v607_v4 = vmul.f32 %v1947_v26, %v2305_v35  ;;  %v608_v5 = vmul.f32 %v1947_v26, %v2306_v36  ;;  %v609_v25 = vmul.f32 %v1947_v26, %v2307_v37 }
 0x126   : > { %v626_v41 = vmax.f32 %v602_v38, 0.0  ;;  %v627_v39 = vmax.f32 %v603_v53, 0.0  ;;  %v628_v63 = vmax.f32 %v604_v62, 0.0  ;;  %v629_v34 = vmax.f32 %v605_v6, 0.0 }
 0x127   : > { %v630_v0 = vmax.f32 %v606_v33, 0.0  ;;  %v631_v52 = vmax.f32 %v607_v4, 0.0  ;;  %v632_v32 = vmax.f32 %v608_v5, 0.0  ;;  %v633_v35 = vmax.f32 %v609_v25, 0.0 }
 0x128   : > { %v1204_v54 = vpack.c.bf16 %v627_v39, %v626_v41  ;;  %v1209_v31 = vpack.c.bf16 %v629_v34, %v628_v63  ;;  %v610_v36 = vmul.f32 %v1947_v26, %v2308_v42  ;;  %v611_v53 = vmul.f32 %v1947_v26, %v2309_v40 }
 0x129   : > { %v1214_v62 = vpack.c.bf16 %v631_v52, %v630_v0  ;;  %v1219_v38 = vpack.c.bf16 %v633_v35, %v632_v32  ;;  %v2310_v6 = vsub.f32 %v1730_v45, %v1713_v13  ;;  %v2311_v63 = vsub.f32 %v1732_v46, %v1713_v13 }
 0x12a   : > { %1205 = vst [vmem:[%s1563_s28] sm:$0xff] %v1204_v54   ;;  %v634_v41 = vmax.f32 %v610_v36, 0.0  ;;  %v635_v4 = vmax.f32 %v611_v53, 0.0  ;;  %v614_v52 = vmul.f32 %v1947_v26, %v2312_v44  ;;  %v2313_v0 = vsub.f32 %v1736_v49, %v1713_v13 }
 0x12b   : > { %v612_v33 = vmul.f32 %v1947_v26, %v2310_v6  ;;  %v613_v43 = vmul.f32 %v1947_v26, %v2311_v63  ;;  %1381 = vst [vmem:[%s1563_s28 + $0x8] sm:$0xff] %v1209_v31   ;;  %v2314_v37 = vsub.f32 %v1738_v22, %v1713_v13  ;;  %v2315_v25 = vsub.f32 %v1740_v51, %v1713_v13 }
 0x12c   : > { %v615_v45 = vmul.f32 %v1947_v26, %v2313_v0  ;;  %1382 = vst [vmem:[%s1563_s28 + $0x10] sm:$0xff] %v1214_v62   ;;  %v1224_v39 = vpack.c.bf16 %v635_v4, %v634_v41  ;;  %v638_v49 = vmax.f32 %v614_v52, 0.0  ;;  %v2316_v31 = vsub.f32 %v1748_v55, %v1713_v13 }
 0x12d   : > { %v636_v5 = vmax.f32 %v612_v33, 0.0  ;;  %v637_v46 = vmax.f32 %v613_v43, 0.0  ;;  %v616_v54 = vmul.f32 %v1947_v26, %v2314_v37  ;;  %v617_v48 = vmul.f32 %v1947_v26, %v2315_v25  ;;  %1383 = vst [vmem:[%s1563_s28 + $0x18] sm:$0xff] %v1219_v38  }
 0x12e   : > { %v639_v34 = vmax.f32 %v615_v45, 0.0  ;;  %v618_v32 = vmul.f32 %v1947_v26, %v2316_v31  ;;  %v2317_v51 = vsub.f32 %v1750_v30, %v1713_v13  ;;  %1384 = vst [vmem:[%s1563_s28 + $0x20] sm:$0xff] %v1224_v39   ;;  %v2318_v62 = vsub.f32 %v1752_v56, %v1713_v13 }
 0x12f   : > { %v1229_v22 = vpack.c.bf16 %v637_v46, %v636_v5  ;;  %v640_v35 = vmax.f32 %v616_v54, 0.0  ;;  %v641_v42 = vmax.f32 %v617_v48, 0.0  ;;  %v2319_v38 = vsub.f32 %v1762_v47, %v1713_v13 }
 0x130   : > { %v619_v36 = vmul.f32 %v1947_v26, %v2317_v51  ;;  %v1234_v40 = vpack.c.bf16 %v639_v34, %v638_v49  ;;  %v642_v53 = vmax.f32 %v618_v32, 0.0  ;;  %v620_v55 = vmul.f32 %v1947_v26, %v2318_v62 }
 0x131   : > { %v621_v6 = vmul.f32 %v1947_v26, %v2319_v38  ;;  %1385 = vst [vmem:[%s1563_s28 + $0x28] sm:$0xff] %v1229_v22   ;;  %v1239_v33 = vpack.c.bf16 %v641_v42, %v640_v35  ;;  %v2320_v30 = vsub.f32 %v1764_v60, %v1713_v13  ;;  %v2321_v41 = vsub.f32 %v1766_v61, %v1713_v13 }
 0x132   : > { %v643_v63 = vmax.f32 %v619_v36, 0.0  ;;  %1386 = vst [vmem:[%s1563_s28 + $0x30] sm:$0xff] %v1234_v40   ;;  %v644_v4 = vmax.f32 %v620_v55, 0.0  ;;  %v2322_v47 = vsub.f32 %v1776_v1, %v1713_v13  ;;  %v2323_v0 = vsub.f32 %v1778_v2, %v1713_v13 }
 0x133   : > { %v622_v43 = vmul.f32 %v1947_v26, %v2320_v30  ;;  %v623_v56 = vmul.f32 %v1947_v26, %v2321_v41  ;;  %v645_v44 = vmax.f32 %v621_v6, 0.0  ;;  %1387 = vst [vmem:[%s1563_s28 + $0x38] sm:$0xff] %v1239_v33   ;;  %v2324_v46 = vsub.f32 %v1780_v3, %v1713_v13 }
 0x134   : > { %v624_v52 = vmul.f32 %v1947_v26, %v2322_v47  ;;  %v625_v60 = vmul.f32 %v1947_v26, %v2323_v0  ;;  %v1244_v45 = vpack.c.bf16 %v643_v63, %v642_v53  ;;  %v2325_v2 = vsub.f32 %v1792_v9, %v1713_v13 }
 0x135   : > { %v646_v61 = vmax.f32 %v622_v43, 0.0  ;;  %v647_v5 = vmax.f32 %v623_v56, 0.0  ;;  %v747_v37 = vmul.f32 %v2324_v46, %v1947_v26  ;;  %v1249_v54 = vpack.c.bf16 %v645_v44, %v644_v4 }
 0x136   : > { %v648_v1 = vmax.f32 %v624_v52, 0.0  ;;  %v649_v25 = vmax.f32 %v625_v60, 0.0  ;;  %v748_v48 = vmul.f32 %v2325_v2, %v1947_v26  ;;  %1388 = vst [vmem:[%s1563_s28 + $0x40] sm:$0xff] %v1244_v45   ;;  %v2326_v34 = vsub.f32 %v1794_v10, %v1713_v13 }
 0x137   : > { %v1254_v39 = vpack.c.bf16 %v647_v5, %v646_v61  ;;  %v771_v49 = vmax.f32 %v747_v37, 0.0  ;;  %v2327_v3 = vsub.f32 %v1796_v11, %v1713_v13  ;;  %1389 = vst [vmem:[%s1563_s28 + $0x48] sm:$0xff] %v1249_v54   ;;  %v2328_v9 = vsub.f32 %v1806_v16, %v1713_v13 }
 0x138   : > { %v749_v31 = vmul.f32 %v2326_v34, %v1947_v26  ;;  %v1259_v22 = vpack.c.bf16 %v649_v25, %v648_v1  ;;  %v772_v35 = vmax.f32 %v748_v48, 0.0  ;;  %v2329_v51 = vsub.f32 %v1808_v18, %v1713_v13 }
 0x139   : > { %v750_v32 = vmul.f32 %v2327_v3, %v1947_v26  ;;  %v751_v42 = vmul.f32 %v2328_v9, %v1947_v26  ;;  %1390 = vst [vmem:[%s1563_s28 + $0x50] sm:$0xff] %v1254_v39   ;;  %v2330_v11 = vsub.f32 %v1810_v50, %v1713_v13  ;;  %v2331_v62 = vsub.f32 %v1818_v20, %v1713_v13 }
 0x13a   : > { %v752_v10 = vmul.f32 %v2329_v51, %v1947_v26  ;;  %v773_v36 = vmax.f32 %v749_v31, 0.0  ;;  %1391 = vst [vmem:[%s1563_s28 + $0x58] sm:$0xff] %v1259_v22   ;;  %v1264_v55 = vpack.c.bf16 %v772_v35, %v771_v49  ;;  %v2332_v6 = vsub.f32 %v1820_v21, %v1713_v13 }
 0x13b   : > { %v774_v40 = vmax.f32 %v750_v32, 0.0  ;;  %v753_v53 = vmul.f32 %v2330_v11, %v1947_v26  ;;  %v754_v16 = vmul.f32 %v2331_v62, %v1947_v26  ;;  %v775_v38 = vmax.f32 %v751_v42, 0.0 }
 0x13c   : > { %v776_v18 = vmax.f32 %v752_v10, 0.0  ;;  %v755_v33 = vmul.f32 %v2332_v6, %v1947_v26  ;;  %v2333_v43 = vsub.f32 %v1822_v23, %v1713_v13  ;;  %1392 = vst [vmem:[%s1563_s28 + $0x60] sm:$0xff] %v1264_v55   ;;  %v2334_v4 = vsub.f32 %v1831_v29, %v1713_v13  ;;  %v2346_v10 = vld [vmem:[#allocation6_spill] sm:$0xff]  ;;  %v2350_v55 = vld [vmem:[#allocation8_spill] sm:$0xff] }
 0x13d   : > { %v1269_v63 = vpack.c.bf16 %v774_v40, %v773_v36  ;;  %v777_v30 = vmax.f32 %v753_v53, 0.0  ;;  %v778_v50 = vmax.f32 %v754_v16, 0.0  ;;  %v2335_v21 = vsub.f32 %v1833_v24, %v1713_v13  ;;  %v2348_v53 = vld [vmem:[#allocation7_spill] sm:$0xff] }
 0x13e   : > { %v756_v20 = vmul.f32 %v2333_v43, %v1947_v26  ;;  %v1274_v41 = vpack.c.bf16 %v776_v18, %v775_v38  ;;  %v779_v56 = vmax.f32 %v755_v33, 0.0  ;;  %v757_v44 = vmul.f32 %v2334_v4, %v1947_v26 }
 0x13f   : > { %v758_v47 = vmul.f32 %v2335_v21, %v1947_v26  ;;  %1393 = vst [vmem:[%s1563_s28 + $0x68] sm:$0xff] %v1269_v63   ;;  %v1279_v52 = vpack.c.bf16 %v778_v50, %v777_v30  ;;  %v2336_v23 = vsub.f32 %v1835_v19, %v1713_v13  ;;  %v2337_v45 = vsub.f32 %v1845_v15, %v1713_v13 }
 0x140   : > { %v780_v0 = vmax.f32 %v756_v20, 0.0  ;;  %1394 = vst [vmem:[%s1563_s28 + $0x70] sm:$0xff] %v1274_v41   ;;  %v781_v61 = vmax.f32 %v757_v44, 0.0  ;;  %v2338_v24 = vsub.f32 %v1847_v28, %v1713_v13  ;;  %v2339_v37 = vsub.f32 %v1849_v14, %v1713_v13 }
 0x141   : > { %v759_v60 = vmul.f32 %v2336_v23, %v1947_v26  ;;  %v760_v29 = vmul.f32 %v2337_v45, %v1947_v26  ;;  %v782_v5 = vmax.f32 %v758_v47, 0.0  ;;  %1395 = vst [vmem:[%s1563_s28 + $0x78] sm:$0xff] %v1279_v52   ;;  %v2340_v25 = vsub.f32 %v1865_v8, %v1713_v13  ;;  %v2343_v8 = vld [vmem:[#allocation5_spill] sm:$0xff] }
 0x142   : > { %v761_v46 = vmul.f32 %v2338_v24, %v1947_v26  ;;  %v762_v19 = vmul.f32 %v2339_v37, %v1947_v26  ;;  %v1284_v54 = vpack.c.bf16 %v780_v0, %v779_v56  ;;  %v2341_v49 = vsub.f32 %v1867_v17, %v1713_v13 }
 0x143   : > { %v783_v1 = vmax.f32 %v759_v60, 0.0  ;;  %v784_v15 = vmax.f32 %v760_v29, 0.0  ;;  %v763_v2 = vmul.f32 %v2340_v25, %v1947_v26  ;;  %v1289_v48 = vpack.c.bf16 %v782_v5, %v781_v61  ;;  %v2358_v29 = vld [vmem:[#allocation10_spill] sm:$0xff]  ;;  %v856_v25 = vld [vmem:[#allocation2 + $0x1d8] sm:$0xff] }
 0x144   : > { %v785_v39 = vmax.f32 %v761_v46, 0.0  ;;  %v786_v28 = vmax.f32 %v762_v19, 0.0  ;;  %v764_v14 = vmul.f32 %v2341_v49, %v1947_v26  ;;  %1396 = vst [vmem:[%s1563_s28 + $0x80] sm:$0xff] %v1284_v54   ;;  %v2342_v3 = vsub.f32 %v1877_v27, %v1713_v13  ;;  %v2360_v46 = vld [vmem:[#allocation11_spill] sm:$0xff]  ;;  %v2362_v19 = vld [vmem:[#allocation12_spill] sm:$0xff] }
 0x145   : > { %v1294_v34 = vpack.c.bf16 %v784_v15, %v783_v1  ;;  %v787_v31 = vmax.f32 %v763_v2, 0.0  ;;  %v2344_v22 = vsub.f32 %v2343_v8, %v1713_v13  ;;  %1397 = vst [vmem:[%s1563_s28 + $0x88] sm:$0xff] %v1289_v48   ;;  %v2345_v17 = vsub.f32 %v1881_v12, %v1713_v13  ;;  %v855_v15 = vld [vmem:[#allocation2 + $0x1d0] sm:$0xff] }
 0x146   : > { %v765_v32 = vmul.f32 %v2342_v3, %v1947_v26  ;;  %v1299_v9 = vpack.c.bf16 %v786_v28, %v785_v39  ;;  %v788_v42 = vmax.f32 %v764_v14, 0.0  ;;  %v2347_v36 = vsub.f32 %v2346_v10, %v1713_v13  ;;  %v2364_v28 = vld [vmem:[#allocation13_spill] sm:$0xff] }
 0x147   : > { %v766_v35 = vmul.f32 %v2344_v22, %v1947_v26  ;;  %v767_v51 = vmul.f32 %v2345_v17, %v1947_v26  ;;  %1398 = vst [vmem:[%s1563_s28 + $0x90] sm:$0xff] %v1294_v34   ;;  %v2349_v62 = vsub.f32 %v2348_v53, %v1713_v13  ;;  %v2351_v38 = vsub.f32 %v2350_v55, %v1713_v13  ;;  %v857_v34 = vld [vmem:[#allocation2 + $0x1e0] sm:$0xff]  ;;  %v2366_v22 = vld [vmem:[#allocation14_spill] sm:$0xff]  ;;  %v860_v17 = vld [vmem:[#allocation2 + $0x1f8] sm:$0xff] }
 0x148   : > { %v768_v27 = vmul.f32 %v2347_v36, %v1947_v26  ;;  %v789_v40 = vmax.f32 %v765_v32, 0.0  ;;  %1399 = vst [vmem:[%s1563_s28 + $0x98] sm:$0xff] %v1299_v9   ;;  %v1304_v18 = vpack.c.bf16 %v788_v42, %v787_v31  ;;  %v2352_v63 = vsub.f32 %v1903_v59, %v1713_v13  ;;  %v858_v31 = vld [vmem:[#allocation2 + $0x1e8] sm:$0xff]  ;;  %v859_v42 = vld [vmem:[#allocation2 + $0x1f0] sm:$0xff] }
 0x149   : > { %v790_v11 = vmax.f32 %v766_v35, 0.0  ;;  %v769_v16 = vmul.f32 %v2349_v62, %v1947_v26  ;;  %v770_v12 = vmul.f32 %v2351_v38, %v1947_v26  ;;  %v791_v6 = vmax.f32 %v767_v51, 0.0 }
 0x14a   : > { %v792_v33 = vmax.f32 %v768_v27, 0.0  ;;  %v893_v30 = vmul.f32 %v2352_v63, %v1947_v26  ;;  %v2353_v41 = vsub.f32 %v1905_v7, %v1713_v13  ;;  %1400 = vst [vmem:[%s1563_s28 + $0xa0] sm:$0xff] %v1304_v18   ;;  %v2354_v21 = vsub.f32 %v1907_v58, %v1713_v13  ;;  %v2356_v7 = vld [vmem:[#allocation9_spill] sm:$0xff] }
 0x14b   : > { %v1309_v50 = vpack.c.bf16 %v790_v11, %v789_v40  ;;  %v793_v43 = vmax.f32 %v769_v16, 0.0  ;;  %v794_v20 = vmax.f32 %v770_v12, 0.0  ;;  %v2355_v59 = vsub.f32 %v1916_v57, %v1713_v13  ;;  %v861_v40 = vld [vmem:[#allocation2 + $0x200] sm:$0xff] }
 0x14c   : > { %v894_v56 = vmul.f32 %v2353_v41, %v1947_v26  ;;  %v1314_v4 = vpack.c.bf16 %v792_v33, %v791_v6  ;;  %v917_v44 = vmax.f32 %v893_v30, 0.0  ;;  %v895_v47 = vmul.f32 %v2354_v21, %v1947_v26  ;;  %v862_v6 = vld [vmem:[#allocation2 + $0x208] sm:$0xff] }
 0x14d   : > { %v896_v52 = vmul.f32 %v2355_v59, %v1947_v26  ;;  %1401 = vst [vmem:[%s1563_s28 + $0xa8] sm:$0xff] %v1309_v50   ;;  %v1319_v0 = vpack.c.bf16 %v794_v20, %v793_v43  ;;  %v2357_v60 = vsub.f32 %v2356_v7, %v1713_v13  ;;  %v2359_v61 = vsub.f32 %v2358_v29, %v1713_v13  ;;  %v863_v43 = vld [vmem:[#allocation2 + $0x210] sm:$0xff] }
 0x14e   : > { %v918_v23 = vmax.f32 %v894_v56, 0.0  ;;  %1402 = vst [vmem:[%s1563_s28 + $0xb0] sm:$0xff] %v1314_v4   ;;  %v919_v58 = vmax.f32 %v895_v47, 0.0  ;;  %v2361_v57 = vsub.f32 %v2360_v46, %v1713_v13  ;;  %v2363_v54 = vsub.f32 %v2362_v19, %v1713_v13 }
 0x14f   : > { %v897_v45 = vmul.f32 %v2357_v60, %v1947_v26  ;;  %v898_v5 = vmul.f32 %v2359_v61, %v1947_v26  ;;  %v920_v24 = vmax.f32 %v896_v52, 0.0  ;;  %1403 = vst [vmem:[%s1563_s28 + $0xb8] sm:$0xff] %v1319_v0   ;;  %v2365_v49 = vsub.f32 %v2364_v28, %v1713_v13  ;;  %v865_v0 = vld [vmem:[#allocation2 + $0x220] sm:$0xff]  ;;  %v867_v61 = vld [vmem:[#allocation2 + $0x230] sm:$0xff] }
 0x150   : > { %v899_v37 = vmul.f32 %v2361_v57, %v1947_v26  ;;  %v900_v1 = vmul.f32 %v2363_v54, %v1947_v26  ;;  %v1324_v2 = vpack.c.bf16 %v918_v23, %v917_v44  ;;  %v2367_v35 = vsub.f32 %v2366_v22, %v1713_v13  ;;  %v864_v44 = vld [vmem:[#allocation2 + $0x218] sm:$0xff]  ;;  %v866_v23 = vld [vmem:[#allocation2 + $0x228] sm:$0xff] }
 0x151   : > { %v921_v48 = vmax.f32 %v897_v45, 0.0  ;;  %v922_v39 = vmax.f32 %v898_v5, 0.0  ;;  %v901_v14 = vmul.f32 %v2365_v49, %v1947_v26  ;;  %v1329_v3 = vpack.c.bf16 %v920_v24, %v919_v58  ;;  %v868_v5 = vld [vmem:[#allocation2 + $0x238] sm:$0xff] }
 0x152   : > { %v923_v32 = vmax.f32 %v899_v37, 0.0  ;;  %v924_v8 = vmax.f32 %v900_v1, 0.0  ;;  %v902_v9 = vmul.f32 %v2367_v35, %v1947_v26  ;;  %1404 = vst [vmem:[%s1563_s28 + $0xc0] sm:$0xff] %v1324_v2   ;;  %v879_v36 = vsub.f32 %v855_v15, %v1713_v13 }
 0x153   : > { %v1334_v51 = vpack.c.bf16 %v922_v39, %v921_v48  ;;  %v925_v10 = vmax.f32 %v901_v14, 0.0  ;;  %v880_v27 = vsub.f32 %v856_v25, %v1713_v13  ;;  %1405 = vst [vmem:[%s1563_s28 + $0xc8] sm:$0xff] %v1329_v3   ;;  %v881_v62 = vsub.f32 %v857_v34, %v1713_v13 }
 0x154   : > { %v1339_v11 = vpack.c.bf16 %v924_v8, %v923_v32  ;;  %v926_v53 = vmax.f32 %v902_v9, 0.0  ;;  %v882_v16 = vsub.f32 %v858_v31, %v1713_v13  ;;  %v903_v55 = vmul.f32 %v879_v36, %v1947_v26 }
 0x155   : > { %1406 = vst [vmem:[%s1563_s28 + $0xd0] sm:$0xff] %v1334_v51   ;;  %v904_v38 = vmul.f32 %v880_v27, %v1947_v26  ;;  %v883_v12 = vsub.f32 %v859_v42, %v1713_v13  ;;  %v884_v18 = vsub.f32 %v860_v17, %v1713_v13  ;;  %v905_v63 = vmul.f32 %v881_v62, %v1947_v26 }
 0x156   : > { %1407 = vst [vmem:[%s1563_s28 + $0xd8] sm:$0xff] %v1339_v11   ;;  %v1344_v33 = vpack.c.bf16 %v926_v53, %v925_v10  ;;  %v906_v30 = vmul.f32 %v882_v16, %v1947_v26  ;;  %v885_v50 = vsub.f32 %v861_v40, %v1713_v13  ;;  %v927_v20 = vmax.f32 %v903_v55, 0.0 }
 0x157   : > { %v928_v41 = vmax.f32 %v904_v38, 0.0  ;;  %v907_v56 = vmul.f32 %v883_v12, %v1947_v26  ;;  %v908_v4 = vmul.f32 %v884_v18, %v1947_v26  ;;  %v929_v21 = vmax.f32 %v905_v63, 0.0 }
 0x158   : > { %1408 = vst [vmem:[%s1563_s28 + $0xe0] sm:$0xff] %v1344_v33   ;;  %v930_v47 = vmax.f32 %v906_v30, 0.0  ;;  %v886_v59 = vsub.f32 %v862_v6, %v1713_v13  ;;  %v909_v52 = vmul.f32 %v885_v50, %v1947_v26  ;;  %v887_v29 = vsub.f32 %v863_v43, %v1713_v13 }
 0x159   : > { %v1349_v7 = vpack.c.bf16 %v928_v41, %v927_v20  ;;  %v931_v60 = vmax.f32 %v907_v56, 0.0  ;;  %v932_v45 = vmax.f32 %v908_v4, 0.0  ;;  %v888_v57 = vsub.f32 %v864_v44, %v1713_v13 }
 0x15a   : > { %v1354_v58 = vpack.c.bf16 %v930_v47, %v929_v21  ;;  %v910_v24 = vmul.f32 %v886_v59, %v1947_v26  ;;  %v933_v46 = vmax.f32 %v909_v52, 0.0  ;;  %v911_v19 = vmul.f32 %v887_v29, %v1947_v26 }
 0x15b   : > { %1409 = vst [vmem:[%s1563_s28 + $0xe8] sm:$0xff] %v1349_v7   ;;  %v1359_v37 = vpack.c.bf16 %v932_v45, %v931_v60  ;;  %v889_v54 = vsub.f32 %v865_v0, %v1713_v13  ;;  %v890_v1 = vsub.f32 %v866_v23, %v1713_v13  ;;  %v912_v25 = vmul.f32 %v888_v57, %v1947_v26 }
 0x15c   : > { %1410 = vst [vmem:[%s1563_s28 + $0xf0] sm:$0xff] %v1354_v58   ;;  %v934_v15 = vmax.f32 %v910_v24, 0.0  ;;  %v891_v2 = vsub.f32 %v867_v61, %v1713_v13  ;;  %v892_v48 = vsub.f32 %v868_v5, %v1713_v13  ;;  %v935_v39 = vmax.f32 %v911_v19, 0.0 }
 0x15d   : > { %1411 = vst [vmem:[%s1563_s28 + $0xf8] sm:$0xff] %v1359_v37   ;;  %v913_v28 = vmul.f32 %v889_v54, %v1947_v26  ;;  %v914_v49 = vmul.f32 %v890_v1, %v1947_v26  ;;  %v936_v34 = vmax.f32 %v912_v25, 0.0 }
 0x15e   : > { %v1364_v14 = vpack.c.bf16 %v934_v15, %v933_v46  ;;  %v915_v31 = vmul.f32 %v891_v2, %v1947_v26  ;;  %v916_v3 = vmul.f32 %v892_v48, %v1947_v26 }
 0x15f   : > { %v937_v32 = vmax.f32 %v913_v28, 0.0  ;;  %v938_v8 = vmax.f32 %v914_v49, 0.0  ;;  %v1369_v22 = vpack.c.bf16 %v936_v34, %v935_v39 }
 0x160   : > { %1412 = vst [vmem:[%s1563_s28 + $0x100] sm:$0xff] %v1364_v14   ;;  %v939_v13 = vmax.f32 %v915_v31, 0.0  ;;  %v940_v35 = vmax.f32 %v916_v3, 0.0 }
 0x161   : > { %v1374_v9 = vpack.c.bf16 %v938_v8, %v937_v32  ;;  %1413 = vst [vmem:[%s1563_s28 + $0x108] sm:$0xff] %v1369_v22  }
 0x162   : > { %v1379_v42 = vpack.c.bf16 %v940_v35, %v939_v13 }
 0x163   : > { %1414 = vst [vmem:[%s1563_s28 + $0x110] sm:$0xff] %v1374_v9  }
 0x164   : > { %1415 = vst [vmem:[%s1563_s28 + $0x118] sm:$0xff] %v1379_v42  }
 0x165 PF: > { %s13_s16 = sadd.s32 1, %s1502_s16   ;;  %s2368_s12 = smov %s1494_s14 }
 0x166   : > { %p10_p10 = scmp.ge.s32.totalorder %s13_s16, 8   ;;  %s2369_s13 = smov %s1498_s15 }
 0x167   : > { %s2370_s14 = smov %s2373_s17  ;;  %s2371_s15 = smov %s2377_s18 }
 0x168   :  { %12 = sbr.rel (!%p10_p10) target bundleno = 3 (0x3), region = 79 }

// kernel: _lambda_.7
= control target key start
LH: loop header
LB: loop body
LE: loop exit
PB: predicated region body
PF: predicated region fallthrough
CT: control target
= control target key end

     0   :  { %s1678_s12 = smov 0   ;;  %s1680_s13 = smov 0   ;;  %s2035_s0 = inlined_call_operand.vmem [shape: bf16[2,144,512], index: 0, kind: input, shape index: {}]   ;;  %s2036_s1 = inlined_call_operand.vmem [shape: bf16[512,128], index: 1, kind: input, shape index: {}]   ;;  %s2037_s2 = inlined_call_operand.vmem [shape: f32[1,128], index: 2, kind: input, shape index: {}]   ;;  %s2038_s3 = inlined_call_operand.vmem [shape: bf16[2,1,144,128], index: 3, kind: output, shape index: {}]  }
   0x1   :  { %s1682_s14 = smov 0  }
   0x2 LB: > { %s25_s15 = sadd.s32 1, %s1652_s13  ;;  %p1207_p0 = scmp.ge.s32.totalorder %s1656_s14, 1  ;;  %s1656_s14 = sphi %s1682_s14, %s13_s14   ;;  %s1652_s13 = sphi %s1680_s13, %s2040_s13   ;;  %s1648_s12 = sphi %s1678_s12, %s2039_s12  }
   0x3   : > { %p27_p1 = scmp.ge.s32.totalorder %s25_s15, 2  ;;  %p157_p2 = scmp.lt.s32.totalorder %s1656_s14, 3 }
   0x5   : > { %s2042_s15 = smov (%p27_p1, %s25_s15), 0  ;;  %p158_p3 = pnand %p1207_p0, %p157_p2 }
   0x6   : > { %p187_p4 = scmp.lt.s32.totalorder (!%p158_p3), %s1648_s12, 1 }
   0x7   : > { %161 = sbr.rel (%p158_p3) target bundleno = 390 (0x186), region = 32 }
   0xc   : > { %v1527_v0 = vld [vmem:[%s2036_s1 + $0x38] sm:$0xff]  ;;  %v1526_v4 = vld [vmem:[%s2036_s1 + $0x30] sm:$0xff]  ;;  %v1525_v8 = vld [vmem:[%s2036_s1 + $0x28] sm:$0xff]  ;;  %s2044_s12 = smov (!%p187_p4, %s1648_s12), 1 }
   0xd   : > { %v1535_v1 = vld [vmem:[%s2036_s1 + $0x78] sm:$0xff]  ;;  %678 = vmatpush.bf16.msra.mxu0 %v1527_v0  ;;  %v1534_v5 = vld [vmem:[%s2036_s1 + $0x70] sm:$0xff]  ;;  %v1533_v9 = vld [vmem:[%s2036_s1 + $0x68] sm:$0xff]  ;;  %s1605_s10 = smul.u32 288, %s2044_s12 }
   0xe   : > { %v1543_v2 = vld [vmem:[%s2036_s1 + $0xb8] sm:$0xff]  ;;  %732 = vmatpush.bf16.msra.mxu1 %v1535_v1  ;;  %v1542_v6 = vld [vmem:[%s2036_s1 + $0xb0] sm:$0xff]  ;;  %v1541_v10 = vld [vmem:[%s2036_s1 + $0xa8] sm:$0xff]  ;;  %s1606_s17 = smul.u32 72, %s2044_s12 }
   0xf   : > { %v1551_v3 = vld [vmem:[%s2036_s1 + $0xf8] sm:$0xff]  ;;  %786 = vmatpush.bf16.msra.mxu2 %v1543_v2  ;;  %v1550_v7 = vld [vmem:[%s2036_s1 + $0xf0] sm:$0xff]  ;;  %v1549_v11 = vld [vmem:[%s2036_s1 + $0xe8] sm:$0xff]  ;;  %s1784_s25 = scalar_lea.vmem %s2035_s0, %s1605_s10 }
  0x10   : > { %840 = vmatpush.bf16.msra.mxu3 %v1551_v3  ;;  %v1524_v12 = vld [vmem:[%s2036_s1 + $0x20] sm:$0xff]  ;;  %v1523_v16 = vld [vmem:[%s2036_s1 + $0x18] sm:$0xff]  ;;  %v1522_v20 = vld [vmem:[%s2036_s1 + $0x10] sm:$0xff]  ;;  %s201_s20 = scalar_lea.vmem %s2038_s3, %s1606_s17 }
  0x11   : > { %679 = vmatpush.bf16.msra.mxu0 %v1526_v4  ;;  %v1532_v13 = vld [vmem:[%s2036_s1 + $0x60] sm:$0xff]  ;;  %v1531_v17 = vld [vmem:[%s2036_s1 + $0x58] sm:$0xff]  ;;  %v1530_v21 = vld [vmem:[%s2036_s1 + $0x50] sm:$0xff] }
  0x12   : > { %733 = vmatpush.bf16.msra.mxu1 %v1534_v5  ;;  %v1540_v14 = vld [vmem:[%s2036_s1 + $0xa0] sm:$0xff]  ;;  %v1539_v18 = vld [vmem:[%s2036_s1 + $0x98] sm:$0xff]  ;;  %v1538_v22 = vld [vmem:[%s2036_s1 + $0x90] sm:$0xff] }
  0x13   : > { %787 = vmatpush.bf16.msra.mxu2 %v1542_v6  ;;  %v1548_v15 = vld [vmem:[%s2036_s1 + $0xe0] sm:$0xff]  ;;  %v1547_v19 = vld [vmem:[%s2036_s1 + $0xd8] sm:$0xff]  ;;  %v1546_v23 = vld [vmem:[%s2036_s1 + $0xd0] sm:$0xff] }
  0x14   : > { %841 = vmatpush.bf16.msra.mxu3 %v1550_v7  ;;  %v1521_v24 = vld [vmem:[%s2036_s1 + $0x8] sm:$0xff]  ;;  %v1520_v28 = vld [vmem:[%s2036_s1] sm:$0xff]  ;;  %v1486_v33 = vld [vmem:[%s1784_s25 + $0xc] sm:$0xf0] }
  0x15   : > { %680 = vmatpush.bf16.msra.mxu0 %v1525_v8  ;;  %v1529_v25 = vld [vmem:[%s2036_s1 + $0x48] sm:$0xff]  ;;  %v1528_v29 = vld [vmem:[%s2036_s1 + $0x40] sm:$0xff]  ;;  %v1214_v35 = vld [vmem:[%s1784_s25 + $0x10] sm:$0xf0] }
  0x16   : > { %734 = vmatpush.bf16.msra.mxu1 %v1533_v9  ;;  %v1537_v26 = vld [vmem:[%s2036_s1 + $0x88] sm:$0xff]  ;;  %v1536_v30 = vld [vmem:[%s2036_s1 + $0x80] sm:$0xff]  ;;  %v1487_v37 = vld [vmem:[%s1784_s25 + $0x14] sm:$0xf0] }
  0x17   : > { %788 = vmatpush.bf16.msra.mxu2 %v1541_v10  ;;  %v1545_v27 = vld [vmem:[%s2036_s1 + $0xc8] sm:$0xff]  ;;  %v1544_v31 = vld [vmem:[%s2036_s1 + $0xc0] sm:$0xff]  ;;  %v1222_v39 = vld [vmem:[%s1784_s25 + $0x18] sm:$0xf0] }
  0x18   : > { %842 = vmatpush.bf16.msra.mxu3 %v1549_v11  ;;  %v1212_v32 = vld [vmem:[%s1784_s25] sm:$0xf]  ;;  %v1484_v34 = vld [vmem:[%s1784_s25 + $0x4] sm:$0xf]  ;;  %v1220_v36 = vld [vmem:[%s1784_s25 + $0x8] sm:$0xf] }
  0x19   : > { %681 = vmatpush.bf16.msra.mxu0 %v1524_v12  ;;  %v1485_v38 = vld [vmem:[%s1784_s25 + $0xc] sm:$0xf]  ;;  %v1213_v40 = vor.u32 %v1486_v33, %v1212_v32  ;;  %v1217_v41 = vor.u32 %v1484_v34, %v1214_v35  ;;  %v1221_v42 = vor.u32 %v1487_v37, %v1220_v36  ;;  %v1228_v44 = vld [vmem:[%s1784_s25 + $0x20] sm:$0xf]  ;;  %v1490_v45 = vld [vmem:[%s1784_s25 + $0x2c] sm:$0xf0] }
  0x1a   : > { %735 = vmatpush.bf16.msra.mxu1 %v1532_v13  ;;  %v1225_v43 = vor.u32 %v1485_v38, %v1222_v39  ;;  %v1488_v46 = vld [vmem:[%s1784_s25 + $0x24] sm:$0xf]  ;;  %v1230_v47 = vld [vmem:[%s1784_s25 + $0x30] sm:$0xf0]  ;;  %v1236_v48 = vld [vmem:[%s1784_s25 + $0x28] sm:$0xf]  ;;  %v1229_v52 = vor.u32 %v1490_v45, %v1228_v44 }
  0x1b   : > { %789 = vmatpush.bf16.msra.mxu2 %v1540_v14  ;;  %v1491_v49 = vld [vmem:[%s1784_s25 + $0x34] sm:$0xf0]  ;;  %v1489_v50 = vld [vmem:[%s1784_s25 + $0x2c] sm:$0xf]  ;;  %v1238_v51 = vld [vmem:[%s1784_s25 + $0x38] sm:$0xf0]  ;;  %v1233_v53 = vor.u32 %v1488_v46, %v1230_v47 }
  0x1c   : > { %843 = vmatpush.bf16.msra.mxu3 %v1548_v15  ;;  %v1237_v54 = vor.u32 %v1491_v49, %v1236_v48  ;;  %v1241_v55 = vor.u32 %v1489_v50, %v1238_v51  ;;  %v1244_v56 = vld [vmem:[%s1784_s25 + $0x40] sm:$0xf]  ;;  %v1494_v57 = vld [vmem:[%s1784_s25 + $0x4c] sm:$0xf0]  ;;  %v1492_v58 = vld [vmem:[%s1784_s25 + $0x44] sm:$0xf] }
  0x1d   : > { %682 = vmatpush.bf16.msra.mxu0 %v1523_v16  ;;  %v1246_v59 = vld [vmem:[%s1784_s25 + $0x50] sm:$0xf0]  ;;  %v1252_v60 = vld [vmem:[%s1784_s25 + $0x48] sm:$0xf]  ;;  %v1495_v61 = vld [vmem:[%s1784_s25 + $0x54] sm:$0xf0]  ;;  %v1245_v0 = vor.u32 %v1494_v57, %v1244_v56 }
  0x1e   : > { %736 = vmatpush.bf16.msra.mxu1 %v1531_v17  ;;  %v1493_v62 = vld [vmem:[%s1784_s25 + $0x4c] sm:$0xf]  ;;  %v1254_v63 = vld [vmem:[%s1784_s25 + $0x58] sm:$0xf0]  ;;  %v1249_v1 = vor.u32 %v1492_v58, %v1246_v59  ;;  %v1253_v2 = vor.u32 %v1495_v61, %v1252_v60  ;;  %v1260_v4 = vld [vmem:[%s1784_s25 + $0x60] sm:$0xf] }
  0x1f   : > { %790 = vmatpush.bf16.msra.mxu2 %v1539_v18  ;;  %v1257_v3 = vor.u32 %v1493_v62, %v1254_v63  ;;  %v1498_v5 = vld [vmem:[%s1784_s25 + $0x6c] sm:$0xf0]  ;;  %v1496_v6 = vld [vmem:[%s1784_s25 + $0x64] sm:$0xf]  ;;  %v1262_v7 = vld [vmem:[%s1784_s25 + $0x70] sm:$0xf0] }
  0x20   : > { %844 = vmatpush.bf16.msra.mxu3 %v1547_v19  ;;  %v1268_v8 = vld [vmem:[%s1784_s25 + $0x68] sm:$0xf]  ;;  %v1499_v9 = vld [vmem:[%s1784_s25 + $0x74] sm:$0xf0]  ;;  %v1497_v10 = vld [vmem:[%s1784_s25 + $0x6c] sm:$0xf]  ;;  %v1261_v12 = vor.u32 %v1498_v5, %v1260_v4  ;;  %v1265_v13 = vor.u32 %v1496_v6, %v1262_v7 }
  0x21   : > { %683 = vmatpush.bf16.msra.mxu0 %v1522_v20  ;;  %v1270_v11 = vld [vmem:[%s1784_s25 + $0x78] sm:$0xf0]  ;;  %v1269_v14 = vor.u32 %v1499_v9, %v1268_v8  ;;  %v1276_v16 = vld [vmem:[%s1784_s25 + $0x80] sm:$0xf]  ;;  %v1502_v17 = vld [vmem:[%s1784_s25 + $0x8c] sm:$0xf0] }
  0x22   : > { %737 = vmatpush.bf16.msra.mxu1 %v1530_v21  ;;  %v1273_v15 = vor.u32 %v1497_v10, %v1270_v11  ;;  %v1500_v18 = vld [vmem:[%s1784_s25 + $0x84] sm:$0xf]  ;;  %v1278_v19 = vld [vmem:[%s1784_s25 + $0x90] sm:$0xf0]  ;;  %v1284_v20 = vld [vmem:[%s1784_s25 + $0x88] sm:$0xf] }
  0x23   : > { %791 = vmatpush.bf16.msra.mxu2 %v1538_v22  ;;  %v1503_v21 = vld [vmem:[%s1784_s25 + $0x94] sm:$0xf0]  ;;  %v1501_v22 = vld [vmem:[%s1784_s25 + $0x8c] sm:$0xf]  ;;  %v1300_v32 = vld [vmem:[%s1784_s25 + $0xa8] sm:$0xf] }
  0x24   : > { %845 = vmatpush.bf16.msra.mxu3 %v1546_v23  ;;  %v1286_v23 = vld [vmem:[%s1784_s25 + $0x98] sm:$0xf0]  ;;  %v1507_v33 = vld [vmem:[%s1784_s25 + $0xb4] sm:$0xf0]  ;;  %v1505_v34 = vld [vmem:[%s1784_s25 + $0xac] sm:$0xf] }
  0x25   : > { %684 = vmatpush.bf16.msra.mxu0 %v1521_v24  ;;  %v1277_v24 = vor.u32 %v1502_v17, %v1276_v16  ;;  %v1302_v35 = vld [vmem:[%s1784_s25 + $0xb8] sm:$0xf0]  ;;  %v1301_v38 = vor.u32 %v1507_v33, %v1300_v32  ;;  %v1316_v44 = vld [vmem:[%s1784_s25 + $0xc8] sm:$0xf]  ;;  %v1511_v45 = vld [vmem:[%s1784_s25 + $0xd4] sm:$0xf0] }
  0x26   : > { %738 = vmatpush.bf16.msra.mxu1 %v1529_v25  ;;  %v1281_v25 = vor.u32 %v1500_v18, %v1278_v19  ;;  %v1305_v39 = vor.u32 %v1505_v34, %v1302_v35  ;;  %v1509_v46 = vld [vmem:[%s1784_s25 + $0xcc] sm:$0xf]  ;;  %v1318_v47 = vld [vmem:[%s1784_s25 + $0xd8] sm:$0xf0]  ;;  %v1317_v50 = vor.u32 %v1511_v45, %v1316_v44  ;;  %v1332_v56 = vld [vmem:[%s1784_s25 + $0xe8] sm:$0xf] }
  0x27   : > { %792 = vmatpush.bf16.msra.mxu2 %v1537_v26  ;;  %v1285_v26 = vor.u32 %v1503_v21, %v1284_v20  ;;  %v1321_v51 = vor.u32 %v1509_v46, %v1318_v47  ;;  %v1515_v57 = vld [vmem:[%s1784_s25 + $0xf4] sm:$0xf0]  ;;  %v1513_v58 = vld [vmem:[%s1784_s25 + $0xec] sm:$0xf]  ;;  %v1334_v59 = vld [vmem:[%s1784_s25 + $0xf8] sm:$0xf0] }
  0x28   : > { %846 = vmatpush.bf16.msra.mxu3 %v1545_v27  ;;  %v1289_v27 = vor.u32 %v1501_v22, %v1286_v23  ;;  %v1333_v62 = vor.u32 %v1515_v57, %v1332_v56  ;;  %v1337_v63 = vor.u32 %v1513_v58, %v1334_v59  ;;  %v1342_v4 = vld [vmem:[%s1784_s25 + $0x110] sm:$0xf0]  ;;  %v1348_v5 = vld [vmem:[%s1784_s25 + $0x108] sm:$0xf]  ;;  %v1519_v6 = vld [vmem:[%s1784_s25 + $0x114] sm:$0xf0] }
  0x29   : > { %685 = vmatpush.bf16.msra.mxu0 %v1520_v28  ;;  %v1292_v28 = vld [vmem:[%s1784_s25 + $0xa0] sm:$0xf]  ;;  %v1517_v7 = vld [vmem:[%s1784_s25 + $0x10c] sm:$0xf]  ;;  %v1350_v8 = vld [vmem:[%s1784_s25 + $0x118] sm:$0xf0] }
  0x2a   : > { %739 = vmatpush.bf16.msra.mxu1 %v1528_v29  ;;  %v1506_v29 = vld [vmem:[%s1784_s25 + $0xac] sm:$0xf0] }
  0x2b   : > { %793 = vmatpush.bf16.msra.mxu2 %v1536_v30  ;;  %v1504_v30 = vld [vmem:[%s1784_s25 + $0xa4] sm:$0xf]  ;;  %v1293_v36 = vor.u32 %v1506_v29, %v1292_v28 }
  0x2c   : > { %847 = vmatpush.bf16.msra.mxu3 %v1544_v31  ;;  %686 = vmatmul.bf16.vlgmr.msra.gmra.mxu0 %v1213_v40  ;;  %v1294_v31 = vld [vmem:[%s1784_s25 + $0xb0] sm:$0xf0]  ;;  %v1308_v40 = vld [vmem:[%s1784_s25 + $0xc0] sm:$0xf] }
  0x2d   : > { %740 = vmatmul.bf16.vlgmr.msra.gmra.mxu1 %v1217_v41  ;;  %v1297_v37 = vor.u32 %v1504_v30, %v1294_v31  ;;  %v1510_v41 = vld [vmem:[%s1784_s25 + $0xcc] sm:$0xf0] }
  0x2e   : > { %794 = vmatmul.bf16.vlgmr.msra.gmra.mxu2 %v1221_v42  ;;  %v1508_v42 = vld [vmem:[%s1784_s25 + $0xc4] sm:$0xf]  ;;  %v1309_v48 = vor.u32 %v1510_v41, %v1308_v40 }
  0x2f   : > { %848 = vmatmul.bf16.vlgmr.msra.gmra.mxu3 %v1225_v43  ;;  %v1310_v43 = vld [vmem:[%s1784_s25 + $0xd0] sm:$0xf0] }
  0x30   : > { %v1313_v49 = vor.u32 %v1508_v42, %v1310_v43 }
  0x3c   : > { %691 = vmatmul.bf16.gmra.mxu0 %v1229_v52  ;;  %v1324_v52 = vld [vmem:[%s1784_s25 + $0xe0] sm:$0xf] }
  0x3d   : > { %745 = vmatmul.bf16.gmra.mxu1 %v1233_v53  ;;  %v1514_v53 = vld [vmem:[%s1784_s25 + $0xec] sm:$0xf0] }
  0x3e   : > { %799 = vmatmul.bf16.gmra.mxu2 %v1237_v54  ;;  %v1512_v54 = vld [vmem:[%s1784_s25 + $0xe4] sm:$0xf]  ;;  %v1325_v60 = vor.u32 %v1514_v53, %v1324_v52 }
  0x3f   : > { %853 = vmatmul.bf16.gmra.mxu3 %v1241_v55  ;;  %v1326_v55 = vld [vmem:[%s1784_s25 + $0xf0] sm:$0xf0] }
  0x40   : > { %v1329_v61 = vor.u32 %v1512_v54, %v1326_v55 }
  0x4c   : > { %696 = vmatmul.bf16.gmra.mxu0 %v1245_v0  ;;  %v1871_v0 = vld [vmem:[%s2037_s2] ss:$0 sm:$0xff] }
  0x4d   : > { %750 = vmatmul.bf16.gmra.mxu1 %v1249_v1  ;;  %v1340_v1 = vld [vmem:[%s1784_s25 + $0x100] sm:$0xf] }
  0x4e   : > { %804 = vmatmul.bf16.gmra.mxu2 %v1253_v2  ;;  %v1518_v2 = vld [vmem:[%s1784_s25 + $0x10c] sm:$0xf0] }
  0x4f   : > { %858 = vmatmul.bf16.gmra.mxu3 %v1257_v3  ;;  %v1516_v3 = vld [vmem:[%s1784_s25 + $0x104] sm:$0xf]  ;;  %v1341_v9 = vor.u32 %v1518_v2, %v1340_v1 }
  0x50   : > { %v1345_v10 = vor.u32 %v1516_v3, %v1342_v4 }
  0x5c   : > { %701 = vmatmul.bf16.gmra.mxu0 %v1261_v12 }
  0x5d   : > { %755 = vmatmul.bf16.gmra.mxu1 %v1265_v13  ;;  %v1349_v13 = vor.u32 %v1519_v6, %v1348_v5 }
  0x5e   : > { %809 = vmatmul.bf16.gmra.mxu2 %v1269_v14  ;;  %v1353_v14 = vor.u32 %v1517_v7, %v1350_v8 }
  0x5f   : > { %863 = vmatmul.bf16.gmra.mxu3 %v1273_v15 }
  0x6c   : > { %706 = vmatmul.bf16.gmra.mxu0 %v1277_v24 }
  0x6d   : > { %760 = vmatmul.bf16.gmra.mxu1 %v1281_v25 }
  0x6e   : > { %814 = vmatmul.bf16.gmra.mxu2 %v1285_v26 }
  0x6f   : > { %868 = vmatmul.bf16.gmra.mxu3 %v1289_v27 }
  0x7c   : > { %711 = vmatmul.bf16.gmra.mxu0 %v1293_v36 }
  0x7d   : > { %765 = vmatmul.bf16.gmra.mxu1 %v1297_v37 }
  0x7e   : > { %819 = vmatmul.bf16.gmra.mxu2 %v1301_v38 }
  0x7f   : > { %873 = vmatmul.bf16.gmra.mxu3 %v1305_v39 }
  0x8c   : > { %716 = vmatmul.bf16.gmra.mxu0 %v1309_v48 }
  0x8d   : > { %770 = vmatmul.bf16.gmra.mxu1 %v1313_v49 }
  0x8e   : > { %824 = vmatmul.bf16.gmra.mxu2 %v1317_v50 }
  0x8f   : > { %878 = vmatmul.bf16.gmra.mxu3 %v1321_v51 }
  0x9c   : > { %721 = vmatmul.bf16.gmra.mxu0 %v1325_v60 }
  0x9d   : > { %775 = vmatmul.bf16.gmra.mxu1 %v1329_v61 }
  0x9e   : > { %829 = vmatmul.bf16.gmra.mxu2 %v1333_v62 }
  0x9f   : > { %883 = vmatmul.bf16.gmra.mxu3 %v1337_v63 }
  0xa9   : > { %v687_v11 = vpop.f32.mrf.mxu0 }
  0xaa   : > { %v741_v12 = vpop.f32.mrf.mxu1  ;;  %v688_v15 = vadd.f32 %v1871_v0, %v687_v11 }
  0xac   : > { %v742_v16 = vadd.f32 %v741_v12, %v688_v15  ;;  %726 = vmatmul.bf16.gmra.mxu0 %v1341_v9 }
  0xad   : > { %780 = vmatmul.bf16.gmra.mxu1 %v1345_v10 }
  0xae   : > { %834 = vmatmul.bf16.gmra.mxu2 %v1349_v13 }
  0xaf   : > { %888 = vmatmul.bf16.gmra.mxu3 %v1353_v14 }
  0xb1   : > { %v795_v17 = vpop.f32.mrf.mxu2  ;;  %v689_v20 = vpop.f32.mrf.mxu0 }
  0xb2   : > { %v849_v18 = vpop.f32.mrf.mxu3  ;;  %v796_v19 = vadd.f32 %v795_v17, %v742_v16  ;;  %v743_v21 = vpop.f32.mrf.mxu1  ;;  %v690_v22 = vadd.f32 %v1871_v0, %v689_v20 }
  0xb4   : > { %v1883_v23 = vadd.f32 %v849_v18, %v796_v19  ;;  %v744_v24 = vadd.f32 %v743_v21, %v690_v22 }
  0xb9   : > { %v797_v25 = vpop.f32.mrf.mxu2  ;;  %v692_v28 = vpop.f32.mrf.mxu0 }
  0xba   : > { %v851_v26 = vpop.f32.mrf.mxu3  ;;  %v798_v27 = vadd.f32 %v797_v25, %v744_v24  ;;  %v746_v29 = vpop.f32.mrf.mxu1  ;;  %v693_v30 = vadd.f32 %v1871_v0, %v692_v28 }
  0xbc   : > { %v1886_v31 = vadd.f32 %v851_v26, %v798_v27  ;;  %v747_v32 = vadd.f32 %v746_v29, %v693_v30 }
  0xc1   : > { %v800_v33 = vpop.f32.mrf.mxu2  ;;  %v694_v36 = vpop.f32.mrf.mxu0 }
  0xc2   : > { %v854_v34 = vpop.f32.mrf.mxu3  ;;  %v801_v35 = vadd.f32 %v800_v33, %v747_v32  ;;  %v748_v37 = vpop.f32.mrf.mxu1  ;;  %v695_v38 = vadd.f32 %v1871_v0, %v694_v36 }
  0xc4   : > { %v1889_v39 = vadd.f32 %v854_v34, %v801_v35  ;;  %v749_v40 = vadd.f32 %v748_v37, %v695_v38  ;;  %v938_v35 = vmul.f32 %v1886_v31, %v1886_v31 }
  0xc9   : > { %v802_v41 = vpop.f32.mrf.mxu2  ;;  %v697_v44 = vpop.f32.mrf.mxu0 }
  0xca   : > { %v856_v42 = vpop.f32.mrf.mxu3  ;;  %v803_v43 = vadd.f32 %v802_v41, %v749_v40  ;;  %v751_v45 = vpop.f32.mrf.mxu1  ;;  %v698_v46 = vadd.f32 %v1871_v0, %v697_v44  ;;  %v937_v40 = vmul.f32 %v1883_v23, %v1883_v23  ;;  %v939_v41 = vmul.f32 %v1889_v39, %v1889_v39 }
  0xcc   : > { %v1892_v47 = vadd.f32 %v856_v42, %v803_v43  ;;  %v752_v48 = vadd.f32 %v751_v45, %v698_v46  ;;  %v914_v45 = vadd.f32 %v1886_v31, %v1883_v23  ;;  %v955_v46 = vadd.f32 %v938_v35, %v937_v40 }
  0xd1   : > { %v805_v49 = vpop.f32.mrf.mxu2  ;;  %v699_v52 = vpop.f32.mrf.mxu0 }
  0xd2   : > { %v859_v50 = vpop.f32.mrf.mxu3  ;;  %v806_v51 = vadd.f32 %v805_v49, %v752_v48  ;;  %v753_v53 = vpop.f32.mrf.mxu1  ;;  %v700_v54 = vadd.f32 %v1871_v0, %v699_v52  ;;  %v940_v48 = vmul.f32 %v1892_v47, %v1892_v47 }
  0xd4   : > { %v1895_v55 = vadd.f32 %v859_v50, %v806_v51  ;;  %v754_v56 = vadd.f32 %v753_v53, %v700_v54  ;;  %v915_v53 = vadd.f32 %v914_v45, %v1889_v39  ;;  %v956_v54 = vadd.f32 %v955_v46, %v939_v41 }
  0xd9   : > { %v807_v57 = vpop.f32.mrf.mxu2  ;;  %v702_v60 = vpop.f32.mrf.mxu0 }
  0xda   : > { %v861_v58 = vpop.f32.mrf.mxu3  ;;  %v808_v59 = vadd.f32 %v807_v57, %v754_v56  ;;  %v756_v61 = vpop.f32.mrf.mxu1  ;;  %v703_v62 = vadd.f32 %v1871_v0, %v702_v60  ;;  %v941_v56 = vmul.f32 %v1895_v55, %v1895_v55  ;;  %v916_v57 = vadd.f32 %v915_v53, %v1892_v47 }
  0xdc   : > { %v1898_v63 = vadd.f32 %v861_v58, %v808_v59  ;;  %v757_v1 = vadd.f32 %v756_v61, %v703_v62  ;;  %v957_v58 = vadd.f32 %v956_v54, %v940_v48 }
  0xde   : > { %v942_v59 = vmul.f32 %v1898_v63, %v1898_v63 }
  0xe1   : > { %v810_v2 = vpop.f32.mrf.mxu2  ;;  %v704_v5 = vpop.f32.mrf.mxu0 }
  0xe2   : > { %v864_v3 = vpop.f32.mrf.mxu3  ;;  %v811_v4 = vadd.f32 %v810_v2, %v757_v1  ;;  %v758_v6 = vpop.f32.mrf.mxu1  ;;  %v705_v34 = vadd.f32 %v1871_v0, %v704_v5  ;;  %v917_v5 = vadd.f32 %v916_v57, %v1895_v55 }
  0xe4   : > { %v1900_v7 = vadd.f32 %v864_v3, %v811_v4  ;;  %v759_v42 = vadd.f32 %v758_v6, %v705_v34  ;;  %v958_v6 = vadd.f32 %v957_v58, %v941_v56 }
  0xe9   : > { %v812_v8 = vpop.f32.mrf.mxu2  ;;  %v707_v10 = vpop.f32.mrf.mxu0 }
  0xea   : > { %v866_v9 = vpop.f32.mrf.mxu3  ;;  %v761_v11 = vpop.f32.mrf.mxu1  ;;  %v708_v36 = vadd.f32 %v1871_v0, %v707_v10  ;;  %v813_v49 = vadd.f32 %v812_v8, %v759_v42 }
  0xec   : > { %v762_v50 = vadd.f32 %v761_v11, %v708_v36  ;;  %v1932_v60 = vadd.f32 %v866_v9, %v813_v49  ;;  %v943_v11 = vmul.f32 %v1900_v7, %v1900_v7  ;;  %v918_v9 = vadd.f32 %v917_v5, %v1898_v63 }
  0xee   : > { %v919_v40 = vadd.f32 %v918_v9, %v1900_v7 }
  0xf0   : > { %v920_v45 = vadd.f32 %v919_v40, %v1932_v60 }
  0xf1   : > { %v815_v12 = vpop.f32.mrf.mxu2  ;;  %v709_v14 = vpop.f32.mrf.mxu0 }
  0xf2   : > { %v869_v13 = vpop.f32.mrf.mxu3  ;;  %v763_v15 = vpop.f32.mrf.mxu1  ;;  %v710_v51 = vadd.f32 %v1871_v0, %v709_v14  ;;  %v816_v61 = vadd.f32 %v815_v12, %v762_v50  ;;  %v959_v12 = vadd.f32 %v958_v6, %v942_v59 }
  0xf4   : > { %v764_v62 = vadd.f32 %v763_v15, %v710_v51  ;;  %v944_v15 = vmul.f32 %v1932_v60, %v1932_v60  ;;  %v960_v41 = vadd.f32 %v959_v12, %v943_v11 }
  0xf6   : > { %v961_v46 = vadd.f32 %v960_v41, %v944_v15 }
  0xf9   : > { %v817_v16 = vpop.f32.mrf.mxu2  ;;  %v712_v18 = vpop.f32.mrf.mxu0 }
  0xfa   : > { %v1902_v17 = vpop.f32.mrf.mxu3  ;;  %v766_v19 = vpop.f32.mrf.mxu1  ;;  %v713_v52 = vadd.f32 %v1871_v0, %v712_v18  ;;  %v818_v14 = vadd.f32 %v817_v16, %v764_v62 }
  0xfc   : > { %v767_v1 = vadd.f32 %v766_v19, %v713_v52  ;;  %v1942_v19 = vadd.f32 %v869_v13, %v816_v61  ;;  %v1948_v16 = vadd.f32 %v1902_v17, %v818_v14 }
  0xfe   : > { %v945_v13 = vmul.f32 %v1942_v19, %v1942_v19  ;;  %v921_v17 = vadd.f32 %v920_v45, %v1942_v19 }
 0x100   : > { %v962_v53 = vadd.f32 %v961_v46, %v945_v13  ;;  %v922_v54 = vadd.f32 %v921_v17, %v1948_v16 }
 0x101   : > { %v820_v20 = vpop.f32.mrf.mxu2  ;;  %v714_v22 = vpop.f32.mrf.mxu0 }
 0x102   : > { %v1904_v21 = vpop.f32.mrf.mxu3  ;;  %v768_v24 = vpop.f32.mrf.mxu1  ;;  %v715_v2 = vadd.f32 %v1871_v0, %v714_v22  ;;  %v821_v22 = vadd.f32 %v820_v20, %v767_v1 }
 0x104   : > { %v769_v34 = vadd.f32 %v768_v24, %v715_v2  ;;  %v1954_v20 = vadd.f32 %v1904_v21, %v821_v22 }
 0x106   : > { %v923_v61 = vadd.f32 %v922_v54, %v1954_v20 }
 0x109   : > { %v822_v25 = vpop.f32.mrf.mxu2  ;;  %v717_v27 = vpop.f32.mrf.mxu0 }
 0x10a   : > { %v1906_v26 = vpop.f32.mrf.mxu3  ;;  %v771_v28 = vpop.f32.mrf.mxu1  ;;  %v718_v8 = vadd.f32 %v1871_v0, %v717_v27  ;;  %v823_v42 = vadd.f32 %v822_v25, %v769_v34  ;;  %v946_v25 = vmul.f32 %v1948_v16, %v1948_v16 }
 0x10c   : > { %v772_v35 = vadd.f32 %v771_v28, %v718_v8  ;;  %v1961_v51 = vadd.f32 %v1906_v26, %v823_v42  ;;  %v963_v59 = vadd.f32 %v962_v53, %v946_v25 }
 0x10e   : > { %v948_v26 = vmul.f32 %v1961_v51, %v1961_v51  ;;  %v924_v6 = vadd.f32 %v923_v61, %v1961_v51 }
 0x111   : > { %v825_v29 = vpop.f32.mrf.mxu2  ;;  %v719_v32 = vpop.f32.mrf.mxu0 }
 0x112   : > { %v1908_v30 = vpop.f32.mrf.mxu3  ;;  %v773_v33 = vpop.f32.mrf.mxu1  ;;  %v720_v36 = vadd.f32 %v1871_v0, %v719_v32  ;;  %v826_v32 = vadd.f32 %v825_v29, %v772_v35  ;;  %v947_v29 = vmul.f32 %v1954_v20, %v1954_v20 }
 0x114   : > { %v964_v1 = vadd.f32 %v963_v59, %v947_v29 }
 0x116   : > { %v965_v11 = vadd.f32 %v964_v1, %v948_v26 }
 0x119   : > { %v827_v37 = vpop.f32.mrf.mxu2  ;;  %v722_v43 = vpop.f32.mrf.mxu0 }
 0x11a   : > { %v1914_v38 = vpop.f32.mrf.mxu3  ;;  %v776_v44 = vpop.f32.mrf.mxu1  ;;  %v723_v27 = vadd.f32 %v1871_v0, %v722_v43  ;;  %v774_v43 = vadd.f32 %v773_v33, %v720_v36 }
 0x11c   : > { %v777_v48 = vadd.f32 %v776_v44, %v723_v27  ;;  %v828_v21 = vadd.f32 %v827_v37, %v774_v43  ;;  %v1968_v44 = vadd.f32 %v1908_v30, %v826_v32 }
 0x11e   : > { %v1974_v37 = vadd.f32 %v1914_v38, %v828_v21  ;;  %v949_v30 = vmul.f32 %v1968_v44, %v1968_v44  ;;  %v925_v14 = vadd.f32 %v924_v6, %v1968_v44 }
 0x120   : > { %v950_v38 = vmul.f32 %v1974_v37, %v1974_v37  ;;  %v966_v12 = vadd.f32 %v965_v11, %v949_v30  ;;  %v926_v15 = vadd.f32 %v925_v14, %v1974_v37 }
 0x121   : > { %v830_v3 = vpop.f32.mrf.mxu2  ;;  %v724_v10 = vpop.f32.mrf.mxu0 }
 0x122   : > { %v884_v4 = vpop.f32.mrf.mxu3  ;;  %v778_v18 = vpop.f32.mrf.mxu1  ;;  %v725_v49 = vadd.f32 %v1871_v0, %v724_v10  ;;  %v831_v56 = vadd.f32 %v830_v3, %v777_v48  ;;  %v967_v35 = vadd.f32 %v966_v12, %v950_v38 }
 0x124   : > { %v779_v57 = vadd.f32 %v778_v18, %v725_v49  ;;  %v1979_v3 = vadd.f32 %v884_v4, %v831_v56 }
 0x126   : > { %v951_v22 = vmul.f32 %v1979_v3, %v1979_v3  ;;  %v927_v36 = vadd.f32 %v926_v15, %v1979_v3 }
 0x128   : > { %v968_v42 = vadd.f32 %v967_v35, %v951_v22 }
 0x129   : > { %v832_v24 = vpop.f32.mrf.mxu2  ;;  %v727_v50 = vpop.f32.mrf.mxu0 }
 0x12a   : > { %v886_v28 = vpop.f32.mrf.mxu3  ;;  %v728_v52 = vadd.f32 %v1871_v0, %v727_v50  ;;  %v781_v33 = vpop.f32.mrf.mxu1  ;;  %v833_v62 = vadd.f32 %v832_v24, %v779_v57 }
 0x12c   : > { %v782_v58 = vadd.f32 %v781_v33, %v728_v52  ;;  %v1984_v18 = vadd.f32 %v886_v28, %v833_v62 }
 0x12e   : > { %v952_v27 = vmul.f32 %v1984_v18, %v1984_v18 }
 0x130   : > { %v969_v24 = vadd.f32 %v968_v42, %v952_v27 }
 0x131   : > { %v835_v2 = vpop.f32.mrf.mxu2  ;;  %v729_v10 = vpop.f32.mrf.mxu0 }
 0x132   : > { %v889_v5 = vpop.f32.mrf.mxu3  ;;  %v836_v8 = vadd.f32 %v835_v2, %v782_v58  ;;  %v730_v9 = vadd.f32 %v1871_v0, %v729_v10  ;;  %v783_v34 = vpop.f32.mrf.mxu1  ;;  %v928_v0 = vadd.f32 %v927_v36, %v1984_v18 }
 0x134   : > { %v1990_v4 = vadd.f32 %v889_v5, %v836_v8  ;;  %v784_v40 = vadd.f32 %v783_v34, %v730_v9 }
 0x136   : > { %v953_v45 = vmul.f32 %v1990_v4, %v1990_v4  ;;  %v929_v28 = vadd.f32 %v928_v0, %v1990_v4 }
 0x138   : > { %v970_v43 = vadd.f32 %v969_v24, %v953_v45 }
 0x139   : > { %v837_v41 = vpop.f32.mrf.mxu2 }
 0x13a   : > { %v838_v46 = vadd.f32 %v837_v41, %v784_v40  ;;  %v891_v13 = vpop.f32.mrf.mxu3 }
 0x13c   : > { %v1999_v32 = vadd.f32 %v891_v13, %v838_v46 }
 0x13e   : > { %v930_v48 = vadd.f32 %v929_v28, %v1999_v32  ;;  %v954_v49 = vmul.f32 %v1999_v32, %v1999_v32 }
 0x140   : > { %v931_v50 = vrot.slane %v930_v48, 4  ;;  %v971_v17 = vadd.f32 %v970_v43, %v954_v49 }
 0x142   : > { %v932_v25 = vadd.f32 %v931_v50, %v930_v48  ;;  %v972_v52 = vrot.slane %v971_v17, 4 }
 0x144   : > { %v933_v21 = vrot.slane %v932_v25, 2  ;;  %v973_v53 = vadd.f32 %v972_v52, %v971_v17 }
 0x146   : > { %v934_v54 = vadd.f32 %v933_v21, %v932_v25  ;;  %v974_v29 = vrot.slane %v973_v53, 2 }
 0x148   : > { %v935_v33 = vrot.slane %v934_v54, 1  ;;  %v975_v56 = vadd.f32 %v974_v29, %v973_v53 }
 0x14a   : > { %v936_v57 = vadd.f32 %v935_v33, %v934_v54  ;;  %v976_v58 = vrot.slane %v975_v56, 1 }
 0x14c   : > { %v977_v59 = vadd.f32 %v976_v58, %v975_v56  ;;  %982 = vst [vmem:[#allocation3] sm:$0x1] %v936_v57 }
 0x14e   : > { %983 = vst [vmem:[#allocation4] sm:$0x1] %v977_v59 }
 0x153   : > { %v997_v26 = vld [vmem:[#allocation3] sm:$0x1] }
 0x154   : > { %v999_v61 = vmul.f32 0.0069444445, %v997_v26 }
 0x155   : > { %v998_v62 = vld [vmem:[#allocation4] sm:$0x1] }
 0x156   : > { %v1000_v1 = vmul.f32 0.0069444445, %v998_v62  ;;  %v1001_v2 = vmul.f32 %v999_v61, %v999_v61  ;;  %v1034_v14 = vperm.slane %v999_v61, 0 }
 0x158   : > { %v1002_v5 = vsub.f32 %v1000_v1, %v1001_v2  ;;  %v1036_v12 = vsub.f32 %v1883_v23, %v1034_v14  ;;  %v1037_v15 = vsub.f32 %v1886_v31, %v1034_v14  ;;  %v1038_v34 = vsub.f32 %v1889_v39, %v1034_v14 }
 0x159   : > { %v1039_v35 = vsub.f32 %v1892_v47, %v1034_v14  ;;  %v1040_v36 = vsub.f32 %v1895_v55, %v1034_v14  ;;  %v1041_v27 = vsub.f32 %v1898_v63, %v1034_v14  ;;  %v1042_v40 = vsub.f32 %v1900_v7, %v1034_v14 }
 0x15a   : > { %v1003_v6 = vmax.f32 %v1002_v5, 0.0  ;;  %v1043_v41 = vsub.f32 %v1932_v60, %v1034_v14  ;;  %v1044_v23 = vsub.f32 %v1942_v19, %v1034_v14  ;;  %v1045_v31 = vsub.f32 %v1948_v16, %v1034_v14 }
 0x15b   : > { %v1046_v0 = vsub.f32 %v1954_v20, %v1034_v14  ;;  %v1047_v39 = vsub.f32 %v1961_v51, %v1034_v14  ;;  %v1048_v47 = vsub.f32 %v1968_v44, %v1034_v14  ;;  %v1049_v45 = vsub.f32 %v1974_v37, %v1034_v14 }
 0x15c   : > { %v1004_v30 = vadd.f32 1e-05, %v1003_v6  ;;  %v1050_v63 = vsub.f32 %v1979_v3, %v1034_v14  ;;  %v1051_v7 = vsub.f32 %v1984_v18, %v1034_v14  ;;  %v1052_v60 = vsub.f32 %v1990_v4, %v1034_v14 }
 0x15d   : > { %v1053_v46 = vsub.f32 %v1999_v32, %v1034_v14 }
 0x15e   : > { %1632 = vrsqrt.f32 %v1004_v30  ;;  %vm1011_vm1 = vweird.f32 %v1004_v30 }
 0x164   : > { %v1633_v8 = vpop.eup %1632 }
 0x165   : > { %v1006_v10 = vmul.f32 %v1633_v8, %v1004_v30  ;;  %vm1012_vm0 = vweird.f32 %v1633_v8 }
 0x166   : > { %vm1013_vm2 = vmor %vm1011_vm1, %vm1012_vm0 }
 0x167   : > { %v1007_v11 = vmul.f32 %v1633_v8, %v1006_v10 }
 0x169   : > { %v1008_v38 = vmul.f32 0.5, %v1007_v11 }
 0x16b   : > { %v1009_v9 = vsub.f32 1.5, %v1008_v38 }
 0x16d   : > { %v1010_v22 = vmul.f32 %v1633_v8, %v1009_v9 }
 0x16f   : > { %v1014_v42 = vsel %vm1013_vm2, %v1633_v8, %v1010_v22 }
 0x170   : > { %v1055_v55 = vperm.slane %v1014_v42, 0 }
 0x172   : > { %v1057_v19 = vmul.f32 %v1055_v55, %v1036_v12  ;;  %v1058_v16 = vmul.f32 %v1055_v55, %v1037_v15  ;;  %v1059_v13 = vmul.f32 %v1055_v55, %v1038_v34  ;;  %v1060_v20 = vmul.f32 %v1055_v55, %v1039_v35 }
 0x173   : > { %v1061_v24 = vmul.f32 %v1055_v55, %v1040_v36  ;;  %v1062_v51 = vmul.f32 %v1055_v55, %v1041_v27  ;;  %v1063_v28 = vmul.f32 %v1055_v55, %v1042_v40  ;;  %v1064_v44 = vmul.f32 %v1055_v55, %v1043_v41 }
 0x174   : > { %v1065_v43 = vmul.f32 %v1055_v55, %v1044_v23  ;;  %v1066_v37 = vmul.f32 %v1055_v55, %v1045_v31  ;;  %v1067_v48 = vmul.f32 %v1055_v55, %v1046_v0  ;;  %v1068_v49 = vmul.f32 %v1055_v55, %v1047_v39 }
 0x175   : > { %v1069_v3 = vmul.f32 %v1055_v55, %v1048_v47  ;;  %v1070_v50 = vmul.f32 %v1055_v55, %v1049_v45  ;;  %v1071_v18 = vmul.f32 %v1055_v55, %v1050_v63  ;;  %v1072_v17 = vmul.f32 %v1055_v55, %v1051_v7 }
 0x176   : > { %v1073_v4 = vmul.f32 %v1055_v55, %v1052_v60  ;;  %v1074_v32 = vmul.f32 %v1055_v55, %v1053_v46  ;;  %v1075_v25 = vmax.f32 %v1057_v19, 0.0  ;;  %v1076_v52 = vmax.f32 %v1058_v16, 0.0 }
 0x177   : > { %v1077_v21 = vmax.f32 %v1059_v13, 0.0  ;;  %v1078_v53 = vmax.f32 %v1060_v20, 0.0  ;;  %v1079_v54 = vmax.f32 %v1061_v24, 0.0  ;;  %v1080_v29 = vmax.f32 %v1062_v51, 0.0 }
 0x178   : > { %v1081_v33 = vmax.f32 %v1063_v28, 0.0  ;;  %v1082_v56 = vmax.f32 %v1064_v44, 0.0  ;;  %v1083_v57 = vmax.f32 %v1065_v43, 0.0  ;;  %v1084_v58 = vmax.f32 %v1066_v37, 0.0 }
 0x179   : > { %v1085_v59 = vmax.f32 %v1067_v48, 0.0  ;;  %v1086_v26 = vmax.f32 %v1068_v49, 0.0  ;;  %v1087_v61 = vmax.f32 %v1069_v3, 0.0  ;;  %v1089_v62 = vmax.f32 %v1071_v18, 0.0 }
 0x17a   : > { %v1090_v1 = vmax.f32 %v1072_v17, 0.0  ;;  %v1091_v2 = vmax.f32 %v1073_v4, 0.0  ;;  %v1092_v5 = vmax.f32 %v1074_v32, 0.0  ;;  %v1088_v6 = vmax.f32 %v1070_v50, 0.0 }
 0x17b   : > { %v1555_v30 = vpack.c.bf16 %v1076_v52, %v1075_v25  ;;  %v1560_v8 = vpack.c.bf16 %v1078_v53, %v1077_v21  ;;  %v1565_v10 = vpack.c.bf16 %v1080_v29, %v1079_v54  ;;  %v1570_v11 = vpack.c.bf16 %v1082_v56, %v1081_v33 }
 0x17c   : > { %v1590_v14 = vpack.c.bf16 %v1090_v1, %v1089_v62  ;;  %v1575_v38 = vpack.c.bf16 %v1084_v58, %v1083_v57  ;;  %v1595_v9 = vpack.c.bf16 %v1092_v5, %v1091_v2  ;;  %v1580_v12 = vpack.c.bf16 %v1086_v26, %v1085_v59 }
 0x17d   : > { %1556 = vst [vmem:[%s201_s20] sm:$0xff] %v1555_v30   ;;  %v1585_v15 = vpack.c.bf16 %v1088_v6, %v1087_v61 }
 0x17e   : > { %1597 = vst [vmem:[%s201_s20 + $0x8] sm:$0xff] %v1560_v8  }
 0x17f   : > { %1598 = vst [vmem:[%s201_s20 + $0x10] sm:$0xff] %v1565_v10  }
 0x180   : > { %1599 = vst [vmem:[%s201_s20 + $0x18] sm:$0xff] %v1570_v11  }
 0x181   : > { %1600 = vst [vmem:[%s201_s20 + $0x20] sm:$0xff] %v1575_v38  }
 0x182   : > { %1601 = vst [vmem:[%s201_s20 + $0x28] sm:$0xff] %v1580_v12  }
 0x183   : > { %1602 = vst [vmem:[%s201_s20 + $0x30] sm:$0xff] %v1585_v15  }
 0x184   : > { %1603 = vst [vmem:[%s201_s20 + $0x38] sm:$0xff] %v1590_v14  }
 0x185   : > { %1604 = vst [vmem:[%s201_s20 + $0x40] sm:$0xff] %v1595_v9  }
 0x186 PF: > { %s13_s14 = sadd.s32 1, %s1656_s14   ;;  %s2039_s12 = smov %s1652_s13 }
 0x187   : > { %p10_p5 = scmp.ge.s32.totalorder %s13_s14, 4   ;;  %s2040_s13 = smov %s2042_s15 }
 0x189   :  { %12 = sbr.rel (!%p10_p5) target bundleno = 2 (0x2), region = 75 }

// kernel: _lambda_.8
= control target key start
LH: loop header
LB: loop body
LE: loop exit
PB: predicated region body
PF: predicated region fallthrough
CT: control target
= control target key end

     0   :  { %s1408_s12 = smov 0   ;;  %s1410_s13 = smov 0   ;;  %s1740_s0 = inlined_call_operand.vmem [shape: bf16[2,144,288], index: 0, kind: input, shape index: {}]   ;;  %s1741_s1 = inlined_call_operand.vmem [shape: bf16[288,128], index: 1, kind: input, shape index: {}]   ;;  %s1742_s2 = inlined_call_operand.vmem [shape: f32[1,128], index: 2, kind: input, shape index: {}]   ;;  %s1743_s3 = inlined_call_operand.vmem [shape: bf16[2,1,144,128], index: 3, kind: output, shape index: {}]  }
   0x1   :  { %s1412_s14 = smov 0  }
   0x2 LB: > { %s25_s15 = sadd.s32 1, %s1382_s13  ;;  %p1025_p0 = scmp.ge.s32.totalorder %s1386_s14, 1  ;;  %s1386_s14 = sphi %s1412_s14, %s13_s14   ;;  %s1382_s13 = sphi %s1410_s13, %s1745_s13   ;;  %s1378_s12 = sphi %s1408_s12, %s1744_s12  }
   0x3   : > { %p27_p1 = scmp.ge.s32.totalorder %s25_s15, 2  ;;  %p157_p2 = scmp.lt.s32.totalorder %s1386_s14, 3 }
   0x5   : > { %s1747_s15 = smov (%p27_p1, %s25_s15), 0  ;;  %p158_p3 = pnand %p1025_p0, %p157_p2 }
   0x6   : > { %p187_p4 = scmp.lt.s32.totalorder (!%p158_p3), %s1378_s12, 1 }
   0x7   : > { %161 = sbr.rel (%p158_p3) target bundleno = 359 (0x167), region = 32 }
   0xc   : > { %v1253_v0 = vld [vmem:[%s1741_s1 + $0x38] sm:$0xff]  ;;  %v1437_v2 = vld [vmem:[%s1741_s1 + $0x88] sm:$0xff]  ;;  %v1252_v3 = vld [vmem:[%s1741_s1 + $0x30] sm:$0xff]  ;;  %s1749_s12 = smov (!%p187_p4, %s1378_s12), 1  ;;  %vm522_vm0 = vcmask 261120  }
   0xd   : > { %v1432_v1 = vld [vmem:[%s1741_s1 + $0x78] sm:$0xff]  ;;  %550 = vmatpush.bf16.msra.mxu0 %v1253_v0  ;;  %1317 = vmatpush.bf16.msra.mxu3 %v1253_v0  ;;  %v1260_v4 = vld [vmem:[%s1741_s1 + $0x70] sm:$0xff]  ;;  %v1452_v5 = vld [vmem:[%s1741_s1 + $0x80] sm:$0xff]  ;;  %s1335_s28 = smul.u32 216, %s1749_s12 }
   0xe   : > { %604 = vmatpush.bf16.msra.mxu1 %v1432_v1  ;;  %664 = vmatpush.bf16.msra.mxu2 %v1437_v2  ;;  %v1251_v6 = vld [vmem:[%s1741_s1 + $0x28] sm:$0xff]  ;;  %v1250_v11 = vld [vmem:[%s1741_s1 + $0x20] sm:$0xff]  ;;  %v1249_v13 = vld [vmem:[%s1741_s1 + $0x18] sm:$0xff] }
   0xf   : > { %s1458_s4 = scalar_lea.vmem %s1740_s0, %s1335_s28  ;;  %v1259_v9 = vld [vmem:[%s1741_s1 + $0x68] sm:$0xff]  ;;  %v1258_v12 = vld [vmem:[%s1741_s1 + $0x60] sm:$0xff]  ;;  %v1257_v14 = vld [vmem:[%s1741_s1 + $0x58] sm:$0xff] }
  0x10   : > { %v1038_v7 = vld [vmem:[%s1458_s4 + $0x8] sm:$0xf]  ;;  %v1221_v8 = vld [vmem:[%s1458_s4 + $0x10] sm:$0xf0]  ;;  %v1050_v17 = vld [vmem:[%s1458_s4 + $0x20] sm:$0xf] }
  0x11   : > { %551 = vmatpush.bf16.msra.mxu0 %v1252_v3  ;;  %1318 = vmatpush.bf16.msra.mxu3 %v1252_v3  ;;  %v1039_v10 = vor.u32 %v1221_v8, %v1038_v7  ;;  %v1248_v15 = vld [vmem:[%s1741_s1 + $0x10] sm:$0xff]  ;;  %v1224_v18 = vld [vmem:[%s1458_s4 + $0x28] sm:$0xf0]  ;;  %v1246_v22 = vld [vmem:[%s1741_s1] sm:$0xff] }
  0x12   : > { %605 = vmatpush.bf16.msra.mxu1 %v1260_v4  ;;  %665 = vmatpush.bf16.msra.mxu2 %v1452_v5  ;;  %v1256_v16 = vld [vmem:[%s1741_s1 + $0x50] sm:$0xff]  ;;  %v1051_v19 = vor.u32 %v1224_v18, %v1050_v17  ;;  %v1247_v20 = vld [vmem:[%s1741_s1 + $0x8] sm:$0xff]  ;;  %v1254_v23 = vld [vmem:[%s1741_s1 + $0x40] sm:$0xff] }
  0x13   : > { %v1255_v21 = vld [vmem:[%s1741_s1 + $0x48] sm:$0xff]  ;;  %v1030_v24 = vld [vmem:[%s1458_s4] sm:$0xf]  ;;  %v1241_v27 = vld [vmem:[%s1458_s4 + $0xb0] sm:$0xf0] }
  0x14   : > { %v1220_v25 = vld [vmem:[%s1458_s4 + $0x8] sm:$0xf0]  ;;  %v1114_v26 = vld [vmem:[%s1458_s4 + $0xa8] sm:$0xf]  ;;  %v1219_v28 = vld [vmem:[%s1458_s4 + $0x4] sm:$0xf] }
  0x15   : > { %1208 = vmatmul.msk.bf16.vlgmr.msra.gmra.mxu2 %vm522_vm0, %v1039_v10  ;;  %552 = vmatpush.bf16.msra.mxu0 %v1251_v6  ;;  %v1032_v29 = vld [vmem:[%s1458_s4 + $0xc] sm:$0xf0]  ;;  %v1031_v30 = vor.u32 %v1220_v25, %v1030_v24  ;;  %v1115_v31 = vor.u32 %v1241_v27, %v1114_v26  ;;  %v1062_v33 = vld [vmem:[%s1458_s4 + $0x38] sm:$0xf]  ;;  %v1227_v34 = vld [vmem:[%s1458_s4 + $0x40] sm:$0xf0] }
  0x16   : > { %1319 = vmatpush.bf16.msra.mxu3 %v1251_v6  ;;  %606 = vmatpush.bf16.msra.mxu1 %v1259_v9  ;;  %v1035_v32 = vor.u32 %v1219_v28, %v1032_v29  ;;  %v1063_v35 = vor.u32 %v1227_v34, %v1062_v33  ;;  %v1042_v36 = vld [vmem:[%s1458_s4 + $0x18] sm:$0xf]  ;;  %v1223_v37 = vld [vmem:[%s1458_s4 + $0x20] sm:$0xf0]  ;;  %v1126_v38 = vld [vmem:[%s1458_s4 + $0xc0] sm:$0xf] }
  0x17   : > { %v1244_v39 = vld [vmem:[%s1458_s4 + $0xc8] sm:$0xf0]  ;;  %v1222_v40 = vld [vmem:[%s1458_s4 + $0x1c] sm:$0xf]  ;;  %v1044_v41 = vld [vmem:[%s1458_s4 + $0x24] sm:$0xf0]  ;;  %v1043_v42 = vor.u32 %v1223_v37, %v1042_v36 }
  0x18   : > { %v1127_v43 = vor.u32 %v1244_v39, %v1126_v38  ;;  %v1047_v44 = vor.u32 %v1222_v40, %v1044_v41  ;;  %v1074_v45 = vld [vmem:[%s1458_s4 + $0x50] sm:$0xf]  ;;  %v1230_v46 = vld [vmem:[%s1458_s4 + $0x58] sm:$0xf0]  ;;  %v1225_v50 = vld [vmem:[%s1458_s4 + $0x34] sm:$0xf] }
  0x19   : > { %553 = vmatpush.bf16.msra.mxu0 %v1250_v11  ;;  %v1075_v47 = vor.u32 %v1230_v46, %v1074_v45  ;;  %v1054_v48 = vld [vmem:[%s1458_s4 + $0x30] sm:$0xf]  ;;  %v1226_v49 = vld [vmem:[%s1458_s4 + $0x38] sm:$0xf0]  ;;  %v1056_v51 = vld [vmem:[%s1458_s4 + $0x3c] sm:$0xf0] }
  0x1a   : > { %1320 = vmatpush.bf16.msra.mxu3 %v1250_v11  ;;  %607 = vmatpush.bf16.msra.mxu1 %v1258_v12  ;;  %v1240_v52 = vld [vmem:[%s1458_s4 + $0xac] sm:$0xf]  ;;  %v1116_v53 = vld [vmem:[%s1458_s4 + $0xb4] sm:$0xf0]  ;;  %v1055_v54 = vor.u32 %v1226_v49, %v1054_v48  ;;  %v1059_v55 = vor.u32 %v1225_v50, %v1056_v51  ;;  %v1086_v57 = vld [vmem:[%s1458_s4 + $0x68] sm:$0xf] }
  0x1b   : > { %v1119_v56 = vor.u32 %v1240_v52, %v1116_v53  ;;  %v1233_v58 = vld [vmem:[%s1458_s4 + $0x70] sm:$0xf0]  ;;  %v1066_v60 = vld [vmem:[%s1458_s4 + $0x48] sm:$0xf]  ;;  %v1228_v62 = vld [vmem:[%s1458_s4 + $0x4c] sm:$0xf] }
  0x1c   : > { %v1087_v59 = vor.u32 %v1233_v58, %v1086_v57  ;;  %v1229_v61 = vld [vmem:[%s1458_s4 + $0x50] sm:$0xf0]  ;;  %v1068_v63 = vld [vmem:[%s1458_s4 + $0x54] sm:$0xf0]  ;;  %v1243_v0 = vld [vmem:[%s1458_s4 + $0xc4] sm:$0xf] }
  0x1d   : > { %554 = vmatpush.bf16.msra.mxu0 %v1249_v13  ;;  %v1071_v3 = vor.u32 %v1228_v62, %v1068_v63  ;;  %v1236_v6 = vld [vmem:[%s1458_s4 + $0x88] sm:$0xf0]  ;;  %v1078_v8 = vld [vmem:[%s1458_s4 + $0x60] sm:$0xf]  ;;  %v1231_v10 = vld [vmem:[%s1458_s4 + $0x64] sm:$0xf] }
  0x1e   : > { %1321 = vmatpush.bf16.msra.mxu3 %v1249_v13  ;;  %608 = vmatpush.bf16.msra.mxu1 %v1257_v14  ;;  %v1080_v11 = vld [vmem:[%s1458_s4 + $0x6c] sm:$0xf0]  ;;  %v1245_v13 = vld [vmem:[%s1458_s4 + $0xd0] sm:$0xf0]  ;;  %v1110_v17 = vld [vmem:[%s1458_s4 + $0x98] sm:$0xf] }
  0x1f   : > { %v1239_v18 = vld [vmem:[%s1458_s4 + $0xa0] sm:$0xf0]  ;;  %v1122_v26 = vld [vmem:[%s1458_s4 + $0xb0] sm:$0xf]  ;;  %v1242_v27 = vld [vmem:[%s1458_s4 + $0xb8] sm:$0xf0] }
  0x20   : > { %v1123_v28 = vor.u32 %v1242_v27, %v1122_v26  ;;  %v1102_v29 = vld [vmem:[%s1458_s4 + $0x90] sm:$0xf]  ;;  %v1566_v37 = vld [vmem:[%s1742_s2] ss:$0 sm:$0xff] }
  0x21   : > { %555 = vmatpush.bf16.msra.mxu0 %v1248_v15 }
  0x22   : > { %1322 = vmatpush.bf16.msra.mxu3 %v1248_v15  ;;  %609 = vmatpush.bf16.msra.mxu1 %v1256_v16  ;;  %v1083_v15 = vor.u32 %v1231_v10, %v1080_v11 }
  0x25   : > { %1209 = vmatmul.msk.bf16.gmra.mxu2 %vm522_vm0, %v1051_v19  ;;  %556 = vmatpush.bf16.msra.mxu0 %v1247_v20  ;;  %v1111_v19 = vor.u32 %v1239_v18, %v1110_v17 }
  0x26   : > { %1323 = vmatpush.bf16.msra.mxu3 %v1247_v20  ;;  %610 = vmatpush.bf16.msra.mxu1 %v1255_v21  ;;  %v1090_v20 = vld [vmem:[%s1458_s4 + $0x78] sm:$0xf] }
  0x29   : > { %557 = vmatpush.bf16.msra.mxu0 %v1246_v22 }
  0x2a   : > { %1324 = vmatpush.bf16.msra.mxu3 %v1246_v22  ;;  %611 = vmatpush.bf16.msra.mxu1 %v1254_v23  ;;  %v1234_v22 = vld [vmem:[%s1458_s4 + $0x7c] sm:$0xf] }
  0x2c   : > { %558 = vmatmul.bf16.vlgmr.msra.gmra.mxu0 %v1031_v30  ;;  %v1238_v30 = vld [vmem:[%s1458_s4 + $0x98] sm:$0xf0] }
  0x2d   : > { %593 = vmatmul.bf16.vlgmr.msra.gmra.mxu3 %v1115_v31  ;;  %612 = vmatmul.bf16.vlgmr.msra.gmra.mxu1 %v1035_v32  ;;  %v1237_v31 = vld [vmem:[%s1458_s4 + $0x94] sm:$0xf]  ;;  %v1104_v32 = vld [vmem:[%s1458_s4 + $0x9c] sm:$0xf0]  ;;  %v1103_v33 = vor.u32 %v1238_v30, %v1102_v29 }
  0x2e   : > { %1325 = vmatpush.bf16.msrb.mxu3 %v1432_v1  ;;  %v1128_v1 = vld [vmem:[%s1458_s4 + $0xcc] sm:$0xf0]  ;;  %v1107_v34 = vor.u32 %v1237_v31, %v1104_v32 }
  0x32   : > { %1326 = vmatpush.bf16.msrb.mxu3 %v1260_v4  ;;  %v1131_v4 = vor.u32 %v1243_v0, %v1128_v1 }
  0x35   : > { %1210 = vmatmul.msk.bf16.gmra.mxu2 %vm522_vm0, %v1063_v35 }
  0x36   : > { %1327 = vmatpush.bf16.msrb.mxu3 %v1259_v9  ;;  %v1232_v9 = vld [vmem:[%s1458_s4 + $0x68] sm:$0xf0] }
  0x3a   : > { %1328 = vmatpush.bf16.msrb.mxu3 %v1258_v12  ;;  %v1134_v12 = vld [vmem:[%s1458_s4 + $0xc8] sm:$0xf] }
  0x3c   : > { %563 = vmatmul.bf16.gmra.mxu0 %v1043_v42 }
  0x3d   : > { %598 = vmatmul.bf16.gmra.mxu3 %v1127_v43  ;;  %617 = vmatmul.bf16.gmra.mxu1 %v1047_v44 }
  0x3e   : > { %1329 = vmatpush.bf16.msrb.mxu3 %v1257_v14  ;;  %v1079_v14 = vor.u32 %v1232_v9, %v1078_v8 }
  0x42   : > { %1330 = vmatpush.bf16.msrb.mxu3 %v1256_v16  ;;  %v1135_v16 = vor.u32 %v1245_v13, %v1134_v12 }
  0x45   : > { %1211 = vmatmul.msk.bf16.gmra.mxu2 %vm522_vm0, %v1075_v47 }
  0x46   : > { %1331 = vmatpush.bf16.msrb.mxu3 %v1255_v21  ;;  %v1235_v21 = vld [vmem:[%s1458_s4 + $0x80] sm:$0xf0] }
  0x47   : > { %v1091_v24 = vor.u32 %v1235_v21, %v1090_v20 }
  0x4a   : > { %1332 = vmatpush.bf16.msrb.mxu3 %v1254_v23  ;;  %v1092_v23 = vld [vmem:[%s1458_s4 + $0x84] sm:$0xf0] }
  0x4b   : > { %v1095_v25 = vor.u32 %v1234_v22, %v1092_v23 }
  0x4c   : > { %568 = vmatmul.bf16.gmra.mxu0 %v1055_v54 }
  0x4d   : > { %622 = vmatmul.bf16.gmra.mxu1 %v1059_v55  ;;  %647 = vmatmul.bf16.vlgmr.msrb.gmra.mxu3 %v1119_v56 }
  0x4e   : > { %1333 = vmatpush.bf16.msra.mxu3 %v1437_v2  ;;  %v1067_v2 = vor.u32 %v1229_v61, %v1066_v60 }
  0x52   : > { %1334 = vmatpush.bf16.msra.mxu3 %v1452_v5  ;;  %v1098_v5 = vld [vmem:[%s1458_s4 + $0x80] sm:$0xf]  ;;  %s1336_s4 = smul.u32 72, %s1749_s12 }
  0x53   : > { %v1099_v7 = vor.u32 %v1236_v6, %v1098_v5 }
  0x54   : > { %s201_s12 = scalar_lea.vmem %s1743_s3, %s1336_s4 }
  0x55   : > { %1212 = vmatmul.msk.bf16.gmra.mxu2 %vm522_vm0, %v1087_v59 }
  0x5c   : > { %573 = vmatmul.bf16.gmra.mxu0 %v1067_v2 }
  0x5d   : > { %627 = vmatmul.bf16.gmra.mxu1 %v1071_v3  ;;  %652 = vmatmul.bf16.gmra.mxu3 %v1131_v4 }
  0x65   : > { %1213 = vmatmul.msk.bf16.gmra.mxu2 %vm522_vm0, %v1099_v7 }
  0x6c   : > { %578 = vmatmul.bf16.gmra.mxu0 %v1079_v14 }
  0x6d   : > { %632 = vmatmul.bf16.gmra.mxu1 %v1083_v15  ;;  %1216 = vmatmul.msk.bf16.vlgmr.msra.gmra.mxu3 %vm522_vm0, %v1135_v16 }
  0x75   : > { %1214 = vmatmul.msk.bf16.gmra.mxu2 %vm522_vm0, %v1111_v19 }
  0x7c   : > { %583 = vmatmul.bf16.gmra.mxu0 %v1091_v24 }
  0x7d   : > { %637 = vmatmul.bf16.gmra.mxu1 %v1095_v25 }
  0x85   : > { %1215 = vmatmul.msk.bf16.gmra.mxu2 %vm522_vm0, %v1123_v28 }
  0x8c   : > { %588 = vmatmul.bf16.gmra.mxu0 %v1103_v33 }
  0x8d   : > { %642 = vmatmul.bf16.gmra.mxu1 %v1107_v34 }
  0x98   : > { %v667_v35 = vpop.f32.mrf.mxu2 }
  0xa0   : > { %v669_v36 = vpop.f32.mrf.mxu2 }
  0xa8   : > { %v672_v38 = vpop.f32.mrf.mxu2 }
  0xa9   : > { %v559_v39 = vpop.f32.mrf.mxu0 }
  0xaa   : > { %v560_v40 = vadd.f32 %v1566_v37, %v559_v39  ;;  %v613_v41 = vpop.f32.mrf.mxu1 }
  0xac   : > { %v614_v42 = vadd.f32 %v613_v41, %v560_v40 }
  0xae   : > { %v1569_v43 = vadd.f32 %v667_v35, %v614_v42 }
  0xb0   : > { %v674_v44 = vpop.f32.mrf.mxu2  ;;  %v1577_v56 = vpop.f32.mrf.mxu3  ;;  %v755_v32 = vmul.f32 %v1569_v43, %v1569_v43 }
  0xb1   : > { %v561_v45 = vpop.f32.mrf.mxu0 }
  0xb2   : > { %v562_v46 = vadd.f32 %v1566_v37, %v561_v45  ;;  %v615_v47 = vpop.f32.mrf.mxu1 }
  0xb4   : > { %v616_v48 = vadd.f32 %v615_v47, %v562_v46 }
  0xb6   : > { %v1572_v49 = vadd.f32 %v669_v36, %v616_v48 }
  0xb8   : > { %v677_v50 = vpop.f32.mrf.mxu2  ;;  %v1579_v61 = vpop.f32.mrf.mxu3  ;;  %v756_v29 = vmul.f32 %v1572_v49, %v1572_v49  ;;  %v732_v34 = vadd.f32 %v1572_v49, %v1569_v43 }
  0xb9   : > { %v564_v51 = vpop.f32.mrf.mxu0 }
  0xba   : > { %v565_v52 = vadd.f32 %v1566_v37, %v564_v51  ;;  %v618_v53 = vpop.f32.mrf.mxu1  ;;  %v773_v40 = vadd.f32 %v756_v29, %v755_v32 }
  0xbc   : > { %v619_v54 = vadd.f32 %v618_v53, %v565_v52 }
  0xbe   : > { %v1575_v55 = vadd.f32 %v672_v38, %v619_v54 }
  0xc0   : > { %v679_v57 = vpop.f32.mrf.mxu2  ;;  %v1581_v3 = vpop.f32.mrf.mxu3  ;;  %v757_v35 = vmul.f32 %v1575_v55, %v1575_v55  ;;  %v733_v41 = vadd.f32 %v732_v34, %v1575_v55 }
  0xc1   : > { %v566_v58 = vpop.f32.mrf.mxu0 }
  0xc2   : > { %v620_v59 = vpop.f32.mrf.mxu1  ;;  %v567_v19 = vadd.f32 %v1566_v37, %v566_v58 }
  0xc4   : > { %v621_v22 = vadd.f32 %v620_v59, %v567_v19 }
  0xc6   : > { %v1603_v30 = vadd.f32 %v674_v44, %v621_v22 }
  0xc8   : > { %v682_v60 = vpop.f32.mrf.mxu2  ;;  %v1583_v7 = vpop.f32.mrf.mxu3  ;;  %v758_v42 = vmul.f32 %v1603_v30, %v1603_v30  ;;  %v734_v52 = vadd.f32 %v733_v41, %v1603_v30 }
  0xc9   : > { %v569_v62 = vpop.f32.mrf.mxu0 }
  0xca   : > { %v623_v63 = vpop.f32.mrf.mxu1  ;;  %v570_v20 = vadd.f32 %v1566_v37, %v569_v62 }
  0xcc   : > { %v624_v26 = vadd.f32 %v623_v63, %v570_v20 }
  0xce   : > { %v1612_v36 = vadd.f32 %v677_v50, %v624_v26  ;;  %v774_v50 = vadd.f32 %v773_v40, %v757_v35  ;;  %v595_v35 = vadd.f32 %v1566_v37, %v1577_v56 }
  0xd0   : > { %v684_v0 = vpop.f32.mrf.mxu2  ;;  %v1585_v11 = vpop.f32.mrf.mxu3  ;;  %v759_v53 = vmul.f32 %v1612_v36, %v1612_v36  ;;  %v735_v62 = vadd.f32 %v734_v52, %v1612_v36 }
  0xd1   : > { %v571_v1 = vpop.f32.mrf.mxu0 }
  0xd2   : > { %v625_v2 = vpop.f32.mrf.mxu1  ;;  %v572_v23 = vadd.f32 %v1566_v37, %v571_v1 }
  0xd4   : > { %v626_v31 = vadd.f32 %v625_v2, %v572_v23 }
  0xd6   : > { %v1618_v44 = vadd.f32 %v679_v57, %v626_v31  ;;  %v775_v57 = vadd.f32 %v774_v50, %v758_v42  ;;  %v597_v42 = vadd.f32 %v1566_v37, %v1579_v61  ;;  %v649_v50 = vadd.f32 %v1585_v11, %v595_v35 }
  0xd8   : > { %v687_v4 = vpop.f32.mrf.mxu2  ;;  %v1591_v16 = vpop.f32.mrf.mxu3  ;;  %v760_v63 = vmul.f32 %v1618_v44, %v1618_v44 }
  0xd9   : > { %v574_v5 = vpop.f32.mrf.mxu0 }
  0xda   : > { %v628_v6 = vpop.f32.mrf.mxu1  ;;  %v575_v27 = vadd.f32 %v1566_v37, %v574_v5 }
  0xdc   : > { %v629_v38 = vadd.f32 %v628_v6, %v575_v27 }
  0xde   : > { %v1626_v54 = vadd.f32 %v682_v60, %v629_v38 }
  0xe0   : > { %v689_v8 = vpop.f32.mrf.mxu2  ;;  %v1599_v28 = vpop.f32.mrf.mxu3  ;;  %v761_v60 = vmul.f32 %v1626_v54, %v1626_v54 }
  0xe1   : > { %v576_v9 = vpop.f32.mrf.mxu0 }
  0xe2   : > { %v630_v10 = vpop.f32.mrf.mxu1  ;;  %v577_v33 = vadd.f32 %v1566_v37, %v576_v9  ;;  %v776_v9 = vadd.f32 %v775_v57, %v759_v53  ;;  %v651_v57 = vadd.f32 %v1591_v16, %v597_v42 }
  0xe4   : > { %v631_v47 = vadd.f32 %v630_v10, %v577_v33  ;;  %v736_v10 = vadd.f32 %v735_v62, %v1618_v44 }
  0xe6   : > { %v1632_v2 = vadd.f32 %v684_v0, %v631_v47  ;;  %v737_v19 = vadd.f32 %v736_v10, %v1626_v54 }
  0xe8   : > { %v1587_v12 = vpop.f32.mrf.mxu2  ;;  %v655_v1 = vpop.f32.mrf.mxu3  ;;  %v762_v0 = vmul.f32 %v1632_v2, %v1632_v2  ;;  %v738_v29 = vadd.f32 %v737_v19, %v1632_v2 }
  0xe9   : > { %v579_v13 = vpop.f32.mrf.mxu0 }
  0xea   : > { %v633_v14 = vpop.f32.mrf.mxu1  ;;  %v580_v39 = vadd.f32 %v1566_v37, %v579_v13 }
  0xec   : > { %v634_v58 = vadd.f32 %v633_v14, %v580_v39 }
  0xee   : > { %v1638_v13 = vadd.f32 %v687_v4, %v634_v58 }
  0xf0   : > { %v1589_v15 = vpop.f32.mrf.mxu2  ;;  %v763_v4 = vmul.f32 %v1638_v13, %v1638_v13  ;;  %v739_v33 = vadd.f32 %v738_v29, %v1638_v13  ;;  %v707_v38 = vpop.f32.mrf.mxu3 }
  0xf1   : > { %v581_v17 = vpop.f32.mrf.mxu0 }
  0xf2   : > { %v635_v18 = vpop.f32.mrf.mxu1  ;;  %v582_v48 = vadd.f32 %v1566_v37, %v581_v17  ;;  %v777_v17 = vadd.f32 %v776_v9, %v760_v63 }
  0xf4   : > { %v636_v5 = vadd.f32 %v635_v18, %v582_v48  ;;  %v778_v26 = vadd.f32 %v777_v17, %v761_v60 }
  0xf6   : > { %v1643_v22 = vadd.f32 %v689_v8, %v636_v5  ;;  %v779_v32 = vadd.f32 %v778_v26, %v762_v0 }
  0xf8   : > { %v1595_v21 = vpop.f32.mrf.mxu2  ;;  %v764_v8 = vmul.f32 %v1643_v22, %v1643_v22  ;;  %v780_v39 = vadd.f32 %v779_v32, %v763_v4  ;;  %v740_v40 = vadd.f32 %v739_v33, %v1643_v22  ;;  %v709_v16 = vpop.f32.mrf.mxu3 }
  0xf9   : > { %v584_v24 = vpop.f32.mrf.mxu0 }
  0xfa   : > { %v638_v25 = vpop.f32.mrf.mxu1  ;;  %v585_v59 = vadd.f32 %v1566_v37, %v584_v24  ;;  %v781_v47 = vadd.f32 %v780_v39, %v764_v8 }
  0xfc   : > { %v639_v14 = vadd.f32 %v638_v25, %v585_v59  ;;  %v602_v59 = vadd.f32 %v1566_v37, %v1583_v7 }
  0xfe   : > { %v1650_v25 = vadd.f32 %v1587_v12, %v639_v14  ;;  %v656_v7 = vadd.f32 %v655_v1, %v602_v59 }
 0x100   : > { %v1620_v45 = vpop.f32.mrf.mxu2  ;;  %v765_v12 = vmul.f32 %v1650_v25, %v1650_v25 }
 0x101   : > { %v586_v46 = vpop.f32.mrf.mxu0 }
 0x102   : > { %v640_v51 = vpop.f32.mrf.mxu1  ;;  %v587_v6 = vadd.f32 %v1566_v37, %v586_v46 }
 0x104   : > { %v641_v18 = vadd.f32 %v640_v51, %v587_v6  ;;  %v600_v51 = vadd.f32 %v1566_v37, %v1581_v3 }
 0x106   : > { %v1656_v34 = vadd.f32 %v1589_v15, %v641_v18  ;;  %v741_v15 = vadd.f32 %v740_v40, %v1650_v25  ;;  %v654_v6 = vadd.f32 %v1599_v28, %v600_v51 }
 0x108   : > { %v702_v27 = vpop.f32.mrf.mxu2  ;;  %v766_v56 = vmul.f32 %v1656_v34, %v1656_v34  ;;  %v742_v53 = vadd.f32 %v741_v15, %v1656_v34  ;;  %v1693_v14 = vadd.f32 %v707_v38, %v654_v6 }
 0x109   : > { %v589_v20 = vpop.f32.mrf.mxu0  ;;  %v1681_v5 = vadd.f32 %v702_v27, %v649_v50 }
 0x10a   : > { %v590_v23 = vadd.f32 %v1566_v37, %v589_v20  ;;  %v643_v24 = vpop.f32.mrf.mxu1  ;;  %v1698_v20 = vadd.f32 %v709_v16, %v656_v7  ;;  %v771_v1 = vmul.f32 %v1693_v14, %v1693_v14 }
 0x10b   : > { %v769_v17 = vmul.f32 %v1681_v5, %v1681_v5 }
 0x10c   : > { %v644_v31 = vadd.f32 %v643_v24, %v590_v23  ;;  %v772_v26 = vmul.f32 %v1698_v20, %v1698_v20 }
 0x10e   : > { %v1664_v41 = vadd.f32 %v1595_v21, %v644_v31  ;;  %v782_v21 = vadd.f32 %v781_v47, %v765_v12 }
 0x110   : > { %v767_v61 = vmul.f32 %v1664_v41, %v1664_v41  ;;  %v704_v62 = vpop.f32.mrf.mxu2  ;;  %v783_v63 = vadd.f32 %v782_v21, %v766_v56  ;;  %v743_v3 = vadd.f32 %v742_v53, %v1664_v41 }
 0x111   : > { %v591_v46 = vpop.f32.mrf.mxu0  ;;  %v1688_v10 = vadd.f32 %v704_v62, %v651_v57 }
 0x112   : > { %v592_v48 = vadd.f32 %v1566_v37, %v591_v46  ;;  %v645_v52 = vpop.f32.mrf.mxu1  ;;  %v784_v9 = vadd.f32 %v783_v63, %v767_v61 }
 0x113   : > { %v770_v28 = vmul.f32 %v1688_v10, %v1688_v10 }
 0x114   : > { %v646_v58 = vadd.f32 %v645_v52, %v592_v48 }
 0x116   : > { %v1685_v11 = vadd.f32 %v1620_v45, %v646_v58 }
 0x118   : > { %v744_v60 = vadd.f32 %v743_v3, %v1685_v11  ;;  %v768_v37 = vmul.f32 %v1685_v11, %v1685_v11 }
 0x11a   : > { %v745_v45 = vadd.f32 %v744_v60, %v1681_v5  ;;  %v785_v19 = vadd.f32 %v784_v9, %v768_v37 }
 0x11c   : > { %v746_v0 = vadd.f32 %v745_v45, %v1688_v10  ;;  %v786_v18 = vadd.f32 %v785_v19, %v769_v17 }
 0x11e   : > { %v747_v23 = vadd.f32 %v746_v0, %v1693_v14  ;;  %v787_v24 = vadd.f32 %v786_v18, %v770_v28 }
 0x120   : > { %v748_v27 = vadd.f32 %v747_v23, %v1698_v20  ;;  %v788_v29 = vadd.f32 %v787_v24, %v771_v1 }
 0x122   : > { %v749_v4 = vrot.slane %v748_v27, 4  ;;  %v789_v31 = vadd.f32 %v788_v29, %v772_v26 }
 0x124   : > { %v750_v32 = vadd.f32 %v749_v4, %v748_v27  ;;  %v790_v33 = vrot.slane %v789_v31, 4 }
 0x126   : > { %v751_v8 = vrot.slane %v750_v32, 2  ;;  %v791_v35 = vadd.f32 %v790_v33, %v789_v31 }
 0x128   : > { %v752_v38 = vadd.f32 %v751_v8, %v750_v32  ;;  %v792_v39 = vrot.slane %v791_v35, 2 }
 0x12a   : > { %v753_v40 = vrot.slane %v752_v38, 1  ;;  %v793_v12 = vadd.f32 %v792_v39, %v791_v35 }
 0x12c   : > { %v754_v42 = vadd.f32 %v753_v40, %v752_v38  ;;  %v794_v46 = vrot.slane %v793_v12, 1 }
 0x12e   : > { %v795_v47 = vadd.f32 %v794_v46, %v793_v12  ;;  %800 = vst [vmem:[#allocation3] sm:$0x1] %v754_v42 }
 0x130   : > { %801 = vst [vmem:[#allocation4] sm:$0x1] %v795_v47 }
 0x135   : > { %v815_v15 = vld [vmem:[#allocation3] sm:$0x1] }
 0x136   : > { %v817_v56 = vmul.f32 0.0069444445, %v815_v15 }
 0x137   : > { %v816_v48 = vld [vmem:[#allocation4] sm:$0x1] }
 0x138   : > { %v818_v51 = vmul.f32 0.0069444445, %v816_v48  ;;  %v819_v50 = vmul.f32 %v817_v56, %v817_v56  ;;  %v852_v57 = vperm.slane %v817_v56, 0 }
 0x13a   : > { %v820_v52 = vsub.f32 %v818_v51, %v819_v50  ;;  %v854_v3 = vsub.f32 %v1569_v43, %v852_v57  ;;  %v855_v6 = vsub.f32 %v1572_v49, %v852_v57  ;;  %v856_v60 = vsub.f32 %v1575_v55, %v852_v57 }
 0x13b   : > { %v857_v37 = vsub.f32 %v1603_v30, %v852_v57  ;;  %v858_v7 = vsub.f32 %v1612_v36, %v852_v57  ;;  %v859_v16 = vsub.f32 %v1618_v44, %v852_v57  ;;  %v860_v17 = vsub.f32 %v1626_v54, %v852_v57 }
 0x13c   : > { %v821_v21 = vmax.f32 %v820_v52, 0.0  ;;  %v861_v45 = vsub.f32 %v1632_v2, %v852_v57  ;;  %v862_v43 = vsub.f32 %v1638_v13, %v852_v57  ;;  %v863_v49 = vsub.f32 %v1643_v22, %v852_v57 }
 0x13d   : > { %v864_v28 = vsub.f32 %v1650_v25, %v852_v57  ;;  %v865_v55 = vsub.f32 %v1656_v34, %v852_v57  ;;  %v866_v30 = vsub.f32 %v1664_v41, %v852_v57  ;;  %v867_v0 = vsub.f32 %v1685_v11, %v852_v57 }
 0x13e   : > { %v822_v53 = vadd.f32 1e-05, %v821_v21  ;;  %v868_v44 = vsub.f32 %v1681_v5, %v852_v57  ;;  %v869_v54 = vsub.f32 %v1688_v10, %v852_v57  ;;  %v870_v2 = vsub.f32 %v1693_v14, %v852_v57 }
 0x13f   : > { %v871_v18 = vsub.f32 %v1698_v20, %v852_v57 }
 0x140   : > { %1362 = vrsqrt.f32 %v822_v53  ;;  %vm829_vm2 = vweird.f32 %v822_v53 }
 0x146   : > { %v1363_v61 = vpop.eup %1362 }
 0x147   : > { %v824_v58 = vmul.f32 %v1363_v61, %v822_v53  ;;  %vm830_vm1 = vweird.f32 %v1363_v61 }
 0x148   : > { %vm831_vm3 = vmor %vm829_vm2, %vm830_vm1 }
 0x149   : > { %v825_v59 = vmul.f32 %v1363_v61, %v824_v58 }
 0x14b   : > { %v826_v62 = vmul.f32 0.5, %v825_v59 }
 0x14d   : > { %v827_v63 = vsub.f32 1.5, %v826_v62 }
 0x14f   : > { %v828_v9 = vmul.f32 %v1363_v61, %v827_v63 }
 0x151   : > { %v832_v19 = vsel %vm831_vm3, %v1363_v61, %v828_v9 }
 0x152   : > { %v873_v36 = vperm.slane %v832_v19, 0 }
 0x154   : > { %v875_v13 = vmul.f32 %v873_v36, %v854_v3  ;;  %v876_v22 = vmul.f32 %v873_v36, %v855_v6  ;;  %v877_v1 = vmul.f32 %v873_v36, %v856_v60  ;;  %v878_v25 = vmul.f32 %v873_v36, %v857_v37 }
 0x155   : > { %v879_v23 = vmul.f32 %v873_v36, %v858_v7  ;;  %v880_v34 = vmul.f32 %v873_v36, %v859_v16  ;;  %v881_v24 = vmul.f32 %v873_v36, %v860_v17  ;;  %v882_v41 = vmul.f32 %v873_v36, %v861_v45 }
 0x156   : > { %v883_v26 = vmul.f32 %v873_v36, %v862_v43  ;;  %v884_v11 = vmul.f32 %v873_v36, %v863_v49  ;;  %v885_v27 = vmul.f32 %v873_v36, %v864_v28  ;;  %v886_v29 = vmul.f32 %v873_v36, %v865_v55 }
 0x157   : > { %v887_v5 = vmul.f32 %v873_v36, %v866_v30  ;;  %v888_v4 = vmul.f32 %v873_v36, %v867_v0  ;;  %v889_v10 = vmul.f32 %v873_v36, %v868_v44  ;;  %v890_v31 = vmul.f32 %v873_v36, %v869_v54 }
 0x158   : > { %v891_v14 = vmul.f32 %v873_v36, %v870_v2  ;;  %v892_v20 = vmul.f32 %v873_v36, %v871_v18  ;;  %v893_v32 = vmax.f32 %v875_v13, 0.0  ;;  %v894_v33 = vmax.f32 %v876_v22, 0.0 }
 0x159   : > { %v895_v8 = vmax.f32 %v877_v1, 0.0  ;;  %v896_v35 = vmax.f32 %v878_v25, 0.0  ;;  %v897_v38 = vmax.f32 %v879_v23, 0.0  ;;  %v898_v39 = vmax.f32 %v880_v34, 0.0 }
 0x15a   : > { %v899_v40 = vmax.f32 %v881_v24, 0.0  ;;  %v900_v12 = vmax.f32 %v882_v41, 0.0  ;;  %v901_v42 = vmax.f32 %v883_v26, 0.0  ;;  %v902_v46 = vmax.f32 %v884_v11, 0.0 }
 0x15b   : > { %v903_v47 = vmax.f32 %v885_v27, 0.0  ;;  %v904_v15 = vmax.f32 %v886_v29, 0.0  ;;  %v905_v56 = vmax.f32 %v887_v5, 0.0  ;;  %v906_v48 = vmax.f32 %v888_v4, 0.0 }
 0x15c   : > { %v907_v51 = vmax.f32 %v889_v10, 0.0  ;;  %v908_v50 = vmax.f32 %v890_v31, 0.0  ;;  %v1267_v52 = vpack.c.bf16 %v894_v33, %v893_v32  ;;  %v1272_v21 = vpack.c.bf16 %v896_v35, %v895_v8 }
 0x15d   : > { %v1277_v53 = vpack.c.bf16 %v898_v39, %v897_v38  ;;  %v1282_v61 = vpack.c.bf16 %v900_v12, %v899_v40  ;;  %v1292_v58 = vpack.c.bf16 %v904_v15, %v903_v47  ;;  %v1297_v59 = vpack.c.bf16 %v906_v48, %v905_v56 }
 0x15e   : > { %v1302_v57 = vpack.c.bf16 %v908_v50, %v907_v51  ;;  %v909_v62 = vmax.f32 %v891_v14, 0.0  ;;  %v910_v63 = vmax.f32 %v892_v20, 0.0  ;;  %1268 = vst [vmem:[%s201_s12] sm:$0xff] %v1267_v52   ;;  %v1287_v3 = vpack.c.bf16 %v902_v46, %v901_v42 }
 0x15f   : > { %1309 = vst [vmem:[%s201_s12 + $0x8] sm:$0xff] %v1272_v21  }
 0x160   : > { %1310 = vst [vmem:[%s201_s12 + $0x10] sm:$0xff] %v1277_v53   ;;  %v1307_v6 = vpack.c.bf16 %v910_v63, %v909_v62 }
 0x161   : > { %1311 = vst [vmem:[%s201_s12 + $0x18] sm:$0xff] %v1282_v61  }
 0x162   : > { %1312 = vst [vmem:[%s201_s12 + $0x20] sm:$0xff] %v1287_v3  }
 0x163   : > { %1313 = vst [vmem:[%s201_s12 + $0x28] sm:$0xff] %v1292_v58  }
 0x164   : > { %1314 = vst [vmem:[%s201_s12 + $0x30] sm:$0xff] %v1297_v59  }
 0x165   : > { %1315 = vst [vmem:[%s201_s12 + $0x38] sm:$0xff] %v1302_v57  }
 0x166   : > { %1316 = vst [vmem:[%s201_s12 + $0x40] sm:$0xff] %v1307_v6  }
 0x167 PF: > { %s13_s14 = sadd.s32 1, %s1386_s14   ;;  %s1744_s12 = smov %s1382_s13 }
 0x168   : > { %p10_p5 = scmp.ge.s32.totalorder %s13_s14, 4   ;;  %s1745_s13 = smov %s1747_s15 }
 0x16a   :  { %12 = sbr.rel (!%p10_p5) target bundleno = 2 (0x2), region = 75 }

// kernel: _lambda_.9
= control target key start
LH: loop header
LB: loop body
LE: loop exit
PB: predicated region body
PF: predicated region fallthrough
CT: control target
= control target key end

     0   :  { %s1553_s15 = smov 0   ;;  %s1555_s16 = smov 0   ;;  %s1940_s0 = inlined_call_operand.vmem [shape: bf16[2,144,288], index: 0, kind: input, shape index: {}]   ;;  %s1941_s1 = inlined_call_operand.vmem [shape: bf16[288,128], index: 1, kind: input, shape index: {}]   ;;  %s1942_s2 = inlined_call_operand.vmem [shape: f32[1,128], index: 2, kind: input, shape index: {}]   ;;  %s1943_s3 = inlined_call_operand.vmem [shape: bf16[2,1,144,128], index: 3, kind: input, shape index: {}]   ;;  %s1944_s4 = inlined_call_operand.vmem [shape: bf16[2,1,144,128], index: 4, kind: output, shape index: {}]  }
   0x1   :  { %s1557_s17 = smov 0  }
   0x2 LB: > { %s26_s18 = sadd.s32 1, %s1522_s16  ;;  %p1120_p0 = scmp.ge.s32.totalorder %s1526_s17, 1  ;;  %s1526_s17 = sphi %s1557_s17, %s14_s17   ;;  %s1522_s16 = sphi %s1555_s16, %s1946_s16   ;;  %s1518_s15 = sphi %s1553_s15, %s1945_s15  }
   0x3   : > { %p28_p1 = scmp.ge.s32.totalorder %s26_s18, 2  ;;  %p192_p2 = scmp.lt.s32.totalorder %s1526_s17, 3 }
   0x5   : > { %s1948_s18 = smov (%p28_p1, %s26_s18), 0  ;;  %p193_p3 = pnand %p1120_p0, %p192_p2 }
   0x6   : > { %p229_p4 = scmp.lt.s32.totalorder (!%p193_p3), %s1518_s15, 1 }
   0x7   : > { %196 = sbr.rel (%p193_p3) target bundleno = 359 (0x167), region = 36 }
   0xc   : > { %v1349_v0 = vld [vmem:[%s1941_s1 + $0x38] sm:$0xff]  ;;  %v1582_v2 = vld [vmem:[%s1941_s1 + $0x88] sm:$0xff]  ;;  %v1348_v3 = vld [vmem:[%s1941_s1 + $0x30] sm:$0xff]  ;;  %s1950_s15 = smov (!%p229_p4, %s1518_s15), 1  ;;  %vm569_vm0 = vcmask 261120  }
   0xd   : > { %v1577_v1 = vld [vmem:[%s1941_s1 + $0x78] sm:$0xff]  ;;  %597 = vmatpush.bf16.msra.mxu0 %v1349_v0  ;;  %1457 = vmatpush.bf16.msra.mxu3 %v1349_v0  ;;  %v1356_v4 = vld [vmem:[%s1941_s1 + $0x70] sm:$0xff]  ;;  %v1597_v5 = vld [vmem:[%s1941_s1 + $0x80] sm:$0xff]  ;;  %s1475_s5 = smul.u32 216, %s1950_s15 }
   0xe   : > { %651 = vmatpush.bf16.msra.mxu1 %v1577_v1  ;;  %711 = vmatpush.bf16.msra.mxu2 %v1582_v2  ;;  %v1347_v6 = vld [vmem:[%s1941_s1 + $0x28] sm:$0xff]  ;;  %v1346_v11 = vld [vmem:[%s1941_s1 + $0x20] sm:$0xff]  ;;  %v1345_v13 = vld [vmem:[%s1941_s1 + $0x18] sm:$0xff] }
   0xf   : > { %s1603_s8 = scalar_lea.vmem %s1940_s0, %s1475_s5  ;;  %v1355_v9 = vld [vmem:[%s1941_s1 + $0x68] sm:$0xff]  ;;  %v1354_v12 = vld [vmem:[%s1941_s1 + $0x60] sm:$0xff]  ;;  %v1353_v14 = vld [vmem:[%s1941_s1 + $0x58] sm:$0xff] }
  0x10   : > { %v1134_v7 = vld [vmem:[%s1603_s8 + $0x8] sm:$0xf]  ;;  %v1317_v8 = vld [vmem:[%s1603_s8 + $0x10] sm:$0xf0]  ;;  %v1146_v17 = vld [vmem:[%s1603_s8 + $0x20] sm:$0xf] }
  0x11   : > { %598 = vmatpush.bf16.msra.mxu0 %v1348_v3  ;;  %1458 = vmatpush.bf16.msra.mxu3 %v1348_v3  ;;  %v1135_v10 = vor.u32 %v1317_v8, %v1134_v7  ;;  %v1344_v15 = vld [vmem:[%s1941_s1 + $0x10] sm:$0xff]  ;;  %v1320_v18 = vld [vmem:[%s1603_s8 + $0x28] sm:$0xf0]  ;;  %v1342_v22 = vld [vmem:[%s1941_s1] sm:$0xff] }
  0x12   : > { %652 = vmatpush.bf16.msra.mxu1 %v1356_v4  ;;  %712 = vmatpush.bf16.msra.mxu2 %v1597_v5  ;;  %v1352_v16 = vld [vmem:[%s1941_s1 + $0x50] sm:$0xff]  ;;  %v1147_v19 = vor.u32 %v1320_v18, %v1146_v17  ;;  %v1343_v20 = vld [vmem:[%s1941_s1 + $0x8] sm:$0xff]  ;;  %v1350_v23 = vld [vmem:[%s1941_s1 + $0x40] sm:$0xff] }
  0x13   : > { %v1351_v21 = vld [vmem:[%s1941_s1 + $0x48] sm:$0xff]  ;;  %v1126_v24 = vld [vmem:[%s1603_s8] sm:$0xf]  ;;  %v1337_v27 = vld [vmem:[%s1603_s8 + $0xb0] sm:$0xf0] }
  0x14   : > { %v1316_v25 = vld [vmem:[%s1603_s8 + $0x8] sm:$0xf0]  ;;  %v1210_v26 = vld [vmem:[%s1603_s8 + $0xa8] sm:$0xf]  ;;  %v1315_v28 = vld [vmem:[%s1603_s8 + $0x4] sm:$0xf] }
  0x15   : > { %1304 = vmatmul.msk.bf16.vlgmr.msra.gmra.mxu2 %vm569_vm0, %v1135_v10  ;;  %599 = vmatpush.bf16.msra.mxu0 %v1347_v6  ;;  %v1128_v29 = vld [vmem:[%s1603_s8 + $0xc] sm:$0xf0]  ;;  %v1127_v30 = vor.u32 %v1316_v25, %v1126_v24  ;;  %v1211_v31 = vor.u32 %v1337_v27, %v1210_v26  ;;  %v1158_v33 = vld [vmem:[%s1603_s8 + $0x38] sm:$0xf]  ;;  %v1323_v34 = vld [vmem:[%s1603_s8 + $0x40] sm:$0xf0] }
  0x16   : > { %1459 = vmatpush.bf16.msra.mxu3 %v1347_v6  ;;  %653 = vmatpush.bf16.msra.mxu1 %v1355_v9  ;;  %v1131_v32 = vor.u32 %v1315_v28, %v1128_v29  ;;  %v1159_v35 = vor.u32 %v1323_v34, %v1158_v33  ;;  %v1138_v36 = vld [vmem:[%s1603_s8 + $0x18] sm:$0xf]  ;;  %v1319_v37 = vld [vmem:[%s1603_s8 + $0x20] sm:$0xf0]  ;;  %v1222_v38 = vld [vmem:[%s1603_s8 + $0xc0] sm:$0xf] }
  0x17   : > { %v1340_v39 = vld [vmem:[%s1603_s8 + $0xc8] sm:$0xf0]  ;;  %v1318_v40 = vld [vmem:[%s1603_s8 + $0x1c] sm:$0xf]  ;;  %v1140_v41 = vld [vmem:[%s1603_s8 + $0x24] sm:$0xf0]  ;;  %v1139_v42 = vor.u32 %v1319_v37, %v1138_v36 }
  0x18   : > { %v1223_v43 = vor.u32 %v1340_v39, %v1222_v38  ;;  %v1143_v44 = vor.u32 %v1318_v40, %v1140_v41  ;;  %v1170_v45 = vld [vmem:[%s1603_s8 + $0x50] sm:$0xf]  ;;  %v1326_v46 = vld [vmem:[%s1603_s8 + $0x58] sm:$0xf0]  ;;  %v1321_v50 = vld [vmem:[%s1603_s8 + $0x34] sm:$0xf] }
  0x19   : > { %600 = vmatpush.bf16.msra.mxu0 %v1346_v11  ;;  %v1171_v47 = vor.u32 %v1326_v46, %v1170_v45  ;;  %v1150_v48 = vld [vmem:[%s1603_s8 + $0x30] sm:$0xf]  ;;  %v1322_v49 = vld [vmem:[%s1603_s8 + $0x38] sm:$0xf0]  ;;  %v1152_v51 = vld [vmem:[%s1603_s8 + $0x3c] sm:$0xf0] }
  0x1a   : > { %1460 = vmatpush.bf16.msra.mxu3 %v1346_v11  ;;  %654 = vmatpush.bf16.msra.mxu1 %v1354_v12  ;;  %v1336_v52 = vld [vmem:[%s1603_s8 + $0xac] sm:$0xf]  ;;  %v1212_v53 = vld [vmem:[%s1603_s8 + $0xb4] sm:$0xf0]  ;;  %v1151_v54 = vor.u32 %v1322_v49, %v1150_v48  ;;  %v1155_v55 = vor.u32 %v1321_v50, %v1152_v51  ;;  %v1182_v57 = vld [vmem:[%s1603_s8 + $0x68] sm:$0xf] }
  0x1b   : > { %v1215_v56 = vor.u32 %v1336_v52, %v1212_v53  ;;  %v1329_v58 = vld [vmem:[%s1603_s8 + $0x70] sm:$0xf0]  ;;  %v1162_v60 = vld [vmem:[%s1603_s8 + $0x48] sm:$0xf]  ;;  %v1324_v62 = vld [vmem:[%s1603_s8 + $0x4c] sm:$0xf] }
  0x1c   : > { %v1183_v59 = vor.u32 %v1329_v58, %v1182_v57  ;;  %v1325_v61 = vld [vmem:[%s1603_s8 + $0x50] sm:$0xf0]  ;;  %v1164_v63 = vld [vmem:[%s1603_s8 + $0x54] sm:$0xf0]  ;;  %v1339_v0 = vld [vmem:[%s1603_s8 + $0xc4] sm:$0xf] }
  0x1d   : > { %601 = vmatpush.bf16.msra.mxu0 %v1345_v13  ;;  %v1167_v3 = vor.u32 %v1324_v62, %v1164_v63  ;;  %v1332_v6 = vld [vmem:[%s1603_s8 + $0x88] sm:$0xf0]  ;;  %v1174_v8 = vld [vmem:[%s1603_s8 + $0x60] sm:$0xf]  ;;  %v1327_v10 = vld [vmem:[%s1603_s8 + $0x64] sm:$0xf] }
  0x1e   : > { %1461 = vmatpush.bf16.msra.mxu3 %v1345_v13  ;;  %655 = vmatpush.bf16.msra.mxu1 %v1353_v14  ;;  %v1176_v11 = vld [vmem:[%s1603_s8 + $0x6c] sm:$0xf0]  ;;  %v1341_v13 = vld [vmem:[%s1603_s8 + $0xd0] sm:$0xf0]  ;;  %v1206_v17 = vld [vmem:[%s1603_s8 + $0x98] sm:$0xf] }
  0x1f   : > { %v1335_v18 = vld [vmem:[%s1603_s8 + $0xa0] sm:$0xf0]  ;;  %v1218_v26 = vld [vmem:[%s1603_s8 + $0xb0] sm:$0xf]  ;;  %v1338_v27 = vld [vmem:[%s1603_s8 + $0xb8] sm:$0xf0] }
  0x20   : > { %v1219_v28 = vor.u32 %v1338_v27, %v1218_v26  ;;  %v1198_v29 = vld [vmem:[%s1603_s8 + $0x90] sm:$0xf]  ;;  %v1711_v37 = vld [vmem:[%s1942_s2] ss:$0 sm:$0xff] }
  0x21   : > { %602 = vmatpush.bf16.msra.mxu0 %v1344_v15 }
  0x22   : > { %1462 = vmatpush.bf16.msra.mxu3 %v1344_v15  ;;  %656 = vmatpush.bf16.msra.mxu1 %v1352_v16  ;;  %v1179_v15 = vor.u32 %v1327_v10, %v1176_v11 }
  0x25   : > { %1305 = vmatmul.msk.bf16.gmra.mxu2 %vm569_vm0, %v1147_v19  ;;  %603 = vmatpush.bf16.msra.mxu0 %v1343_v20  ;;  %v1207_v19 = vor.u32 %v1335_v18, %v1206_v17 }
  0x26   : > { %1463 = vmatpush.bf16.msra.mxu3 %v1343_v20  ;;  %657 = vmatpush.bf16.msra.mxu1 %v1351_v21  ;;  %v1186_v20 = vld [vmem:[%s1603_s8 + $0x78] sm:$0xf] }
  0x29   : > { %604 = vmatpush.bf16.msra.mxu0 %v1342_v22 }
  0x2a   : > { %1464 = vmatpush.bf16.msra.mxu3 %v1342_v22  ;;  %658 = vmatpush.bf16.msra.mxu1 %v1350_v23  ;;  %v1330_v22 = vld [vmem:[%s1603_s8 + $0x7c] sm:$0xf] }
  0x2c   : > { %605 = vmatmul.bf16.vlgmr.msra.gmra.mxu0 %v1127_v30  ;;  %v1334_v30 = vld [vmem:[%s1603_s8 + $0x98] sm:$0xf0] }
  0x2d   : > { %640 = vmatmul.bf16.vlgmr.msra.gmra.mxu3 %v1211_v31  ;;  %659 = vmatmul.bf16.vlgmr.msra.gmra.mxu1 %v1131_v32  ;;  %v1333_v31 = vld [vmem:[%s1603_s8 + $0x94] sm:$0xf]  ;;  %v1200_v32 = vld [vmem:[%s1603_s8 + $0x9c] sm:$0xf0]  ;;  %v1199_v33 = vor.u32 %v1334_v30, %v1198_v29 }
  0x2e   : > { %1465 = vmatpush.bf16.msrb.mxu3 %v1577_v1  ;;  %v1224_v1 = vld [vmem:[%s1603_s8 + $0xcc] sm:$0xf0]  ;;  %v1203_v34 = vor.u32 %v1333_v31, %v1200_v32 }
  0x32   : > { %1466 = vmatpush.bf16.msrb.mxu3 %v1356_v4  ;;  %v1227_v4 = vor.u32 %v1339_v0, %v1224_v1 }
  0x35   : > { %1306 = vmatmul.msk.bf16.gmra.mxu2 %vm569_vm0, %v1159_v35 }
  0x36   : > { %1467 = vmatpush.bf16.msrb.mxu3 %v1355_v9  ;;  %v1328_v9 = vld [vmem:[%s1603_s8 + $0x68] sm:$0xf0] }
  0x3a   : > { %1468 = vmatpush.bf16.msrb.mxu3 %v1354_v12  ;;  %v1230_v12 = vld [vmem:[%s1603_s8 + $0xc8] sm:$0xf] }
  0x3c   : > { %610 = vmatmul.bf16.gmra.mxu0 %v1139_v42 }
  0x3d   : > { %645 = vmatmul.bf16.gmra.mxu3 %v1223_v43  ;;  %664 = vmatmul.bf16.gmra.mxu1 %v1143_v44 }
  0x3e   : > { %1469 = vmatpush.bf16.msrb.mxu3 %v1353_v14  ;;  %v1175_v14 = vor.u32 %v1328_v9, %v1174_v8 }
  0x42   : > { %1470 = vmatpush.bf16.msrb.mxu3 %v1352_v16  ;;  %v1231_v16 = vor.u32 %v1341_v13, %v1230_v12 }
  0x45   : > { %1307 = vmatmul.msk.bf16.gmra.mxu2 %vm569_vm0, %v1171_v47 }
  0x46   : > { %1471 = vmatpush.bf16.msrb.mxu3 %v1351_v21  ;;  %v1331_v21 = vld [vmem:[%s1603_s8 + $0x80] sm:$0xf0] }
  0x47   : > { %v1187_v24 = vor.u32 %v1331_v21, %v1186_v20 }
  0x4a   : > { %1472 = vmatpush.bf16.msrb.mxu3 %v1350_v23  ;;  %v1188_v23 = vld [vmem:[%s1603_s8 + $0x84] sm:$0xf0] }
  0x4b   : > { %v1191_v25 = vor.u32 %v1330_v22, %v1188_v23 }
  0x4c   : > { %615 = vmatmul.bf16.gmra.mxu0 %v1151_v54 }
  0x4d   : > { %669 = vmatmul.bf16.gmra.mxu1 %v1155_v55  ;;  %694 = vmatmul.bf16.vlgmr.msrb.gmra.mxu3 %v1215_v56 }
  0x4e   : > { %1473 = vmatpush.bf16.msra.mxu3 %v1582_v2  ;;  %v1163_v2 = vor.u32 %v1325_v61, %v1162_v60 }
  0x52   : > { %1474 = vmatpush.bf16.msra.mxu3 %v1597_v5  ;;  %v1194_v5 = vld [vmem:[%s1603_s8 + $0x80] sm:$0xf]  ;;  %s1476_s8 = smul.u32 72, %s1950_s15 }
  0x53   : > { %v1195_v7 = vor.u32 %v1332_v6, %v1194_v5 }
  0x54   : > { %s1860_s20 = scalar_lea.vmem %s1943_s3, %s1476_s8  ;;  %s248_s23 = scalar_lea.vmem %s1944_s4, %s1476_s8 }
  0x55   : > { %1308 = vmatmul.msk.bf16.gmra.mxu2 %vm569_vm0, %v1183_v59 }
  0x5c   : > { %620 = vmatmul.bf16.gmra.mxu0 %v1163_v2 }
  0x5d   : > { %674 = vmatmul.bf16.gmra.mxu1 %v1167_v3  ;;  %699 = vmatmul.bf16.gmra.mxu3 %v1227_v4 }
  0x65   : > { %1309 = vmatmul.msk.bf16.gmra.mxu2 %vm569_vm0, %v1195_v7 }
  0x6c   : > { %625 = vmatmul.bf16.gmra.mxu0 %v1175_v14 }
  0x6d   : > { %679 = vmatmul.bf16.gmra.mxu1 %v1179_v15  ;;  %1312 = vmatmul.msk.bf16.vlgmr.msra.gmra.mxu3 %vm569_vm0, %v1231_v16 }
  0x75   : > { %1310 = vmatmul.msk.bf16.gmra.mxu2 %vm569_vm0, %v1207_v19 }
  0x7c   : > { %630 = vmatmul.bf16.gmra.mxu0 %v1187_v24 }
  0x7d   : > { %684 = vmatmul.bf16.gmra.mxu1 %v1191_v25 }
  0x85   : > { %1311 = vmatmul.msk.bf16.gmra.mxu2 %vm569_vm0, %v1219_v28 }
  0x8c   : > { %635 = vmatmul.bf16.gmra.mxu0 %v1199_v33 }
  0x8d   : > { %689 = vmatmul.bf16.gmra.mxu1 %v1203_v34 }
  0x98   : > { %v714_v35 = vpop.f32.mrf.mxu2 }
  0xa0   : > { %v716_v36 = vpop.f32.mrf.mxu2 }
  0xa8   : > { %v719_v38 = vpop.f32.mrf.mxu2 }
  0xa9   : > { %v606_v39 = vpop.f32.mrf.mxu0 }
  0xaa   : > { %v607_v40 = vadd.f32 %v1711_v37, %v606_v39  ;;  %v660_v41 = vpop.f32.mrf.mxu1 }
  0xac   : > { %v661_v42 = vadd.f32 %v660_v41, %v607_v40 }
  0xae   : > { %v1714_v43 = vadd.f32 %v714_v35, %v661_v42 }
  0xb0   : > { %v721_v44 = vpop.f32.mrf.mxu2  ;;  %v1722_v56 = vpop.f32.mrf.mxu3  ;;  %v802_v32 = vmul.f32 %v1714_v43, %v1714_v43 }
  0xb1   : > { %v608_v45 = vpop.f32.mrf.mxu0 }
  0xb2   : > { %v609_v46 = vadd.f32 %v1711_v37, %v608_v45  ;;  %v662_v47 = vpop.f32.mrf.mxu1 }
  0xb4   : > { %v663_v48 = vadd.f32 %v662_v47, %v609_v46 }
  0xb6   : > { %v1717_v49 = vadd.f32 %v716_v36, %v663_v48 }
  0xb8   : > { %v724_v50 = vpop.f32.mrf.mxu2  ;;  %v1724_v61 = vpop.f32.mrf.mxu3  ;;  %v803_v29 = vmul.f32 %v1717_v49, %v1717_v49  ;;  %v779_v34 = vadd.f32 %v1717_v49, %v1714_v43 }
  0xb9   : > { %v611_v51 = vpop.f32.mrf.mxu0 }
  0xba   : > { %v612_v52 = vadd.f32 %v1711_v37, %v611_v51  ;;  %v665_v53 = vpop.f32.mrf.mxu1  ;;  %v820_v40 = vadd.f32 %v803_v29, %v802_v32 }
  0xbc   : > { %v666_v54 = vadd.f32 %v665_v53, %v612_v52 }
  0xbe   : > { %v1720_v55 = vadd.f32 %v719_v38, %v666_v54 }
  0xc0   : > { %v726_v57 = vpop.f32.mrf.mxu2  ;;  %v1726_v3 = vpop.f32.mrf.mxu3  ;;  %v804_v35 = vmul.f32 %v1720_v55, %v1720_v55  ;;  %v780_v41 = vadd.f32 %v779_v34, %v1720_v55 }
  0xc1   : > { %v613_v58 = vpop.f32.mrf.mxu0 }
  0xc2   : > { %v667_v59 = vpop.f32.mrf.mxu1  ;;  %v614_v19 = vadd.f32 %v1711_v37, %v613_v58 }
  0xc4   : > { %v668_v22 = vadd.f32 %v667_v59, %v614_v19 }
  0xc6   : > { %v1748_v30 = vadd.f32 %v721_v44, %v668_v22 }
  0xc8   : > { %v729_v60 = vpop.f32.mrf.mxu2  ;;  %v1728_v7 = vpop.f32.mrf.mxu3  ;;  %v805_v42 = vmul.f32 %v1748_v30, %v1748_v30  ;;  %v781_v52 = vadd.f32 %v780_v41, %v1748_v30 }
  0xc9   : > { %v616_v62 = vpop.f32.mrf.mxu0 }
  0xca   : > { %v670_v63 = vpop.f32.mrf.mxu1  ;;  %v617_v20 = vadd.f32 %v1711_v37, %v616_v62 }
  0xcc   : > { %v671_v26 = vadd.f32 %v670_v63, %v617_v20 }
  0xce   : > { %v1757_v36 = vadd.f32 %v724_v50, %v671_v26  ;;  %v821_v50 = vadd.f32 %v820_v40, %v804_v35  ;;  %v642_v35 = vadd.f32 %v1711_v37, %v1722_v56 }
  0xd0   : > { %v731_v0 = vpop.f32.mrf.mxu2  ;;  %v1730_v11 = vpop.f32.mrf.mxu3  ;;  %v806_v53 = vmul.f32 %v1757_v36, %v1757_v36  ;;  %v782_v62 = vadd.f32 %v781_v52, %v1757_v36 }
  0xd1   : > { %v618_v1 = vpop.f32.mrf.mxu0 }
  0xd2   : > { %v672_v2 = vpop.f32.mrf.mxu1  ;;  %v619_v23 = vadd.f32 %v1711_v37, %v618_v1 }
  0xd4   : > { %v673_v31 = vadd.f32 %v672_v2, %v619_v23 }
  0xd6   : > { %v1763_v44 = vadd.f32 %v726_v57, %v673_v31  ;;  %v822_v57 = vadd.f32 %v821_v50, %v805_v42  ;;  %v644_v42 = vadd.f32 %v1711_v37, %v1724_v61  ;;  %v696_v50 = vadd.f32 %v1730_v11, %v642_v35 }
  0xd8   : > { %v734_v4 = vpop.f32.mrf.mxu2  ;;  %v1736_v16 = vpop.f32.mrf.mxu3  ;;  %v807_v63 = vmul.f32 %v1763_v44, %v1763_v44 }
  0xd9   : > { %v621_v5 = vpop.f32.mrf.mxu0 }
  0xda   : > { %v675_v6 = vpop.f32.mrf.mxu1  ;;  %v622_v27 = vadd.f32 %v1711_v37, %v621_v5 }
  0xdc   : > { %v676_v38 = vadd.f32 %v675_v6, %v622_v27 }
  0xde   : > { %v1771_v54 = vadd.f32 %v729_v60, %v676_v38 }
  0xe0   : > { %v736_v8 = vpop.f32.mrf.mxu2  ;;  %v1744_v28 = vpop.f32.mrf.mxu3  ;;  %v808_v60 = vmul.f32 %v1771_v54, %v1771_v54 }
  0xe1   : > { %v623_v9 = vpop.f32.mrf.mxu0 }
  0xe2   : > { %v677_v10 = vpop.f32.mrf.mxu1  ;;  %v624_v33 = vadd.f32 %v1711_v37, %v623_v9  ;;  %v823_v9 = vadd.f32 %v822_v57, %v806_v53  ;;  %v698_v57 = vadd.f32 %v1736_v16, %v644_v42 }
  0xe4   : > { %v678_v47 = vadd.f32 %v677_v10, %v624_v33  ;;  %v783_v10 = vadd.f32 %v782_v62, %v1763_v44 }
  0xe6   : > { %v1777_v2 = vadd.f32 %v731_v0, %v678_v47  ;;  %v784_v19 = vadd.f32 %v783_v10, %v1771_v54 }
  0xe8   : > { %v1732_v12 = vpop.f32.mrf.mxu2  ;;  %v702_v1 = vpop.f32.mrf.mxu3  ;;  %v809_v0 = vmul.f32 %v1777_v2, %v1777_v2  ;;  %v785_v29 = vadd.f32 %v784_v19, %v1777_v2 }
  0xe9   : > { %v626_v13 = vpop.f32.mrf.mxu0 }
  0xea   : > { %v680_v14 = vpop.f32.mrf.mxu1  ;;  %v627_v39 = vadd.f32 %v1711_v37, %v626_v13 }
  0xec   : > { %v681_v58 = vadd.f32 %v680_v14, %v627_v39 }
  0xee   : > { %v1783_v13 = vadd.f32 %v734_v4, %v681_v58 }
  0xf0   : > { %v1734_v15 = vpop.f32.mrf.mxu2  ;;  %v810_v4 = vmul.f32 %v1783_v13, %v1783_v13  ;;  %v786_v33 = vadd.f32 %v785_v29, %v1783_v13  ;;  %v754_v38 = vpop.f32.mrf.mxu3 }
  0xf1   : > { %v628_v17 = vpop.f32.mrf.mxu0 }
  0xf2   : > { %v682_v18 = vpop.f32.mrf.mxu1  ;;  %v629_v48 = vadd.f32 %v1711_v37, %v628_v17  ;;  %v824_v17 = vadd.f32 %v823_v9, %v807_v63 }
  0xf4   : > { %v683_v5 = vadd.f32 %v682_v18, %v629_v48  ;;  %v825_v26 = vadd.f32 %v824_v17, %v808_v60 }
  0xf6   : > { %v1788_v22 = vadd.f32 %v736_v8, %v683_v5  ;;  %v826_v32 = vadd.f32 %v825_v26, %v809_v0 }
  0xf8   : > { %v1740_v21 = vpop.f32.mrf.mxu2  ;;  %v811_v8 = vmul.f32 %v1788_v22, %v1788_v22  ;;  %v827_v39 = vadd.f32 %v826_v32, %v810_v4  ;;  %v787_v40 = vadd.f32 %v786_v33, %v1788_v22  ;;  %v756_v16 = vpop.f32.mrf.mxu3 }
  0xf9   : > { %v631_v24 = vpop.f32.mrf.mxu0 }
  0xfa   : > { %v685_v25 = vpop.f32.mrf.mxu1  ;;  %v632_v59 = vadd.f32 %v1711_v37, %v631_v24  ;;  %v828_v47 = vadd.f32 %v827_v39, %v811_v8 }
  0xfc   : > { %v686_v14 = vadd.f32 %v685_v25, %v632_v59  ;;  %v649_v59 = vadd.f32 %v1711_v37, %v1728_v7 }
  0xfe   : > { %v1795_v25 = vadd.f32 %v1732_v12, %v686_v14  ;;  %v703_v7 = vadd.f32 %v702_v1, %v649_v59  ;;  %v1865_v59 = vld [vmem:[%s1860_s20] sm:$0xff]  }
 0x100   : > { %v1765_v45 = vpop.f32.mrf.mxu2  ;;  %v812_v12 = vmul.f32 %v1795_v25, %v1795_v25 }
 0x101   : > { %v633_v46 = vpop.f32.mrf.mxu0 }
 0x102   : > { %v687_v51 = vpop.f32.mrf.mxu1  ;;  %v634_v6 = vadd.f32 %v1711_v37, %v633_v46 }
 0x104   : > { %v688_v18 = vadd.f32 %v687_v51, %v634_v6  ;;  %v647_v51 = vadd.f32 %v1711_v37, %v1726_v3 }
 0x106   : > { %v1801_v34 = vadd.f32 %v1734_v15, %v688_v18  ;;  %v788_v15 = vadd.f32 %v787_v40, %v1795_v25  ;;  %v701_v6 = vadd.f32 %v1744_v28, %v647_v51 }
 0x108   : > { %v749_v27 = vpop.f32.mrf.mxu2  ;;  %v813_v56 = vmul.f32 %v1801_v34, %v1801_v34  ;;  %v789_v53 = vadd.f32 %v788_v15, %v1801_v34  ;;  %v1838_v14 = vadd.f32 %v754_v38, %v701_v6  ;;  %v1363_v6 = vunpack.c.h.bf16 %v1865_v59 }
 0x109   : > { %v636_v20 = vpop.f32.mrf.mxu0  ;;  %v1826_v5 = vadd.f32 %v749_v27, %v696_v50 }
 0x10a   : > { %v637_v23 = vadd.f32 %v1711_v37, %v636_v20  ;;  %v690_v24 = vpop.f32.mrf.mxu1  ;;  %v1843_v20 = vadd.f32 %v756_v16, %v703_v7  ;;  %v818_v1 = vmul.f32 %v1838_v14, %v1838_v14 }
 0x10b   : > { %v816_v17 = vmul.f32 %v1826_v5, %v1826_v5 }
 0x10c   : > { %v691_v31 = vadd.f32 %v690_v24, %v637_v23  ;;  %v819_v26 = vmul.f32 %v1843_v20, %v1843_v20 }
 0x10e   : > { %v1809_v41 = vadd.f32 %v1740_v21, %v691_v31  ;;  %v829_v21 = vadd.f32 %v828_v47, %v812_v12 }
 0x110   : > { %v814_v61 = vmul.f32 %v1809_v41, %v1809_v41  ;;  %v751_v62 = vpop.f32.mrf.mxu2  ;;  %v830_v63 = vadd.f32 %v829_v21, %v813_v56  ;;  %v790_v3 = vadd.f32 %v789_v53, %v1809_v41 }
 0x111   : > { %v638_v46 = vpop.f32.mrf.mxu0  ;;  %v1833_v10 = vadd.f32 %v751_v62, %v698_v57  ;;  %v1868_v57 = vld [vmem:[%s1860_s20 + $0x8] sm:$0xff]  }
 0x112   : > { %v639_v48 = vadd.f32 %v1711_v37, %v638_v46  ;;  %v692_v52 = vpop.f32.mrf.mxu1  ;;  %v831_v9 = vadd.f32 %v830_v63, %v814_v61  ;;  %v1367_v16 = vunpack.c.h.bf16 %v1868_v57 }
 0x113   : > { %v817_v28 = vmul.f32 %v1833_v10, %v1833_v10 }
 0x114   : > { %v693_v58 = vadd.f32 %v692_v52, %v639_v48 }
 0x116   : > { %v1830_v11 = vadd.f32 %v1765_v45, %v693_v58 }
 0x118   : > { %v791_v60 = vadd.f32 %v790_v3, %v1830_v11  ;;  %v815_v37 = vmul.f32 %v1830_v11, %v1830_v11  ;;  %v1362_v3 = vunpack.c.l.bf16 %v1865_v59 }
 0x11a   : > { %v792_v45 = vadd.f32 %v791_v60, %v1826_v5  ;;  %v832_v19 = vadd.f32 %v831_v9, %v815_v37  ;;  %v1366_v9 = vunpack.c.l.bf16 %v1868_v57 }
 0x11c   : > { %v793_v0 = vadd.f32 %v792_v45, %v1833_v10  ;;  %v833_v18 = vadd.f32 %v832_v19, %v816_v17 }
 0x11e   : > { %v794_v23 = vadd.f32 %v793_v0, %v1838_v14  ;;  %v834_v24 = vadd.f32 %v833_v18, %v817_v28  ;;  %v1442_v18 = vld [vmem:[%s1860_s20 + $0x10] sm:$0xff]  }
 0x120   : > { %v795_v27 = vadd.f32 %v794_v23, %v1843_v20  ;;  %v835_v29 = vadd.f32 %v834_v24, %v818_v1  ;;  %v1445_v23 = vld [vmem:[%s1860_s20 + $0x28] sm:$0xff]  }
 0x122   : > { %v796_v4 = vrot.slane %v795_v27, 4  ;;  %v836_v31 = vadd.f32 %v835_v29, %v819_v26  ;;  %v1446_v26 = vld [vmem:[%s1860_s20 + $0x30] sm:$0xff]  }
 0x124   : > { %v797_v32 = vadd.f32 %v796_v4, %v795_v27  ;;  %v837_v33 = vrot.slane %v836_v31, 4  ;;  %v1371_v27 = vunpack.c.h.bf16 %v1442_v18  ;;  %v1447_v4 = vld [vmem:[%s1860_s20 + $0x38] sm:$0xff]  }
 0x126   : > { %v798_v8 = vrot.slane %v797_v32, 2  ;;  %v838_v35 = vadd.f32 %v837_v33, %v836_v31  ;;  %v1448_v31 = vld [vmem:[%s1860_s20 + $0x40] sm:$0xff]  }
 0x128   : > { %v799_v38 = vadd.f32 %v798_v8, %v797_v32  ;;  %v839_v39 = vrot.slane %v838_v35, 2  ;;  %v1382_v8 = vunpack.c.l.bf16 %v1445_v23 }
 0x12a   : > { %v800_v40 = vrot.slane %v799_v38, 1  ;;  %v840_v12 = vadd.f32 %v839_v39, %v838_v35  ;;  %v1386_v39 = vunpack.c.l.bf16 %v1446_v26 }
 0x12c   : > { %v801_v42 = vadd.f32 %v800_v40, %v799_v38  ;;  %v841_v46 = vrot.slane %v840_v12, 1  ;;  %v1383_v38 = vunpack.c.h.bf16 %v1445_v23  ;;  %v1390_v40 = vunpack.c.l.bf16 %v1447_v4 }
 0x12e   : > { %v842_v47 = vadd.f32 %v841_v46, %v840_v12  ;;  %847 = vst [vmem:[#allocation3] sm:$0x1] %v801_v42  ;;  %v1391_v12 = vunpack.c.h.bf16 %v1447_v4  ;;  %v1395_v42 = vunpack.c.h.bf16 %v1448_v31 }
 0x130   : > { %848 = vst [vmem:[#allocation4] sm:$0x1] %v842_v47 }
 0x135   : > { %v862_v15 = vld [vmem:[#allocation3] sm:$0x1] }
 0x136   : > { %v864_v56 = vmul.f32 0.0069444445, %v862_v15 }
 0x137   : > { %v863_v48 = vld [vmem:[#allocation4] sm:$0x1] }
 0x138   : > { %v865_v51 = vmul.f32 0.0069444445, %v863_v48  ;;  %v866_v50 = vmul.f32 %v864_v56, %v864_v56  ;;  %v1862_v58 = vperm.slane %v864_v56, 0 }
 0x13a   : > { %v867_v52 = vsub.f32 %v865_v51, %v866_v50  ;;  %v901_v60 = vsub.f32 %v1714_v43, %v1862_v58  ;;  %v902_v37 = vsub.f32 %v1717_v49, %v1862_v58  ;;  %v903_v7 = vsub.f32 %v1720_v55, %v1862_v58 }
 0x13b   : > { %v904_v45 = vsub.f32 %v1748_v30, %v1862_v58  ;;  %v905_v19 = vsub.f32 %v1757_v36, %v1862_v58  ;;  %v906_v43 = vsub.f32 %v1763_v44, %v1862_v58  ;;  %v907_v49 = vsub.f32 %v1771_v54, %v1862_v58  ;;  %v1443_v54 = vld [vmem:[%s1860_s20 + $0x18] sm:$0xff]  }
 0x13c   : > { %v868_v21 = vmax.f32 %v867_v52, 0.0  ;;  %v908_v55 = vsub.f32 %v1777_v2, %v1862_v58  ;;  %v909_v28 = vsub.f32 %v1783_v13, %v1862_v58  ;;  %v910_v30 = vsub.f32 %v1788_v22, %v1862_v58 }
 0x13d   : > { %v911_v36 = vsub.f32 %v1795_v25, %v1862_v58  ;;  %v912_v44 = vsub.f32 %v1801_v34, %v1862_v58  ;;  %v913_v2 = vsub.f32 %v1809_v41, %v1862_v58  ;;  %v914_v13 = vsub.f32 %v1830_v11, %v1862_v58  ;;  %v1444_v25 = vld [vmem:[%s1860_s20 + $0x20] sm:$0xff]  }
 0x13e   : > { %v869_v53 = vadd.f32 1e-05, %v868_v21  ;;  %v915_v22 = vsub.f32 %v1826_v5, %v1862_v58  ;;  %v916_v1 = vsub.f32 %v1833_v10, %v1862_v58  ;;  %v917_v34 = vsub.f32 %v1838_v14, %v1862_v58 }
 0x13f   : > { %v918_v41 = vsub.f32 %v1843_v20, %v1862_v58  ;;  %v1370_v11 = vunpack.c.l.bf16 %v1442_v18  ;;  %v1374_v29 = vunpack.c.l.bf16 %v1443_v54  ;;  %v1375_v5 = vunpack.c.h.bf16 %v1443_v54 }
 0x140   : > { %1502 = vrsqrt.f32 %v869_v53  ;;  %vm876_vm2 = vweird.f32 %v869_v53  ;;  %v1378_v32 = vunpack.c.l.bf16 %v1444_v25  ;;  %v1379_v33 = vunpack.c.h.bf16 %v1444_v25 }
 0x141   : > { %v1387_v14 = vunpack.c.h.bf16 %v1446_v26  ;;  %v1394_v20 = vunpack.c.l.bf16 %v1448_v31 }
 0x146   : > { %v1503_v61 = vpop.eup %1502 }
 0x147   : > { %v871_v62 = vmul.f32 %v1503_v61, %v869_v53  ;;  %vm877_vm1 = vweird.f32 %v1503_v61 }
 0x148   : > { %vm878_vm3 = vmor %vm876_vm2, %vm877_vm1 }
 0x149   : > { %v872_v63 = vmul.f32 %v1503_v61, %v871_v62 }
 0x14b   : > { %v873_v17 = vmul.f32 0.5, %v872_v63 }
 0x14d   : > { %v874_v0 = vsub.f32 1.5, %v873_v17 }
 0x14f   : > { %v875_v24 = vmul.f32 %v1503_v61, %v874_v0 }
 0x151   : > { %v879_v10 = vsel %vm878_vm3, %v1503_v61, %v875_v24 }
 0x152   : > { %v920_v35 = vperm.slane %v879_v10, 0 }
 0x154   : > { %v922_v46 = vmul.f32 %v920_v35, %v901_v60  ;;  %v923_v47 = vmul.f32 %v920_v35, %v902_v37  ;;  %v924_v15 = vmul.f32 %v920_v35, %v903_v7  ;;  %v925_v56 = vmul.f32 %v920_v35, %v904_v45 }
 0x155   : > { %v926_v48 = vmul.f32 %v920_v35, %v905_v19  ;;  %v927_v51 = vmul.f32 %v920_v35, %v906_v43  ;;  %v928_v50 = vmul.f32 %v920_v35, %v907_v49  ;;  %v929_v52 = vmul.f32 %v920_v35, %v908_v55 }
 0x156   : > { %v930_v21 = vmul.f32 %v920_v35, %v909_v28  ;;  %v931_v53 = vmul.f32 %v920_v35, %v910_v30  ;;  %v932_v61 = vmul.f32 %v920_v35, %v911_v36  ;;  %v933_v58 = vmul.f32 %v920_v35, %v912_v44 }
 0x157   : > { %v934_v62 = vmul.f32 %v920_v35, %v913_v2  ;;  %v935_v63 = vmul.f32 %v920_v35, %v914_v13  ;;  %v936_v17 = vmul.f32 %v920_v35, %v915_v22  ;;  %v937_v0 = vmul.f32 %v920_v35, %v916_v1 }
 0x158   : > { %v938_v18 = vmul.f32 %v920_v35, %v917_v34  ;;  %v939_v54 = vmul.f32 %v920_v35, %v918_v41  ;;  %v976_v60 = vadd.f32 %v1362_v3, %v922_v46  ;;  %v977_v37 = vadd.f32 %v1363_v6, %v923_v47 }
 0x159   : > { %v978_v7 = vadd.f32 %v1366_v9, %v924_v15  ;;  %v979_v45 = vadd.f32 %v1367_v16, %v925_v56  ;;  %v980_v19 = vadd.f32 %v1370_v11, %v926_v48  ;;  %v981_v43 = vadd.f32 %v1371_v27, %v927_v51 }
 0x15a   : > { %v982_v49 = vadd.f32 %v1374_v29, %v928_v50  ;;  %v983_v55 = vadd.f32 %v1375_v5, %v929_v52  ;;  %v984_v28 = vadd.f32 %v1378_v32, %v930_v21  ;;  %v985_v30 = vadd.f32 %v1379_v33, %v931_v53 }
 0x15b   : > { %v986_v36 = vadd.f32 %v1382_v8, %v932_v61  ;;  %v987_v44 = vadd.f32 %v1383_v38, %v933_v58  ;;  %v988_v2 = vadd.f32 %v1386_v39, %v934_v62  ;;  %v989_v13 = vadd.f32 %v1387_v14, %v935_v63 }
 0x15c   : > { %v990_v59 = vadd.f32 %v1390_v40, %v936_v17  ;;  %v991_v3 = vadd.f32 %v1391_v12, %v937_v0  ;;  %v1399_v6 = vpack.c.bf16 %v977_v37, %v976_v60  ;;  %v1404_v57 = vpack.c.bf16 %v979_v45, %v978_v7 }
 0x15d   : > { %v1409_v9 = vpack.c.bf16 %v981_v43, %v980_v19  ;;  %v1414_v16 = vpack.c.bf16 %v983_v55, %v982_v49  ;;  %v1424_v22 = vpack.c.bf16 %v987_v44, %v986_v36  ;;  %v1429_v1 = vpack.c.bf16 %v989_v13, %v988_v2 }
 0x15e   : > { %v1434_v25 = vpack.c.bf16 %v991_v3, %v990_v59  ;;  %v992_v23 = vadd.f32 %v1394_v20, %v938_v18  ;;  %v993_v24 = vadd.f32 %v1395_v42, %v939_v54  ;;  %1400 = vst [vmem:[%s248_s23] sm:$0xff] %v1399_v6   ;;  %v1419_v34 = vpack.c.bf16 %v985_v30, %v984_v28 }
 0x15f   : > { %1449 = vst [vmem:[%s248_s23 + $0x8] sm:$0xff] %v1404_v57  }
 0x160   : > { %1450 = vst [vmem:[%s248_s23 + $0x10] sm:$0xff] %v1409_v9   ;;  %v1439_v41 = vpack.c.bf16 %v993_v24, %v992_v23 }
 0x161   : > { %1451 = vst [vmem:[%s248_s23 + $0x18] sm:$0xff] %v1414_v16  }
 0x162   : > { %1452 = vst [vmem:[%s248_s23 + $0x20] sm:$0xff] %v1419_v34  }
 0x163   : > { %1453 = vst [vmem:[%s248_s23 + $0x28] sm:$0xff] %v1424_v22  }
 0x164   : > { %1454 = vst [vmem:[%s248_s23 + $0x30] sm:$0xff] %v1429_v1  }
 0x165   : > { %1455 = vst [vmem:[%s248_s23 + $0x38] sm:$0xff] %v1434_v25  }
 0x166   : > { %1456 = vst [vmem:[%s248_s23 + $0x40] sm:$0xff] %v1439_v41  }
 0x167 PF: > { %s14_s17 = sadd.s32 1, %s1526_s17   ;;  %s1945_s15 = smov %s1522_s16 }
 0x168   : > { %p11_p5 = scmp.ge.s32.totalorder %s14_s17, 4   ;;  %s1946_s16 = smov %s1948_s18 }
 0x16a   :  { %13 = sbr.rel (!%p11_p5) target bundleno = 2 (0x2), region = 82 }

</bundles_post_ra>
